<compile_context>
chip_gen: v6e
topology: v6e:2x2x1
jax: 0.10.0
libtpu: 0.0.40
codegen_flags: <defaults>
</compile_context>

<pallas_src>
import functools

import jax
import jax.numpy as jnp
from jax.experimental import pallas as pl
from jax.experimental.pallas import tpu as pltpu


def _round_up(n, m):
    return ((n + m - 1) // m) * m


_ACTIVATIONS = {
    "relu": lambda v: jnp.maximum(v, 0.0),
    "sigmoid": jax.nn.sigmoid,
    "tanh": jnp.tanh,
    "softplus": jax.nn.softplus,
}


def _noisy_mlp_kernel(x_ref, w1_ref, b1_ref, w2_ref, b2_ref, w3_ref, b3_ref,
                      o_ref, *, act):
    # Layer 1: cast the f32 activation tile to bf16 in-kernel (rides on idle
    # VPU/load slots under the MXU work), matmul with f32 accumulation, then
    # f32 bias-add + activation epilogue.
    x = x_ref[...].astype(w1_ref.dtype)
    h1 = jnp.dot(x, w1_ref[...], preferred_element_type=jnp.float32)
    h1 = act(h1 + b1_ref[...])
    # Layer 2
    h2 = jnp.dot(h1.astype(w2_ref.dtype), w2_ref[...],
                 preferred_element_type=jnp.float32)
    h2 = act(h2 + b2_ref[...])
    # Output layer (no activation); store bf16, lane-dense.
    out = jnp.dot(h2.astype(w3_ref.dtype), w3_ref[...],
                  preferred_element_type=jnp.float32) + b3_ref[...]
    o_ref[...] = out.astype(o_ref.dtype)


def prepare_params(params, compute_dtype=jnp.bfloat16):
    """One-time pad/cast of weights (hoisted out of the per-call path).

    params: (w1, b1, w2, b2, w3, b3), weights stored (in_features, out_features)
    -- the transpose of nn.Linear's (out, in) layout but the identical forward
    y = x @ W + b. Returns padded/cast device arrays plus static padded dims.
    """
    w1, b1, w2, b2, w3, b3 = params
    D, H1r = w1.shape
    H2r = w2.shape[1]
    n_cls = w3.shape[1]

    # Minimal 128-lane padding; zeros are numerically exact through the MLP.
    Dp = _round_up(D, 128)
    H1 = _round_up(H1r, 128)      # 300 -> 384
    H2 = _round_up(H2r, 128)      # 100 -> 128
    NC = _round_up(n_cls, 128)    # n_cls -> 128 (lane-dense output)

    def pad2(a, rows, cols):
        return jnp.pad(a, ((0, rows - a.shape[0]), (0, cols - a.shape[1])))

    weights = (
        pad2(w1, Dp, H1).astype(compute_dtype),
        pad2(b1.reshape(1, -1), 1, H1).astype(jnp.float32),
        pad2(w2, H1, H2).astype(compute_dtype),
        pad2(b2.reshape(1, -1), 1, H2).astype(jnp.float32),
        pad2(w3, H2, NC).astype(compute_dtype),
        pad2(b3.reshape(1, -1), 1, NC).astype(jnp.float32),
    )
    dims = dict(D=D, Dp=Dp, H1=H1, H2=H2, NC=NC, n_cls=n_cls)
    return weights, dims


def _per_chip_defaults():
    """(batch_tile, vmem_limit_bytes) re-derived per TPU generation."""
    try:
        kind = jax.devices()[0].device_kind.lower()
    except Exception:
        kind = ""
    if "v7" in kind:                       # 64 MiB physical VMEM per TC
        return 1024, 48 * 1024 * 1024
    if "v5" in kind or "v6" in kind:       # 128 MiB physical VMEM
        return 2048, 64 * 1024 * 1024
    return 512, 32 * 1024 * 1024           # conservative fallback (v3/v4/unknown)


def noisy_mlp_forward(x, prepared, *, activation_fn="relu",
                      batch_tile=None, vmem_limit_bytes=None):
    """x: (B, C, H, W) or (B, D), native dtype (f32). Returns f32 (B, n_cls)."""
    weights, dims = prepared
    w1p, b1p, w2p, b2p, w3p, b3p = weights
    D, Dp, H1, H2, NC, n_cls = (dims["D"], dims["Dp"], dims["H1"], dims["H2"],
                                dims["NC"], dims["n_cls"])

    B = x.shape[0]
    x2d = x.reshape(B, -1)                  # x.view(x.size(0), -1); stays f32
    assert x2d.shape[1] == D, f"flattened input dim {x2d.shape[1]} != {D}"
    if D != Dp:                             # feature-dim pad only when needed
        x2d = jnp.pad(x2d, ((0, 0), (0, Dp - D)))

    tb_def, vmem_def = _per_chip_defaults()
    if batch_tile is None:
        batch_tile = tb_def
    if vmem_limit_bytes is None:
        vmem_limit_bytes = vmem_def

    # Batch tile: multiple of 128 rows, no batch padding -- Pallas masks the
    # ragged last tile.
    TB = min(batch_tile, _round_up(B, 128))
    grid = (pl.cdiv(B, TB),)

    # Weights/biases: constant index_map -> fetched once, VMEM-resident.
    def resident(shape):
        return pl.BlockSpec(shape, lambda i: (0, 0))

    rows = TB * grid[0]
    flops = 2 * rows * (Dp * H1 + H1 * H2 + H2 * NC)
    transcendentals = 0 if activation_fn == "relu" else rows * (H1 + H2)
    bytes_accessed = (
        rows * Dp * x2d.dtype.itemsize
        + sum(int(a.size) * a.dtype.itemsize for a in weights)
        + rows * NC * 2                      # bf16 output
    )

    kernel = functools.partial(_noisy_mlp_kernel,
                               act=_ACTIVATIONS[activation_fn])

    out = pl.pallas_call(
        kernel,
        out_shape=jax.ShapeDtypeStruct((B, NC), jnp.bfloat16),
        grid=grid,
        in_specs=[
            pl.BlockSpec((TB, Dp), lambda i: (i, 0)),   # x tile (pipelined, f32)
            resident((Dp, H1)), resident((1, H1)),      # W1, b1 (resident)
            resident((H1, H2)), resident((1, H2)),      # W2, b2
            resident((H2, NC)), resident((1, NC)),      # W3, b3
        ],
        out_specs=pl.BlockSpec((TB, NC), lambda i: (i, 0)),
        compiler_params=pltpu.CompilerParams(
            # "parallel" lets the runtime shard the batch axis across v7x's two
            # TensorCores; switch to pltpu.CORE_PARALLEL if a v7x profile shows
            # one TC idle.
            dimension_semantics=("parallel",),
            vmem_limit_bytes=vmem_limit_bytes,
        ),
        cost_estimate=pl.CostEstimate(
            flops=flops, transcendentals=transcendentals,
            bytes_accessed=bytes_accessed),
    )(x2d, w1p, b1p, w2p, b2p, w3p, b3p)

    # Tiny (B, n_cls) slice; return f32 logits like the PyTorch module.
    return out[:, :n_cls].astype(jnp.float32)


def init_params(key, input_dim, n_cls, layer_dims=(300, 100), dtype=jnp.float32):
    """Deterministic PyTorch-style (uniform +/- 1/sqrt(fan_in)) initialization.
    Weights stored transposed: (in_features, out_features); biases (1, out)."""
    dims = [input_dim] + list(layer_dims) + [n_cls]
    params = []
    for i in range(len(dims) - 1):
        fan_in, fan_out = dims[i], dims[i + 1]
        key, kw, kb = jax.random.split(key, 3)
        bound = 1.0 / (fan_in ** 0.5)
        w = jax.random.uniform(kw, (fan_in, fan_out), dtype, -bound, bound)
        b = jax.random.uniform(kb, (1, fan_out), dtype, -bound, bound)
        params += [w, b]
    return tuple(params)


if __name__ == "__main__":
    key = jax.random.PRNGKey(0)
    k_x, k_p = jax.random.split(key)

    # Small, module-consistent shapes: batch=2, NCHW image input of 4x16x16
    B, C, H, W = 2, 4, 16, 16
    input_dim = C * H * W          # 1024 after flatten
    n_cls = 10
    layer_dims = (300, 100)        # module defaults

    x = jax.random.normal(k_x, (B, C, H, W), dtype=jnp.float32)
    params = init_params(k_p, input_dim, n_cls, layer_dims)

    prepared = prepare_params(params)          # one-time pad/cast (hoisted)
    forward = jax.jit(lambda xx: noisy_mlp_forward(xx, prepared))

    out = forward(x)
    jax.block_until_ready(out)
    assert out.shape == (B, n_cls)
    assert out.dtype == jnp.float32

    # Reference with matching numerics (bf16 matmul inputs, f32 accumulation,
    # f32 bias/ReLU epilogue, bf16 logits store).
    x2d = x.reshape(B, -1)
    w1, b1, w2, b2, w3, b3 = params
    cd = jnp.bfloat16
    ref = jnp.maximum(
        jnp.dot(x2d.astype(cd), w1.astype(cd),
                preferred_element_type=jnp.float32) + b1, 0.0)
    ref = jnp.maximum(
        jnp.dot(ref.astype(cd), w2.astype(cd),
                preferred_element_type=jnp.float32) + b2, 0.0)
    ref = (jnp.dot(ref.astype(cd), w3.astype(cd),
                   preferred_element_type=jnp.float32) + b3)
    ref = ref.astype(cd).astype(jnp.float32)   # kernel stores logits in bf16

    assert jnp.allclose(out, ref, atol=5e-2, rtol=5e-2), (
        "max abs err = %s" % jnp.max(jnp.abs(out - ref)))

    print("KERNEL_OK")
</pallas_src>

<mosaic_0001>
module attributes {stable_mosaic.version = 11 : i64} {
  func.func @_noisy_mlp_kernel(%arg0: i32, %arg1: memref<128x1024xf32, #tpu.memory_space<vmem>>, %arg2: memref<1024x384xbf16, #tpu.memory_space<vmem>>, %arg3: memref<1x384xf32, #tpu.memory_space<vmem>>, %arg4: memref<384x128xbf16, #tpu.memory_space<vmem>>, %arg5: memref<1x128xf32, #tpu.memory_space<vmem>>, %arg6: memref<128x128xbf16, #tpu.memory_space<vmem>>, %arg7: memref<1x128xf32, #tpu.memory_space<vmem>>, %arg8: memref<128x128xbf16, #tpu.memory_space<vmem>>) attributes {dimension_semantics = [#tpu.dimension_semantics<parallel>], iteration_bounds = array<i64: 1>, scalar_prefetch = 0 : i64, scratch_operands = 0 : i64, tpu.core_type = #tpu.core_type<tc>, window_params = [{transform_indices = @transform_0, window_bounds = array<i64: 128, 1024>}, {pipeline_mode = #tpu.pipeline_mode<synchronous>, transform_indices = @transform_1, window_bounds = array<i64: 1024, 384>}, {pipeline_mode = #tpu.pipeline_mode<synchronous>, transform_indices = @transform_2, window_bounds = array<i64: 1, 384>}, {pipeline_mode = #tpu.pipeline_mode<synchronous>, transform_indices = @transform_3, window_bounds = array<i64: 384, 128>}, {pipeline_mode = #tpu.pipeline_mode<synchronous>, transform_indices = @transform_4, window_bounds = array<i64: 1, 128>}, {pipeline_mode = #tpu.pipeline_mode<synchronous>, transform_indices = @transform_5, window_bounds = array<i64: 128, 128>}, {pipeline_mode = #tpu.pipeline_mode<synchronous>, transform_indices = @transform_6, window_bounds = array<i64: 1, 128>}, {transform_indices = @transform_7, window_bounds = array<i64: 128, 128>}]} {
    %c0 = arith.constant 0 : index
    %c0_0 = arith.constant 0 : index
    %0 = vector.load %arg1[%c0, %c0_0] : memref<128x1024xf32, #tpu.memory_space<vmem>>, vector<128x1024xf32>
    %1 = arith.truncf %0 : vector<128x1024xf32> to vector<128x1024xbf16>
    %c0_1 = arith.constant 0 : index
    %c0_2 = arith.constant 0 : index
    %2 = vector.load %arg2[%c0_1, %c0_2] : memref<1024x384xbf16, #tpu.memory_space<vmem>>, vector<1024x384xbf16>
    %cst = arith.constant dense<0.000000e+00> : vector<128x384xf32>
    %3 = tpu.matmul %1, %2, %cst {dimension_numbers = #tpu.dot_dimension_numbers<[1], [0], [0], [1], [0, 0, 1, 1], [], []>} : vector<128x1024xbf16>, vector<1024x384xbf16>, vector<128x384xf32> -> vector<128x384xf32>
    %c0_3 = arith.constant 0 : index
    %c0_4 = arith.constant 0 : index
    %4 = vector.load %arg3[%c0_3, %c0_4] : memref<1x384xf32, #tpu.memory_space<vmem>>, vector<1x384xf32>
    %5 = vector.broadcast %4 : vector<1x384xf32> to vector<128x384xf32>
    %6 = arith.addf %3, %5 : vector<128x384xf32>
    %cst_5 = arith.constant 0.000000e+00 : f32
    %7 = vector.broadcast %cst_5 : f32 to vector<128x384xf32>
    %8 = arith.maximumf %6, %7 : vector<128x384xf32>
    %9 = arith.truncf %8 : vector<128x384xf32> to vector<128x384xbf16>
    %c0_6 = arith.constant 0 : index
    %c0_7 = arith.constant 0 : index
    %10 = vector.load %arg4[%c0_6, %c0_7] : memref<384x128xbf16, #tpu.memory_space<vmem>>, vector<384x128xbf16>
    %cst_8 = arith.constant dense<0.000000e+00> : vector<128x128xf32>
    %11 = tpu.matmul %9, %10, %cst_8 {dimension_numbers = #tpu.dot_dimension_numbers<[1], [0], [0], [1], [0, 0, 1, 1], [], []>} : vector<128x384xbf16>, vector<384x128xbf16>, vector<128x128xf32> -> vector<128x128xf32>
    %c0_9 = arith.constant 0 : index
    %c0_10 = arith.constant 0 : index
    %12 = vector.load %arg5[%c0_9, %c0_10] : memref<1x128xf32, #tpu.memory_space<vmem>>, vector<1x128xf32>
    %13 = vector.broadcast %12 : vector<1x128xf32> to vector<128x128xf32>
    %14 = arith.addf %11, %13 : vector<128x128xf32>
    %cst_11 = arith.constant 0.000000e+00 : f32
    %15 = vector.broadcast %cst_11 : f32 to vector<128x128xf32>
    %16 = arith.maximumf %14, %15 : vector<128x128xf32>
    %17 = arith.truncf %16 : vector<128x128xf32> to vector<128x128xbf16>
    %c0_12 = arith.constant 0 : index
    %c0_13 = arith.constant 0 : index
    %18 = vector.load %arg6[%c0_12, %c0_13] : memref<128x128xbf16, #tpu.memory_space<vmem>>, vector<128x128xbf16>
    %cst_14 = arith.constant dense<0.000000e+00> : vector<128x128xf32>
    %19 = tpu.matmul %17, %18, %cst_14 {dimension_numbers = #tpu.dot_dimension_numbers<[1], [0], [0], [1], [0, 0, 1, 1], [], []>} : vector<128x128xbf16>, vector<128x128xbf16>, vector<128x128xf32> -> vector<128x128xf32>
    %c0_15 = arith.constant 0 : index
    %c0_16 = arith.constant 0 : index
    %20 = vector.load %arg7[%c0_15, %c0_16] : memref<1x128xf32, #tpu.memory_space<vmem>>, vector<1x128xf32>
    %21 = vector.broadcast %20 : vector<1x128xf32> to vector<128x128xf32>
    %22 = arith.addf %19, %21 : vector<128x128xf32>
    %23 = arith.truncf %22 : vector<128x128xf32> to vector<128x128xbf16>
    %c0_17 = arith.constant 0 : index
    %c0_18 = arith.constant 0 : index
    %24 = vector.load %arg8[%c0_17, %c0_18] : memref<128x128xbf16, #tpu.memory_space<vmem>>, vector<128x128xbf16>
    tpu.vector_store %arg8[%c0_17, %c0_18], %23 {strides = array<i32>} : memref<128x128xbf16, #tpu.memory_space<vmem>>, vector<128x128xbf16>,
    return
  }
  func.func @transform_0(%arg0: i32) -> (i32, i32) {
    %c0_i32 = arith.constant 0 : i32
    %c0_i32_0 = arith.constant 0 : i32
    return %arg0, %c0_i32 : i32, i32
  }
  func.func @transform_1(%arg0: i32) -> (i32, i32) {
    %c0_i32 = arith.constant 0 : i32
    %c0_i32_0 = arith.constant 0 : i32
    %c0_i32_1 = arith.constant 0 : i32
    return %c0_i32, %c0_i32_0 : i32, i32
  }
  func.func @transform_2(%arg0: i32) -> (i32, i32) {
    %c0_i32 = arith.constant 0 : i32
    %c0_i32_0 = arith.constant 0 : i32
    %c0_i32_1 = arith.constant 0 : i32
    return %c0_i32, %c0_i32_0 : i32, i32
  }
  func.func @transform_3(%arg0: i32) -> (i32, i32) {
    %c0_i32 = arith.constant 0 : i32
    %c0_i32_0 = arith.constant 0 : i32
    %c0_i32_1 = arith.constant 0 : i32
    return %c0_i32, %c0_i32_0 : i32, i32
  }
  func.func @transform_4(%arg0: i32) -> (i32, i32) {
    %c0_i32 = arith.constant 0 : i32
    %c0_i32_0 = arith.constant 0 : i32
    %c0_i32_1 = arith.constant 0 : i32
    return %c0_i32, %c0_i32_0 : i32, i32
  }
  func.func @transform_5(%arg0: i32) -> (i32, i32) {
    %c0_i32 = arith.constant 0 : i32
    %c0_i32_0 = arith.constant 0 : i32
    %c0_i32_1 = arith.constant 0 : i32
    return %c0_i32, %c0_i32_0 : i32, i32
  }
  func.func @transform_6(%arg0: i32) -> (i32, i32) {
    %c0_i32 = arith.constant 0 : i32
    %c0_i32_0 = arith.constant 0 : i32
    %c0_i32_1 = arith.constant 0 : i32
    return %c0_i32, %c0_i32_0 : i32, i32
  }
  func.func @transform_7(%arg0: i32) -> (i32, i32) {
    %c0_i32 = arith.constant 0 : i32
    %c0_i32_0 = arith.constant 0 : i32
    return %arg0, %c0_i32 : i32, i32
  }
}

</mosaic_0001>

<bundles_post_ra>
// kernel: _lambda_.1
= control target key start
LH: loop header
LB: loop body
LE: loop exit
PB: predicated region body
PF: predicated region fallthrough
CT: control target
= control target key end

     0   :  { %12 = vsyncpa [#allocation3], 0  ;;  %s7455_s0 = inlined_call_operand.vmem [shape: f32[2,1024], index: 0, kind: input, shape index: {}]   ;;  %s7456_s1 = inlined_call_operand.hbm [shape: bf16[1024,384], index: 1, kind: input, shape index: {}]   ;;  %s7457_s2 = inlined_call_operand.vmem [shape: f32[1,384], index: 2, kind: input, shape index: {}]   ;;  %s7458_s3 = inlined_call_operand.hbm [shape: bf16[384,128], index: 3, kind: input, shape index: {}]   ;;  %s7459_s4 = inlined_call_operand.vmem [shape: f32[1,128], index: 4, kind: input, shape index: {}]   ;;  %s7460_s5 = inlined_call_operand.vmem [shape: bf16[128,128], index: 5, kind: input, shape index: {}]   ;;  %s7461_s6 = inlined_call_operand.vmem [shape: f32[1,128], index: 6, kind: input, shape index: {}]   ;;  %s7462_s7 = inlined_call_operand.vmem [shape: bf16[2,128], index: 7, kind: output, shape index: {}]  }
   0x1   :  { %13 = vsyncpa [#allocation5], 0  ;;  %s6242_s24 = smov [#allocation2]  }
   0x2   :  { %s21_s25 = sshll.u32 %s6242_s24, 4  ;;  %s22_s25 = int_to_ptr.vmem [resolvable:$true] %s21_s25 }
   0x3   :  { %s6206_s26 = scalar_lea.vmem %s22_s25, 24576  ;;  %p6211_p1 = scmp.lt.s32.totalorder %s22_s25, %s22_s25 }
   0x4   :  { %p6207_p0 = scmp.ne.s32.totalorder %s22_s25, %s6206_s26  ;;  %p6212_p2 = scmp.lt.s32.totalorder %s6206_s26, %s6206_s26 }
   0x6   :  { %p6213_p3 = por %p6212_p2, %p6211_p1 }
   0x8   :  { %p6214_p4 = pnand %p6213_p3, %p6207_p0 }
   0xa   :  { %6217 = shalt.err (!%p6214_p4)
}
   0xb   :  { %s6243_s27 = smov 192   ;;  %s6244_s28 = smov 12  }
   0xc   :  { %27 = dma.hbm_to_vmem [thread:$0]  %s7456_s1, 24576, %s22_s25, [#allocation3], %s6243_s27, %s6243_s27, %s6244_s28  }
   0xd   :  { %s6245_s8 = smov [#allocation4]  }
   0xe   :  { %s35_s9 = sshll.u32 %s6245_s8, 4  ;;  %s36_s9 = int_to_ptr.vmem [resolvable:$true] %s35_s9 }
   0xf   :  { %s6226_s10 = scalar_lea.vmem %s36_s9, 3072  ;;  %p6231_p6 = scmp.lt.s32.totalorder %s36_s9, %s36_s9 }
  0x10   :  { %p6227_p5 = scmp.ne.s32.totalorder %s36_s9, %s6226_s10  ;;  %p6232_p7 = scmp.lt.s32.totalorder %s6226_s10, %s6226_s10 }
  0x12   :  { %p6233_p8 = por %p6232_p7, %p6231_p6 }
  0x14   :  { %p6234_p9 = pnand %p6233_p8, %p6227_p5 }
  0x16   :  { %6237 = shalt.err (!%p6234_p9)
}
  0x17   :  { %s6246_s11 = smov 64   ;;  %s6247_s12 = smov 4  }
  0x18   :  { %41 = dma.hbm_to_vmem [thread:$0]  %s7458_s3, 3072, %s36_s9, [#allocation5], %s6246_s11, %s6246_s11, %s6247_s12  }
  0x19   :  { %6238 = dma.done.wait [#allocation3], 24576  }
  0x1a   :  { %6239 = vsyncadd [#allocation3], 4294942720 }
  0x1b   :  { %6240 = dma.done.wait [#allocation5], 3072  }
  0x1c   :  { %6241 = vsyncadd [#allocation5], 4294964224  ;;  %v5718_v0 = vld [vmem:[#allocation2 + $0xac] ss:$12 sps:$4 sm:$0xff]   ;;  %v5722_v2 = vld [vmem:[#allocation2 + $0xa8] ss:$12 sps:$4 sm:$0xff]   ;;  %v318_v41 = vlaneseq }
  0x1d   :  { %v5720_v1 = vld [vmem:[#allocation2 + $0x22c] ss:$12 sps:$4 sm:$0xff]   ;;  %2952 = vmatprep.subr.bf16.mxu0 %v5718_v0  ;;  %v5723_v3 = vld [vmem:[#allocation2 + $0x228] ss:$12 sps:$4 sm:$0xff]   ;;  %v5728_v6 = vld [vmem:[#allocation2 + $0x90] ss:$12 sps:$4 sm:$0xff]  }
  0x1e   :  { %3065 = vmatprep.subr.bf16.mxu1 %v5720_v1  ;;  %v5724_v4 = vld [vmem:[#allocation2 + $0x94] ss:$12 sps:$4 sm:$0xff]   ;;  %2953 = vmatpush1.bf16.msra.mxu0 %v5722_v2  ;;  %v5729_v7 = vld [vmem:[#allocation2 + $0x210] ss:$12 sps:$4 sm:$0xff]   ;;  %v5734_v10 = vld [vmem:[#allocation2 + $0x78] ss:$12 sps:$4 sm:$0xff]  }
  0x1f   :  { %3066 = vmatpush1.bf16.msra.mxu1 %v5723_v3  ;;  %v5726_v5 = vld [vmem:[#allocation2 + $0x214] ss:$12 sps:$4 sm:$0xff]   ;;  %2954 = vmatprep.subr.bf16.mxu0 %v5724_v4  ;;  %v5730_v8 = vld [vmem:[#allocation2 + $0x7c] ss:$12 sps:$4 sm:$0xff]   ;;  %v5735_v11 = vld [vmem:[#allocation2 + $0x1f8] ss:$12 sps:$4 sm:$0xff]  }
  0x20   :  { %3067 = vmatprep.subr.bf16.mxu1 %v5726_v5  ;;  %v5732_v9 = vld [vmem:[#allocation2 + $0x1fc] ss:$12 sps:$4 sm:$0xff]   ;;  %v5736_v12 = vld [vmem:[#allocation2 + $0x64] ss:$12 sps:$4 sm:$0xff]   ;;  %v5740_v14 = vld [vmem:[#allocation2 + $0x60] ss:$12 sps:$4 sm:$0xff]  }
  0x21   :  { %v5738_v13 = vld [vmem:[#allocation2 + $0x1e4] ss:$12 sps:$4 sm:$0xff]   ;;  %v5741_v15 = vld [vmem:[#allocation2 + $0x1e0] ss:$12 sps:$4 sm:$0xff]   ;;  %v5746_v18 = vld [vmem:[#allocation2 + $0x48] ss:$12 sps:$4 sm:$0xff]  }
  0x22   :  { %2955 = vmatpush1.bf16.msra.mxu0 %v5728_v6  ;;  %v5742_v16 = vld [vmem:[#allocation2 + $0x4c] ss:$12 sps:$4 sm:$0xff]   ;;  %v5747_v19 = vld [vmem:[#allocation2 + $0x1c8] ss:$12 sps:$4 sm:$0xff]   ;;  %v5752_v22 = vld [vmem:[#allocation2 + $0x30] ss:$12 sps:$4 sm:$0xff]  }
  0x23   :  { %3068 = vmatpush1.bf16.msra.mxu1 %v5729_v7  ;;  %2956 = vmatprep.subr.bf16.mxu0 %v5730_v8  ;;  %v5744_v17 = vld [vmem:[#allocation2 + $0x1cc] ss:$12 sps:$4 sm:$0xff]   ;;  %v5748_v20 = vld [vmem:[#allocation2 + $0x34] ss:$12 sps:$4 sm:$0xff]   ;;  %v5753_v23 = vld [vmem:[#allocation2 + $0x1b0] ss:$12 sps:$4 sm:$0xff]  }
  0x24   :  { %3069 = vmatprep.subr.bf16.mxu1 %v5732_v9  ;;  %v5750_v21 = vld [vmem:[#allocation2 + $0x1b4] ss:$12 sps:$4 sm:$0xff]   ;;  %v5754_v24 = vld [vmem:[#allocation2 + $0x1c] ss:$12 sps:$4 sm:$0xff]   ;;  %v5758_v26 = vld [vmem:[#allocation2 + $0x18] ss:$12 sps:$4 sm:$0xff]  }
  0x25   :  { %v5756_v25 = vld [vmem:[#allocation2 + $0x19c] ss:$12 sps:$4 sm:$0xff]   ;;  %v5759_v27 = vld [vmem:[#allocation2 + $0x198] ss:$12 sps:$4 sm:$0xff]   ;;  %v5764_v30 = vld [vmem:[#allocation2] ss:$12 sps:$4 sm:$0xff]  }
  0x26   :  { %2957 = vmatpush1.bf16.msra.mxu0 %v5734_v10  ;;  %v5760_v28 = vld [vmem:[#allocation2 + $0x4] ss:$12 sps:$4 sm:$0xff]   ;;  %v5765_v31 = vld [vmem:[#allocation2 + $0x180] ss:$12 sps:$4 sm:$0xff]   ;;  %v5770_v34 = vld [vmem:[#allocation2 + $0x168] ss:$12 sps:$4 sm:$0xff]  }
  0x27   :  { %3070 = vmatpush1.bf16.msra.mxu1 %v5735_v11  ;;  %2958 = vmatprep.subr.bf16.mxu0 %v5736_v12  ;;  %v5762_v29 = vld [vmem:[#allocation2 + $0x184] ss:$12 sps:$4 sm:$0xff]   ;;  %v5766_v32 = vld [vmem:[#allocation2 + $0x16c] ss:$12 sps:$4 sm:$0xff]   ;;  %v5771_v35 = vld [vmem:[#allocation2 + $0x2e8] ss:$12 sps:$4 sm:$0xff]  }
  0x28   :  { %3071 = vmatprep.subr.bf16.mxu1 %v5738_v13  ;;  %v5768_v33 = vld [vmem:[#allocation2 + $0x2ec] ss:$12 sps:$4 sm:$0xff]   ;;  %v5772_v36 = vld [vmem:[#allocation2 + $0x154] ss:$12 sps:$4 sm:$0xff]   ;;  %v5776_v38 = vld [vmem:[#allocation2 + $0x150] ss:$12 sps:$4 sm:$0xff]  }
  0x29   :  { %v5774_v37 = vld [vmem:[#allocation2 + $0x2d4] ss:$12 sps:$4 sm:$0xff]   ;;  %v6248_v39 = vmov 1983009808   ;;  %v5777_v42 = vld [vmem:[#allocation2 + $0x2d0] ss:$12 sps:$4 sm:$0xff]  }
  0x2a   :  { %2959 = vmatpush1.bf16.msra.mxu0 %v5740_v14  ;;  %v316_v40 = vunpack.c.l.s4 %v6248_v39  ;;  %v5778_v43 = vld [vmem:[#allocation2 + $0x13c] ss:$12 sps:$4 sm:$0xff]   ;;  %v5782_v45 = vld [vmem:[#allocation2 + $0x138] ss:$12 sps:$4 sm:$0xff]   ;;  %v6296_v48 = vshrl.u32 %v318_v41, 7 }
  0x2b   :  { %3072 = vmatpush1.bf16.msra.mxu1 %v5741_v15  ;;  %2960 = vmatprep.subr.bf16.mxu0 %v5742_v16  ;;  %v5780_v44 = vld [vmem:[#allocation2 + $0x2bc] ss:$12 sps:$4 sm:$0xff]   ;;  %v5783_v46 = vld [vmem:[#allocation2 + $0x2b8] ss:$12 sps:$4 sm:$0xff]   ;;  %v5788_v51 = vld [vmem:[#allocation2 + $0x120] ss:$12 sps:$4 sm:$0xff]  }
  0x2c   :  { %3073 = vmatprep.subr.bf16.mxu1 %v5744_v17  ;;  %v317_v47 = vunpack.c.0.s8 %v316_v40  ;;  %v5784_v49 = vld [vmem:[#allocation2 + $0x124] ss:$12 sps:$4 sm:$0xff]   ;;  %v5789_v52 = vld [vmem:[#allocation2 + $0x2a0] ss:$12 sps:$4 sm:$0xff]   ;;  %v5794_v58 = vld [vmem:[#allocation2 + $0x108] ss:$12 sps:$4 sm:$0xff]  }
  0x2d   :  { %v5786_v50 = vld [vmem:[#allocation2 + $0x2a4] ss:$12 sps:$4 sm:$0xff]   ;;  %v5790_v53 = vld [vmem:[#allocation2 + $0x10c] ss:$12 sps:$4 sm:$0xff]   ;;  %v5795_v59 = vld [vmem:[#allocation2 + $0x288] ss:$12 sps:$4 sm:$0xff]  }
  0x2e   :  { %2961 = vmatpush1.bf16.msra.mxu0 %v5746_v18  ;;  %v5792_v54 = vld [vmem:[#allocation2 + $0x28c] ss:$12 sps:$4 sm:$0xff]   ;;  %v6299_v55 = vsub.s32 %v317_v47, %v6296_v48  ;;  %v5814_v56 = vld [vmem:[%s7455_s0] ss:$16 sps:$4 sm:$0xff]   ;;  %v5822_v62 = vld [vmem:[%s7455_s0 + $0x4] ss:$16 sps:$4 sm:$0xff]  }
  0x2f   :  { %3074 = vmatpush1.bf16.msra.mxu1 %v5747_v19  ;;  %2962 = vmatprep.subr.bf16.mxu0 %v5748_v20  ;;  %v5816_v57 = vld [vmem:[%s7455_s0 + $0x20] ss:$16 sps:$4 sm:$0xff]   ;;  %v5823_v1 = vld [vmem:[%s7455_s0 + $0x24] ss:$16 sps:$4 sm:$0xff]   ;;  %v5802_v17 = vld [vmem:[#allocation2 + $0xdc] ss:$12 sps:$4 sm:$0xff]  }
  0x30   :  { %3075 = vmatprep.subr.bf16.mxu1 %v5750_v21  ;;  %v5818_v60 = vld [vmem:[%s7455_s0 + $0x40] ss:$16 sps:$4 sm:$0xff]   ;;  %v6317_v63 = vrot.slane %v5814_v56, %v6299_v55  ;;  %v6320_v0 = vrot.slane %v5816_v57, %v6299_v55  ;;  %v5824_v2 = vld [vmem:[%s7455_s0 + $0x44] ss:$16 sps:$4 sm:$0xff]   ;;  %v6338_v7 = vrot.slane %v5822_v62, %v6299_v55  ;;  %v342_v10 = vrot.slane %v5823_v1, %v6299_v55  ;;  %v5804_v20 = vld [vmem:[#allocation2 + $0x25c] ss:$12 sps:$4 sm:$0xff]  }
  0x31   :  { %v5820_v61 = vld [vmem:[%s7455_s0 + $0x60] ss:$16 sps:$4 sm:$0xff]   ;;  %v5825_v3 = vld [vmem:[%s7455_s0 + $0x64] ss:$16 sps:$4 sm:$0xff]   ;;  %v6332_v5 = vrot.slane %v5818_v60, %v6299_v55  ;;  %v400_v11 = vrot.slane %v5824_v2, %v6299_v55 }
  0x32   :  { %2963 = vmatpush1.bf16.msra.mxu0 %v5752_v22  ;;  %v5796_v4 = vld [vmem:[#allocation2 + $0xf4] ss:$12 sps:$4 sm:$0xff]   ;;  %v6335_v6 = vrot.slane %v5820_v61, %v6299_v55  ;;  %v344_v9 = vcombine.high %v6317_v63, %v6320_v0  ;;  %v414_v13 = vrot.slane %v5825_v3, %v6299_v55  ;;  %v5800_v14 = vld [vmem:[#allocation2 + $0xf0] ss:$12 sps:$4 sm:$0xff]   ;;  %v346_v16 = vcombine.high %v6338_v7, %v342_v10  ;;  %v5806_v21 = vld [vmem:[#allocation2 + $0xd8] ss:$12 sps:$4 sm:$0xff]  }
  0x33   :  { %3076 = vmatpush1.bf16.msra.mxu1 %v5753_v23  ;;  %2964 = vmatprep.subr.bf16.mxu0 %v5754_v24  ;;  %v5798_v8 = vld [vmem:[#allocation2 + $0x274] ss:$12 sps:$4 sm:$0xff]   ;;  %v5801_v15 = vld [vmem:[#allocation2 + $0x270] ss:$12 sps:$4 sm:$0xff]   ;;  %v5807_v22 = vld [vmem:[#allocation2 + $0x258] ss:$12 sps:$4 sm:$0xff]  }
  0x34   :  { %3077 = vmatprep.subr.bf16.mxu1 %v5756_v25  ;;  %v416_v12 = vcombine.high %v6332_v5, %v6335_v6  ;;  %v418_v19 = vcombine.high %v400_v11, %v414_v13  ;;  %v5808_v24 = vld [vmem:[#allocation2 + $0xc4] ss:$12 sps:$4 sm:$0xff]   ;;  %v5812_v40 = vld [vmem:[#allocation2 + $0xc0] ss:$12 sps:$4 sm:$0xff]  }
  0x35   :  { %v5810_v25 = vld [vmem:[#allocation2 + $0x244] ss:$12 sps:$4 sm:$0xff]   ;;  %v5813_v41 = vld [vmem:[#allocation2 + $0x240] ss:$12 sps:$4 sm:$0xff]  }
  0x36   :  { %2965 = vmatpush1.bf16.msra.mxu0 %v5758_v26  ;;  %v6348_v18 = vpack.c.bf16 %v416_v12, %v344_v9  ;;  %v6351_v23 = vpack.c.bf16 %v418_v19, %v346_v16  ;;  %v5838_v26 = vld [vmem:[%s7455_s0 + $0x80] ss:$16 sps:$4 sm:$0xff]   ;;  %v5849_v39 = vld [vmem:[%s7455_s0 + $0xe4] ss:$16 sps:$4 sm:$0xff]  }
  0x37   :  { %3078 = vmatpush1.bf16.msra.mxu1 %v5759_v27  ;;  %2966 = vmatprep.subr.bf16.mxu0 %v5760_v28  ;;  %v5840_v27 = vld [vmem:[%s7455_s0 + $0xa0] ss:$16 sps:$4 sm:$0xff]   ;;  %v5872_v16 = vld [vmem:[%s7455_s0 + $0x144] ss:$16 sps:$4 sm:$0xff]  }
  0x38   :  { %3079 = vmatprep.subr.bf16.mxu1 %v5762_v29  ;;  %2984 = vmatprep.mubr.bf16.mxu0 %v6348_v18  ;;  %v5842_v28 = vld [vmem:[%s7455_s0 + $0xc0] ss:$16 sps:$4 sm:$0xff]   ;;  %v343_v29 = vcombine.low %v6317_v63, %v6320_v0 }
  0x39   :  { %3097 = vmatprep.mubr.bf16.mxu1 %v6351_v23  ;;  %v5834_v60 = vld [vmem:[#allocation2 + $0x394] ss:$12 sps:$4 sm:$0xff]   ;;  %v5832_v0 = vld [vmem:[#allocation2 + $0x390] ss:$12 sps:$4 sm:$0xff]  }
  0x3a   :  { %2967 = vmatpush1.bf16.msra.mxu0 %v5764_v30  ;;  %v415_v30 = vcombine.low %v6332_v5, %v6335_v6  ;;  %v5837_v61 = vld [vmem:[#allocation2 + $0x514] ss:$12 sps:$4 sm:$0xff]   ;;  %v5835_v1 = vld [vmem:[#allocation2 + $0x510] ss:$12 sps:$4 sm:$0xff]  }
  0x3b   :  { %3080 = vmatpush1.bf16.msra.mxu1 %v5765_v31  ;;  %2968 = vmatprep.subr.bf16.mxu0 %v5766_v32  ;;  %v5844_v31 = vld [vmem:[%s7455_s0 + $0xe0] ss:$16 sps:$4 sm:$0xff]   ;;  %v5846_v32 = vld [vmem:[%s7455_s0 + $0x84] ss:$16 sps:$4 sm:$0xff]  }
  0x3c   :  { %3081 = vmatprep.subr.bf16.mxu1 %v5768_v33  ;;  %v5847_v33 = vld [vmem:[%s7455_s0 + $0xa4] ss:$16 sps:$4 sm:$0xff]   ;;  %v5864_v9 = vld [vmem:[%s7455_s0 + $0x120] ss:$16 sps:$4 sm:$0xff]  }
  0x3e   :  { %2969 = vmatpush2.bf16.msra.mxu0 %v5770_v34  ;;  %v345_v34 = vcombine.low %v6338_v7, %v342_v10  ;;  %v5852_v7 = vld [vmem:[#allocation2 + $0x37c] ss:$12 sps:$4 sm:$0xff]   ;;  %v5866_v10 = vld [vmem:[%s7455_s0 + $0x140] ss:$16 sps:$4 sm:$0xff]  }
  0x3f   :  { %3082 = vmatpush2.bf16.msra.mxu1 %v5771_v35  ;;  %2970 = vmatprep.subr.bf16.mxu0 %v5772_v36  ;;  %v465_v35 = vrot.slane %v5838_v26, %v6299_v55  ;;  %v479_v36 = vrot.slane %v5840_v27, %v6299_v55  ;;  %v681_v19 = vrot.slane %v5866_v10, %v6299_v55  ;;  %v5850_v27 = vld [vmem:[#allocation2 + $0x378] ss:$12 sps:$4 sm:$0xff]  }
  0x40   :  { %3083 = vmatprep.subr.bf16.mxu1 %v5774_v37  ;;  %v537_v37 = vrot.slane %v5842_v28, %v6299_v55  ;;  %v5853_v28 = vld [vmem:[#allocation2 + $0x4f8] ss:$12 sps:$4 sm:$0xff]  }
  0x41   :  { %v487_v62 = vcombine.low %v465_v35, %v479_v36 }
  0x42   :  { %2971 = vmatpush2.bf16.msra.mxu0 %v5776_v38  ;;  %v5848_v38 = vld [vmem:[%s7455_s0 + $0xc4] ss:$16 sps:$4 sm:$0xff]  }
  0x43   :  { %3084 = vmatpush2.bf16.msra.mxu1 %v5777_v42  ;;  %2972 = vmatprep.subr.bf16.mxu0 %v5778_v43  ;;  %v417_v42 = vcombine.low %v400_v11, %v414_v13  ;;  %v551_v43 = vrot.slane %v5844_v31, %v6299_v55  ;;  %v544_v47 = vrot.slane %v5848_v38, %v6299_v55  ;;  %v5868_v11 = vld [vmem:[%s7455_s0 + $0x160] ss:$16 sps:$4 sm:$0xff]  }
  0x44   :  { %3085 = vmatprep.subr.bf16.mxu1 %v5780_v44  ;;  %v472_v44 = vrot.slane %v5846_v32, %v6299_v55  ;;  %v5858_v32 = vld [vmem:[#allocation2 + $0x364] ss:$12 sps:$4 sm:$0xff]  }
  0x45   :  { %v559_v63 = vcombine.low %v537_v37, %v551_v43 }
  0x46   :  { %2973 = vmatpush2.bf16.msra.mxu0 %v5782_v45  ;;  %v486_v45 = vrot.slane %v5847_v33, %v6299_v55 }
  0x47   :  { %3086 = vmatpush2.bf16.msra.mxu1 %v5783_v46  ;;  %2974 = vmatprep.subr.bf16.mxu0 %v5784_v49  ;;  %v5828_v46 = vld [vmem:[#allocation2 + $0x3ac] ss:$12 sps:$4 sm:$0xff]   ;;  %v558_v49 = vrot.slane %v5849_v39, %v6299_v55  ;;  %v6413_v12 = vpack.c.bf16 %v559_v63, %v487_v62  ;;  %v5896_v62 = vld [vmem:[%s7455_s0 + $0x1c4] ss:$16 sps:$4 sm:$0xff]  }
  0x48   :  { %3087 = vmatprep.subr.bf16.mxu1 %v5786_v50  ;;  %v5831_v50 = vld [vmem:[#allocation2 + $0x52c] ss:$12 sps:$4 sm:$0xff]   ;;  %v490_v56 = vcombine.high %v472_v44, %v486_v45  ;;  %v489_v5 = vcombine.low %v472_v44, %v486_v45  ;;  %v5897_v63 = vld [vmem:[%s7455_s0 + $0x1e4] ss:$16 sps:$4 sm:$0xff]  }
  0x49   :  { %v562_v57 = vcombine.high %v544_v47, %v558_v49  ;;  %v561_v6 = vcombine.low %v544_v47, %v558_v49  ;;  %v5876_v44 = vld [vmem:[#allocation2 + $0x34c] ss:$12 sps:$4 sm:$0xff]   ;;  %v5888_v47 = vld [vmem:[%s7455_s0 + $0x1a0] ss:$16 sps:$4 sm:$0xff]   ;;  %v5874_v49 = vld [vmem:[#allocation2 + $0x348] ss:$12 sps:$4 sm:$0xff]  }
  0x4a   :  { %2975 = vmatpush2.bf16.msra.mxu0 %v5788_v51  ;;  %v5826_v51 = vld [vmem:[#allocation2 + $0x3a8] ss:$12 sps:$4 sm:$0xff]   ;;  %v5879_v45 = vld [vmem:[#allocation2 + $0x4cc] ss:$12 sps:$4 sm:$0xff]  }
  0x4b   :  { %3088 = vmatpush2.bf16.msra.mxu1 %v5789_v52  ;;  %2976 = vmatprep.subr.bf16.mxu0 %v5790_v53  ;;  %v5829_v52 = vld [vmem:[#allocation2 + $0x528] ss:$12 sps:$4 sm:$0xff]   ;;  %v488_v53 = vcombine.high %v465_v35, %v479_v36  ;;  %v6397_v3 = vpack.c.bf16 %v562_v57, %v490_v56  ;;  %v6436_v26 = vpack.c.bf16 %v561_v6, %v489_v5  ;;  %v5856_v36 = vld [vmem:[#allocation2 + $0x360] ss:$12 sps:$4 sm:$0xff]  }
  0x4c   :  { %3089 = vmatprep.subr.bf16.mxu1 %v5792_v54  ;;  %v560_v54 = vcombine.high %v537_v37, %v551_v43  ;;  %v5859_v37 = vld [vmem:[#allocation2 + $0x4e0] ss:$12 sps:$4 sm:$0xff]  }
  0x4d   :  { %v5885_v6 = vld [vmem:[#allocation2 + $0x4b4] ss:$12 sps:$4 sm:$0xff]  }
  0x4e   :  { %2977 = vmatpush2.bf16.msra.mxu0 %v5794_v58  ;;  %v6391_v58 = vpack.c.bf16 %v415_v30, %v343_v29  ;;  %v6395_v2 = vpack.c.bf16 %v560_v54, %v488_v53  ;;  %v5894_v53 = vld [vmem:[%s7455_s0 + $0x184] ss:$16 sps:$4 sm:$0xff]  }
  0x4f   :  { %3090 = vmatpush2.bf16.msra.mxu1 %v5795_v59  ;;  %2978 = vmatprep.subr.bf16.mxu0 %v5796_v4  ;;  %v6393_v59 = vpack.c.bf16 %v417_v42, %v345_v34  ;;  %v5862_v4 = vld [vmem:[%s7455_s0 + $0x100] ss:$16 sps:$4 sm:$0xff]   ;;  %v760_v5 = vrot.slane %v5894_v53, %v6299_v55 }
  0x50   :  { %3091 = vmatprep.subr.bf16.mxu1 %v5798_v8  ;;  %v5855_v8 = vld [vmem:[#allocation2 + $0x4fc] ss:$12 sps:$4 sm:$0xff]   ;;  %v609_v13 = vrot.slane %v5862_v4, %v6299_v55  ;;  %v5861_v34 = vld [vmem:[#allocation2 + $0x4e4] ss:$12 sps:$4 sm:$0xff]  }
  0x52   :  { %2979 = vmatpush2.bf16.msra.mxu0 %v5800_v14  ;;  %v5870_v14 = vld [vmem:[%s7455_s0 + $0x104] ss:$16 sps:$4 sm:$0xff]  }
  0x53   :  { %3092 = vmatpush2.bf16.msra.mxu1 %v5801_v15  ;;  %2980 = vmatprep.subr.bf16.mxu0 %v5802_v17  ;;  %v5871_v15 = vld [vmem:[%s7455_s0 + $0x124] ss:$16 sps:$4 sm:$0xff]   ;;  %v623_v17 = vrot.slane %v5864_v9, %v6299_v55  ;;  %v832_v9 = vrot.slane %v5896_v62, %v6299_v55 }
  0x54   :  { %3093 = vmatprep.subr.bf16.mxu1 %v5804_v20  ;;  %v695_v20 = vrot.slane %v5868_v11, %v6299_v55  ;;  %v846_v11 = vrot.slane %v5897_v63, %v6299_v55 }
  0x55   :  { %v632_v29 = vcombine.high %v609_v13, %v623_v17  ;;  %v631_v39 = vcombine.low %v609_v13, %v623_v17 }
  0x56   :  { %2981 = vmatpush2.bf16.msra.mxu0 %v5806_v21  ;;  %v5873_v21 = vld [vmem:[%s7455_s0 + $0x164] ss:$16 sps:$4 sm:$0xff]   ;;  %v704_v30 = vcombine.high %v681_v19, %v695_v20 }
  0x57   :  { %3094 = vmatpush2.bf16.msra.mxu1 %v5807_v22  ;;  %2982 = vmatprep.subr.bf16.mxu0 %v5808_v24  ;;  %v616_v22 = vrot.slane %v5870_v14, %v6299_v55  ;;  %v630_v24 = vrot.slane %v5871_v15, %v6299_v55  ;;  %v702_v31 = vrot.slane %v5873_v21, %v6299_v55  ;;  %v5880_v14 = vld [vmem:[#allocation2 + $0x330] ss:$12 sps:$4 sm:$0xff]  }
  0x58   :  { %3095 = vmatprep.subr.bf16.mxu1 %v5810_v25  ;;  %v688_v25 = vrot.slane %v5872_v16, %v6299_v55  ;;  %v6439_v38 = vpack.c.bf16 %v704_v30, %v632_v29  ;;  %v5883_v15 = vld [vmem:[#allocation2 + $0x4b0] ss:$12 sps:$4 sm:$0xff]   ;;  %v850_v21 = vcombine.high %v832_v9, %v846_v11  ;;  %v5901_v29 = vld [vmem:[#allocation2 + $0x498] ss:$12 sps:$4 sm:$0xff]  }
  0x59   :  { %v634_v33 = vcombine.high %v616_v22, %v630_v24  ;;  %v633_v42 = vcombine.low %v616_v22, %v630_v24  ;;  %v5900_v22 = vld [vmem:[#allocation2 + $0x31c] ss:$12 sps:$4 sm:$0xff]   ;;  %v849_v24 = vcombine.low %v832_v9, %v846_v11  ;;  %v5927_v9 = vld [vmem:[#allocation2 + $0x5ec] ss:$12 sps:$4 sm:$0xff]   ;;  %v5930_v11 = vld [vmem:[#allocation2 + $0x454] ss:$12 sps:$4 sm:$0xff]  }
  0x5a   :  { %2983 = vmatpush2.bf16.msra.mxu0 %v5812_v40  ;;  %v706_v35 = vcombine.high %v688_v25, %v702_v31  ;;  %v703_v40 = vcombine.low %v681_v19, %v695_v20  ;;  %v705_v43 = vcombine.low %v688_v25, %v702_v31  ;;  %v5903_v25 = vld [vmem:[#allocation2 + $0x49c] ss:$12 sps:$4 sm:$0xff]  }
  0x5b   :  { %3096 = vmatpush2.bf16.msra.mxu1 %v5813_v41  ;;  %3178 = vmatprep.subr.bf16.mxu0 %v5828_v46  ;;  %v5886_v46 = vld [vmem:[%s7455_s0 + $0x180] ss:$16 sps:$4 sm:$0xff]  }
  0x5c   :  { %3291 = vmatprep.subr.bf16.mxu1 %v5831_v50  ;;  %v6443_v41 = vpack.c.bf16 %v706_v35, %v634_v33  ;;  %v5877_v50 = vld [vmem:[#allocation2 + $0x4c8] ss:$12 sps:$4 sm:$0xff]   ;;  %v6462_v54 = vpack.c.bf16 %v703_v40, %v631_v39  ;;  %v6464_v56 = vpack.c.bf16 %v705_v43, %v633_v42  ;;  %v753_v57 = vrot.slane %v5886_v46, %v6299_v55  ;;  %v5909_v33 = vld [vmem:[#allocation2 + $0x484] ss:$12 sps:$4 sm:$0xff]  }
  0x5d   :  { %2985 = vmatmul.mubr.bf16.vlgmr.msra.gmra.mxu0 %v6391_v58  ;;  %v5912_v35 = vld [vmem:[%s7455_s0 + $0x220] ss:$16 sps:$4 sm:$0xff]   ;;  %v5918_v39 = vld [vmem:[%s7455_s0 + $0x204] ss:$16 sps:$4 sm:$0xff]  }
  0x5e   :  { %3098 = vmatmul.mubr.bf16.vlgmr.msra.gmra.mxu1 %v6393_v59  ;;  %3179 = vmatpush1.bf16.msra.mxu0 %v5826_v51  ;;  %v5890_v51 = vld [vmem:[%s7455_s0 + $0x1c0] ss:$16 sps:$4 sm:$0xff]   ;;  %v5919_v40 = vld [vmem:[%s7455_s0 + $0x224] ss:$16 sps:$4 sm:$0xff]   ;;  %v911_v43 = vrot.slane %v5912_v35, %v6299_v55 }
  0x5f   :  { %3292 = vmatpush1.bf16.msra.mxu1 %v5829_v52  ;;  %3180 = vmatprep.subr.bf16.mxu0 %v5834_v60  ;;  %v5892_v52 = vld [vmem:[%s7455_s0 + $0x1e0] ss:$16 sps:$4 sm:$0xff]   ;;  %v767_v60 = vrot.slane %v5888_v47, %v6299_v55  ;;  %v5921_v46 = vld [vmem:[%s7455_s0 + $0x264] ss:$16 sps:$4 sm:$0xff]  }
  0x60   :  { %3293 = vmatprep.subr.bf16.mxu1 %v5837_v61  ;;  %2994 = vmatprep.mubr.bf16.mxu0 %v6395_v2  ;;  %v5895_v61 = vld [vmem:[%s7455_s0 + $0x1a4] ss:$16 sps:$4 sm:$0xff]   ;;  %v839_v4 = vrot.slane %v5892_v52, %v6299_v55  ;;  %v5904_v47 = vld [vmem:[#allocation2 + $0x300] ss:$12 sps:$4 sm:$0xff]  }
  0x61   :  { %3107 = vmatprep.mubr.bf16.mxu1 %v6397_v3  ;;  %v775_v13 = vcombine.low %v753_v57, %v767_v60  ;;  %v5907_v52 = vld [vmem:[#allocation2 + $0x480] ss:$12 sps:$4 sm:$0xff]  }
  0x62   :  { %3181 = vmatpush1.bf16.msra.mxu0 %v5832_v0  ;;  %v5882_v0 = vld [vmem:[#allocation2 + $0x334] ss:$12 sps:$4 sm:$0xff]  }
  0x63   :  { %3294 = vmatpush1.bf16.msra.mxu1 %v5835_v1  ;;  %3182 = vmatprep.subr.bf16.mxu0 %v5852_v7  ;;  %v825_v1 = vrot.slane %v5890_v51, %v6299_v55  ;;  %v776_v7 = vcombine.high %v753_v57, %v767_v60  ;;  %v918_v51 = vrot.slane %v5919_v40, %v6299_v55 }
  0x64   :  { %3295 = vmatprep.subr.bf16.mxu1 %v5855_v8  ;;  %v774_v8 = vrot.slane %v5895_v61, %v6299_v55  ;;  %v990_v60 = vrot.slane %v5921_v46, %v6299_v55 }
  0x65   :  { %2995 = vmatmul.mubr.bf16.gmra.mxu0 %v6413_v12  ;;  %v848_v10 = vcombine.high %v825_v1, %v839_v4  ;;  %v847_v17 = vcombine.low %v825_v1, %v839_v4 }
  0x66   :  { %3108 = vmatmul.mubr.bf16.gmra.mxu1 %v6436_v26  ;;  %3183 = vmatpush1.bf16.msra.mxu0 %v5850_v27  ;;  %v778_v16 = vcombine.high %v760_v5, %v774_v8  ;;  %v777_v19 = vcombine.low %v760_v5, %v774_v8  ;;  %v5925_v8 = vld [vmem:[#allocation2 + $0x5e8] ss:$12 sps:$4 sm:$0xff]  }
  0x67   :  { %3296 = vmatpush1.bf16.msra.mxu1 %v5853_v28  ;;  %3184 = vmatprep.subr.bf16.mxu0 %v5858_v32  ;;  %v6485_v20 = vpack.c.bf16 %v848_v10, %v776_v7  ;;  %v5898_v28 = vld [vmem:[#allocation2 + $0x318] ss:$12 sps:$4 sm:$0xff]   ;;  %v6490_v30 = vpack.c.bf16 %v847_v17, %v775_v13  ;;  %v5922_v7 = vld [vmem:[#allocation2 + $0x468] ss:$12 sps:$4 sm:$0xff]   ;;  %v5928_v17 = vld [vmem:[#allocation2 + $0x450] ss:$12 sps:$4 sm:$0xff]  }
  0x68   :  { %3297 = vmatprep.subr.bf16.mxu1 %v5861_v34  ;;  %3004 = vmatprep.mubr.bf16.mxu0 %v6439_v38  ;;  %v6488_v27 = vpack.c.bf16 %v850_v21, %v778_v16  ;;  %v6492_v31 = vpack.c.bf16 %v849_v24, %v777_v19  ;;  %v5906_v32 = vld [vmem:[#allocation2 + $0x304] ss:$12 sps:$4 sm:$0xff]   ;;  %v5933_v13 = vld [vmem:[#allocation2 + $0x5d4] ss:$12 sps:$4 sm:$0xff]  }
  0x69   :  { %3117 = vmatprep.mubr.bf16.mxu1 %v6443_v41  ;;  %v5910_v34 = vld [vmem:[%s7455_s0 + $0x200] ss:$16 sps:$4 sm:$0xff]  }
  0x6a   :  { %3185 = vmatpush1.bf16.msra.mxu0 %v5856_v36  ;;  %v5914_v36 = vld [vmem:[%s7455_s0 + $0x240] ss:$16 sps:$4 sm:$0xff]   ;;  %v897_v42 = vrot.slane %v5910_v34, %v6299_v55 }
  0x6b   :  { %3298 = vmatpush1.bf16.msra.mxu1 %v5859_v37  ;;  %3186 = vmatprep.subr.bf16.mxu0 %v5876_v44  ;;  %v5916_v37 = vld [vmem:[%s7455_s0 + $0x260] ss:$16 sps:$4 sm:$0xff]   ;;  %v969_v44 = vrot.slane %v5914_v36, %v6299_v55 }
  0x6c   :  { %3299 = vmatprep.subr.bf16.mxu1 %v5879_v45  ;;  %v5920_v45 = vld [vmem:[%s7455_s0 + $0x244] ss:$16 sps:$4 sm:$0xff]   ;;  %v920_v53 = vcombine.high %v897_v42, %v911_v43  ;;  %v919_v63 = vcombine.low %v897_v42, %v911_v43  ;;  %v5931_v19 = vld [vmem:[#allocation2 + $0x5d0] ss:$12 sps:$4 sm:$0xff]  }
  0x6d   :  { %3005 = vmatmul.mubr.bf16.gmra.mxu0 %v6462_v54  ;;  %v976_v57 = vrot.slane %v5920_v45, %v6299_v55  ;;  %v5934_v21 = vld [vmem:[%s7455_s0 + $0x280] ss:$16 sps:$4 sm:$0xff]   ;;  %v5948_v43 = vld [vmem:[#allocation2 + $0x43c] ss:$12 sps:$4 sm:$0xff]  }
  0x6e   :  { %3118 = vmatmul.mubr.bf16.gmra.mxu1 %v6464_v56  ;;  %3187 = vmatpush1.bf16.msra.mxu0 %v5874_v49  ;;  %v983_v49 = vrot.slane %v5916_v37, %v6299_v55  ;;  %v5938_v24 = vld [vmem:[%s7455_s0 + $0x2c0] ss:$16 sps:$4 sm:$0xff]   ;;  %v5945_v37 = vld [vmem:[%s7455_s0 + $0x2e4] ss:$16 sps:$4 sm:$0xff]  }
  0x6f   :  { %3300 = vmatpush1.bf16.msra.mxu1 %v5877_v50  ;;  %3188 = vmatprep.subr.bf16.mxu0 %v5882_v0  ;;  %v904_v50 = vrot.slane %v5918_v39, %v6299_v55  ;;  %v5924_v0 = vld [vmem:[#allocation2 + $0x46c] ss:$12 sps:$4 sm:$0xff]   ;;  %v994_v1 = vcombine.high %v976_v57, %v990_v60  ;;  %v1113_v35 = vrot.slane %v5938_v24, %v6299_v55  ;;  %v5968_v24 = vld [vmem:[%s7455_s0 + $0x344] ss:$16 sps:$4 sm:$0xff]  }
  0x70   :  { %3301 = vmatprep.subr.bf16.mxu1 %v5885_v6  ;;  %3014 = vmatprep.mubr.bf16.mxu0 %v6485_v20  ;;  %v992_v61 = vcombine.high %v969_v44, %v983_v49  ;;  %v991_v4 = vcombine.low %v969_v44, %v983_v49  ;;  %v993_v6 = vcombine.low %v976_v57, %v990_v60  ;;  %v5946_v49 = vld [vmem:[#allocation2 + $0x438] ss:$12 sps:$4 sm:$0xff]  }
  0x71   :  { %3127 = vmatprep.mubr.bf16.mxu1 %v6488_v27  ;;  %v922_v62 = vcombine.high %v904_v50, %v918_v51  ;;  %v921_v5 = vcombine.low %v904_v50, %v918_v51  ;;  %v1134_v46 = vrot.slane %v5945_v37, %v6299_v55  ;;  %v5951_v50 = vld [vmem:[#allocation2 + $0x5bc] ss:$12 sps:$4 sm:$0xff]   ;;  %v5949_v57 = vld [vmem:[#allocation2 + $0x5b8] ss:$12 sps:$4 sm:$0xff]  }
  0x72   :  { %3189 = vmatpush1.bf16.msra.mxu0 %v5880_v14  ;;  %v6529_v10 = vpack.c.bf16 %v992_v61, %v920_v53 }
  0x73   :  { %3302 = vmatpush1.bf16.msra.mxu1 %v5883_v15  ;;  %3190 = vmatprep.subr.bf16.mxu0 %v5900_v22  ;;  %v6531_v14 = vpack.c.bf16 %v994_v1, %v922_v62  ;;  %v6533_v15 = vpack.c.bf16 %v991_v4, %v919_v63  ;;  %v6535_v16 = vpack.c.bf16 %v993_v6, %v921_v5  ;;  %v5936_v22 = vld [vmem:[%s7455_s0 + $0x2a0] ss:$16 sps:$4 sm:$0xff]  }
  0x74   :  { %3303 = vmatprep.subr.bf16.mxu1 %v5903_v25  ;;  %v5940_v25 = vld [vmem:[%s7455_s0 + $0x2e0] ss:$16 sps:$4 sm:$0xff]   ;;  %v1055_v34 = vrot.slane %v5936_v22, %v6299_v55  ;;  %v5967_v22 = vld [vmem:[%s7455_s0 + $0x324] ss:$16 sps:$4 sm:$0xff]  }
  0x75   :  { %3015 = vmatmul.mubr.bf16.gmra.mxu0 %v6490_v30  ;;  %v1127_v36 = vrot.slane %v5940_v25, %v6299_v55  ;;  %v5954_v63 = vld [vmem:[#allocation2 + $0x424] ss:$12 sps:$4 sm:$0xff]   ;;  %v5955_v1 = vld [vmem:[#allocation2 + $0x5a0] ss:$12 sps:$4 sm:$0xff]  }
  0x76   :  { %3128 = vmatmul.mubr.bf16.gmra.mxu1 %v6492_v31  ;;  %3191 = vmatpush1.bf16.msra.mxu0 %v5898_v28  ;;  %v1041_v28 = vrot.slane %v5934_v21, %v6299_v55  ;;  %v5957_v4 = vld [vmem:[#allocation2 + $0x5a4] ss:$12 sps:$4 sm:$0xff]  }
  0x77   :  { %3304 = vmatpush1.bf16.msra.mxu1 %v5901_v29  ;;  %3192 = vmatprep.subr.bf16.mxu0 %v5906_v32  ;;  %v5942_v29 = vld [vmem:[%s7455_s0 + $0x284] ss:$16 sps:$4 sm:$0xff]   ;;  %v1136_v45 = vcombine.high %v1113_v35, %v1127_v36 }
  0x78   :  { %3305 = vmatprep.subr.bf16.mxu1 %v5909_v33  ;;  %3024 = vmatprep.mubr.bf16.mxu0 %v6529_v10  ;;  %v5943_v32 = vld [vmem:[%s7455_s0 + $0x2a4] ss:$16 sps:$4 sm:$0xff]   ;;  %v1048_v39 = vrot.slane %v5942_v29, %v6299_v55  ;;  %v1064_v44 = vcombine.high %v1041_v28, %v1055_v34 }
  0x79   :  { %3137 = vmatprep.mubr.bf16.mxu1 %v6531_v14  ;;  %v5944_v33 = vld [vmem:[%s7455_s0 + $0x2c4] ss:$16 sps:$4 sm:$0xff]   ;;  %v1062_v40 = vrot.slane %v5943_v32, %v6299_v55 }
  0x7a   :  { %3193 = vmatpush1.bf16.msra.mxu0 %v5904_v47  ;;  %v1120_v42 = vrot.slane %v5944_v33, %v6299_v55  ;;  %v1063_v47 = vcombine.low %v1041_v28, %v1055_v34  ;;  %v6573_v60 = vpack.c.bf16 %v1136_v45, %v1064_v44  ;;  %v5969_v25 = vld [vmem:[%s7455_s0 + $0x364] ss:$16 sps:$4 sm:$0xff]   ;;  %v5975_v45 = vld [vmem:[#allocation2 + $0x58c] ss:$12 sps:$4 sm:$0xff]  }
  0x7b   :  { %3306 = vmatpush1.bf16.msra.mxu1 %v5907_v52  ;;  %3194 = vmatprep.subr.bf16.mxu0 %v5924_v0  ;;  %v1066_v51 = vcombine.high %v1048_v39, %v1062_v40  ;;  %v1135_v52 = vcombine.low %v1113_v35, %v1127_v36  ;;  %v1065_v53 = vcombine.low %v1048_v39, %v1062_v40  ;;  %v5970_v33 = vld [vmem:[#allocation2 + $0x408] ss:$12 sps:$4 sm:$0xff]   ;;  %v5972_v39 = vld [vmem:[#allocation2 + $0x40c] ss:$12 sps:$4 sm:$0xff]  }
  0x7c   :  { %3307 = vmatprep.subr.bf16.mxu1 %v5927_v9  ;;  %v1138_v61 = vcombine.high %v1120_v42, %v1134_v46  ;;  %v1137_v62 = vcombine.low %v1120_v42, %v1134_v46  ;;  %v5960_v9 = vld [vmem:[%s7455_s0 + $0x320] ss:$16 sps:$4 sm:$0xff]   ;;  %v1206_v35 = vrot.slane %v5967_v22, %v6299_v55  ;;  %v1264_v36 = vrot.slane %v5968_v24, %v6299_v55  ;;  %v5973_v44 = vld [vmem:[#allocation2 + $0x588] ss:$12 sps:$4 sm:$0xff]  }
  0x7d   :  { %3025 = vmatmul.mubr.bf16.gmra.mxu0 %v6533_v15  ;;  %v6575_v0 = vpack.c.bf16 %v1135_v52, %v1063_v47  ;;  %v1199_v21 = vrot.slane %v5960_v9, %v6299_v55  ;;  %v1278_v37 = vrot.slane %v5969_v25, %v6299_v55  ;;  %v5978_v52 = vld [vmem:[#allocation2 + $0x3f4] ss:$12 sps:$4 sm:$0xff]  }
  0x7e   :  { %3138 = vmatmul.mubr.bf16.gmra.mxu1 %v6535_v16  ;;  %3195 = vmatpush2.bf16.msra.mxu0 %v5922_v7  ;;  %v6578_v5 = vpack.c.bf16 %v1138_v61, %v1066_v51  ;;  %v6580_v6 = vpack.c.bf16 %v1137_v62, %v1065_v53  ;;  %v5952_v7 = vld [vmem:[#allocation2 + $0x420] ss:$12 sps:$4 sm:$0xff]   ;;  %v5976_v51 = vld [vmem:[#allocation2 + $0x3f0] ss:$12 sps:$4 sm:$0xff]   ;;  %v5992_v22 = vld [vmem:[%s7455_s0 + $0x3c4] ss:$16 sps:$4 sm:$0xff]  }
  0x7f   :  { %3308 = vmatpush2.bf16.msra.mxu1 %v5925_v8  ;;  %3196 = vmatprep.subr.bf16.mxu0 %v5930_v11  ;;  %v5958_v8 = vld [vmem:[%s7455_s0 + $0x300] ss:$16 sps:$4 sm:$0xff]   ;;  %v1282_v47 = vcombine.high %v1264_v36, %v1278_v37  ;;  %v5993_v24 = vld [vmem:[%s7455_s0 + $0x3e4] ss:$16 sps:$4 sm:$0xff]  }
  0x80   :  { %3309 = vmatprep.subr.bf16.mxu1 %v5933_v13  ;;  %3034 = vmatprep.mubr.bf16.mxu0 %v6573_v60  ;;  %v5962_v11 = vld [vmem:[%s7455_s0 + $0x340] ss:$16 sps:$4 sm:$0xff]  }
  0x81   :  { %3147 = vmatprep.mubr.bf16.mxu1 %v6578_v5  ;;  %v5964_v13 = vld [vmem:[%s7455_s0 + $0x360] ss:$16 sps:$4 sm:$0xff]   ;;  %v1257_v28 = vrot.slane %v5962_v11, %v6299_v55  ;;  %v5990_v11 = vld [vmem:[%s7455_s0 + $0x384] ss:$16 sps:$4 sm:$0xff]  }
  0x82   :  { %3197 = vmatpush2.bf16.msra.mxu0 %v5928_v17  ;;  %v5966_v17 = vld [vmem:[%s7455_s0 + $0x304] ss:$16 sps:$4 sm:$0xff]   ;;  %v1271_v29 = vrot.slane %v5964_v13, %v6299_v55  ;;  %v5979_v61 = vld [vmem:[#allocation2 + $0x570] ss:$12 sps:$4 sm:$0xff]  }
  0x83   :  { %3310 = vmatpush2.bf16.msra.mxu1 %v5931_v19  ;;  %3198 = vmatprep.subr.bf16.mxu0 %v5948_v43  ;;  %v1185_v19 = vrot.slane %v5958_v8, %v6299_v55  ;;  %v1192_v32 = vrot.slane %v5966_v17, %v6299_v55  ;;  %v5986_v8 = vld [vmem:[%s7455_s0 + $0x3c0] ss:$16 sps:$4 sm:$0xff]   ;;  %v5991_v13 = vld [vmem:[%s7455_s0 + $0x3a4] ss:$16 sps:$4 sm:$0xff]  }
  0x84   :  { %3311 = vmatprep.subr.bf16.mxu1 %v5951_v50  ;;  %v1280_v40 = vcombine.high %v1257_v28, %v1271_v29  ;;  %v1279_v43 = vcombine.low %v1257_v28, %v1271_v29  ;;  %v1281_v50 = vcombine.low %v1264_v36, %v1278_v37  ;;  %v5988_v9 = vld [vmem:[%s7455_s0 + $0x3e0] ss:$16 sps:$4 sm:$0xff]   ;;  %v1336_v28 = vrot.slane %v5990_v11, %v6299_v55  ;;  %v6010_v11 = vld [vmem:[%s7455_s0 + $0x48] ss:$16 sps:$4 sm:$0xff]  }
  0x85   :  { %3035 = vmatmul.mubr.bf16.gmra.mxu0 %v6575_v0  ;;  %v1208_v34 = vcombine.high %v1185_v19, %v1199_v21  ;;  %v1207_v42 = vcombine.low %v1185_v19, %v1199_v21  ;;  %v1210_v46 = vcombine.high %v1192_v32, %v1206_v35  ;;  %v1401_v21 = vrot.slane %v5986_v8, %v6299_v55  ;;  %v6006_v8 = vld [vmem:[%s7455_s0 + $0x8] ss:$16 sps:$4 sm:$0xff]  }
  0x86   :  { %3199 = vmatpush2.bf16.msra.mxu0 %v5946_v49  ;;  %3148 = vmatmul.mubr.bf16.gmra.mxu1 %v6580_v6  ;;  %v1209_v49 = vcombine.low %v1192_v32, %v1206_v35  ;;  %v1415_v25 = vrot.slane %v5988_v9, %v6299_v55  ;;  %v1350_v29 = vrot.slane %v5991_v13, %v6299_v55  ;;  %v5994_v32 = vld [vmem:[#allocation2 + $0x3d8] ss:$12 sps:$4 sm:$0xff]  }
  0x87   :  { %3312 = vmatpush2.bf16.msra.mxu1 %v5949_v57  ;;  %3200 = vmatprep.subr.bf16.mxu0 %v5954_v63  ;;  %v6617_v53 = vpack.c.bf16 %v1280_v40, %v1208_v34  ;;  %v6619_v57 = vpack.c.bf16 %v1279_v43, %v1207_v42  ;;  %v6621_v62 = vpack.c.bf16 %v1282_v47, %v1210_v46  ;;  %v6008_v9 = vld [vmem:[%s7455_s0 + $0x28] ss:$16 sps:$4 sm:$0xff]  }
  0x88   :  { %3313 = vmatprep.subr.bf16.mxu1 %v5957_v4  ;;  %v6623_v63 = vpack.c.bf16 %v1281_v50, %v1209_v49  ;;  %v5982_v4 = vld [vmem:[%s7455_s0 + $0x380] ss:$16 sps:$4 sm:$0xff]   ;;  %v1408_v35 = vrot.slane %v5992_v22, %v6299_v55  ;;  %v1422_v36 = vrot.slane %v5993_v24, %v6299_v55  ;;  %v1424_v40 = vcombine.high %v1401_v21, %v1415_v25  ;;  %v6012_v13 = vld [vmem:[%s7455_s0 + $0x68] ss:$16 sps:$4 sm:$0xff]   ;;  %v6016_v22 = vld [vmem:[%s7455_s0 + $0x4c] ss:$16 sps:$4 sm:$0xff]  }
  0x89   :  { %3044 = vmatprep.mubr.bf16.mxu0 %v6617_v53  ;;  %3157 = vmatprep.mubr.bf16.mxu1 %v6621_v62  ;;  %v1329_v17 = vrot.slane %v5982_v4, %v6299_v55  ;;  %v1354_v42 = vcombine.high %v1336_v28, %v1350_v29  ;;  %v1423_v43 = vcombine.low %v1401_v21, %v1415_v25  ;;  %v6000_v49 = vld [vmem:[#allocation2 + $0x3c0] ss:$12 sps:$4 sm:$0xff]   ;;  %v6002_v50 = vld [vmem:[#allocation2 + $0x3c4] ss:$12 sps:$4 sm:$0xff]  }
  0x8a   :  { %3201 = vmatpush2.bf16.msra.mxu0 %v5952_v7  ;;  %v5984_v7 = vld [vmem:[%s7455_s0 + $0x3a0] ss:$16 sps:$4 sm:$0xff]   ;;  %v1426_v46 = vcombine.high %v1408_v35, %v1422_v36  ;;  %v1425_v47 = vcombine.low %v1408_v35, %v1422_v36  ;;  %v6015_v21 = vld [vmem:[%s7455_s0 + $0x2c] ss:$16 sps:$4 sm:$0xff]   ;;  %v371_v24 = vrot.slane %v6008_v9, %v6299_v55  ;;  %v429_v25 = vrot.slane %v6010_v11, %v6299_v55  ;;  %v6022_v11 = vld [vmem:[%s7455_s0 + $0x88] ss:$16 sps:$4 sm:$0xff]  }
  0x8b   :  { %3314 = vmatpush2.bf16.msra.mxu1 %v5955_v1  ;;  %3202 = vmatprep.subr.bf16.mxu0 %v5972_v39  ;;  %v5981_v1 = vld [vmem:[#allocation2 + $0x574] ss:$12 sps:$4 sm:$0xff]   ;;  %v1343_v19 = vrot.slane %v5984_v7, %v6299_v55  ;;  %v5997_v39 = vld [vmem:[#allocation2 + $0x558] ss:$12 sps:$4 sm:$0xff]   ;;  %v6018_v35 = vld [vmem:[#allocation2 + $0x170] ss:$12 sps:$4 sm:$0xff]  }
  0x8c   :  { %3315 = vmatprep.subr.bf16.mxu1 %v5975_v45  ;;  %v5999_v45 = vld [vmem:[#allocation2 + $0x55c] ss:$12 sps:$4 sm:$0xff]   ;;  %v6665_v4 = vpack.c.bf16 %v1426_v46, %v1354_v42 }
  0x8d   :  { %3045 = vmatmul.mubr.bf16.gmra.mxu0 %v6619_v57  ;;  %v1352_v34 = vcombine.high %v1329_v17, %v1343_v19  ;;  %v1351_v37 = vcombine.low %v1329_v17, %v1343_v19  ;;  %v357_v17 = vrot.slane %v6006_v8, %v6299_v55  ;;  %v6014_v19 = vld [vmem:[%s7455_s0 + $0xc] ss:$16 sps:$4 sm:$0xff]  }
  0x8e   :  { %3203 = vmatpush2.bf16.msra.mxu0 %v5970_v33  ;;  %3158 = vmatmul.mubr.bf16.gmra.mxu1 %v6623_v63  ;;  %v5996_v33 = vld [vmem:[#allocation2 + $0x3dc] ss:$12 sps:$4 sm:$0xff]  }
  0x8f   :  { %3316 = vmatpush2.bf16.msra.mxu1 %v5973_v44  ;;  %3204 = vmatprep.subr.bf16.mxu0 %v5978_v52  ;;  %v1353_v44 = vcombine.low %v1336_v28, %v1350_v29  ;;  %v6663_v52 = vpack.c.bf16 %v1423_v43, %v1351_v37  ;;  %v443_v28 = vrot.slane %v6012_v13, %v6299_v55  ;;  %v6017_v29 = vld [vmem:[%s7455_s0 + $0x6c] ss:$16 sps:$4 sm:$0xff]   ;;  %v6024_v13 = vld [vmem:[%s7455_s0 + $0xa8] ss:$16 sps:$4 sm:$0xff]  }
  0x90   :  { %3317 = vmatprep.subr.bf16.mxu1 %v5981_v1  ;;  %v6005_v1 = vld [vmem:[#allocation2 + $0x544] ss:$12 sps:$4 sm:$0xff]   ;;  %3167 = vmatprep.mubr.bf16.mxu1 %v6665_v4  ;;  %v379_v36 = vcombine.low %v357_v17, %v371_v24  ;;  %v380_v37 = vcombine.high %v357_v17, %v371_v24  ;;  %v6026_v17 = vld [vmem:[%s7455_s0 + $0xc8] ss:$16 sps:$4 sm:$0xff]   ;;  %v501_v24 = vrot.slane %v6022_v11, %v6299_v55 }
  0x91   :  { %v6667_v7 = vpack.c.bf16 %v1425_v47, %v1353_v44  ;;  %v450_v44 = vrot.slane %v6017_v29, %v6299_v55  ;;  %v6032_v29 = vld [vmem:[%s7455_s0 + $0xcc] ss:$16 sps:$4 sm:$0xff]  }
  0x92   :  { %3205 = vmatpush2.bf16.msra.mxu0 %v5976_v51  ;;  %v6661_v51 = vpack.c.bf16 %v1424_v40, %v1352_v34  ;;  %v436_v34 = vrot.slane %v6016_v22, %v6299_v55  ;;  %v452_v40 = vcombine.high %v429_v25, %v443_v28  ;;  %v6031_v22 = vld [vmem:[%s7455_s0 + $0xac] ss:$16 sps:$4 sm:$0xff]  }
  0x93   :  { %3318 = vmatpush2.bf16.msra.mxu1 %v5979_v61  ;;  %3206 = vmatprep.subr.bf16.mxu0 %v5996_v33  ;;  %v6003_v61 = vld [vmem:[#allocation2 + $0x540] ss:$12 sps:$4 sm:$0xff]   ;;  %v378_v33 = vrot.slane %v6015_v21, %v6299_v55 }
  0x94   :  { %3319 = vmatprep.subr.bf16.mxu1 %v5999_v45  ;;  %3054 = vmatprep.mubr.bf16.mxu0 %v6661_v51  ;;  %v6020_v45 = vld [vmem:[#allocation2 + $0x2f0] ss:$12 sps:$4 sm:$0xff]   ;;  %v6705_v46 = vpack.c.bf16 %v452_v40, %v380_v37 }
  0x95   :  { %3055 = vmatmul.mubr.bf16.gmra.mxu0 %v6663_v52  ;;  %v6030_v21 = vld [vmem:[%s7455_s0 + $0x8c] ss:$16 sps:$4 sm:$0xff]  }
  0x96   :  { %3207 = vmatpush2.bf16.msra.mxu0 %v5994_v32  ;;  %3168 = vmatmul.mubr.bf16.gmra.mxu1 %v6667_v7  ;;  %v364_v32 = vrot.slane %v6014_v19, %v6299_v55  ;;  %v6028_v19 = vld [vmem:[%s7455_s0 + $0xe8] ss:$16 sps:$4 sm:$0xff]  }
  0x97   :  { %3320 = vmatpush2.bf16.msra.mxu1 %v5997_v39  ;;  %3208 = vmatprep.subr.bf16.mxu0 %v6002_v50  ;;  %v451_v39 = vcombine.low %v429_v25, %v443_v28  ;;  %v453_v50 = vcombine.low %v436_v34, %v450_v44  ;;  %v515_v25 = vrot.slane %v6024_v13, %v6299_v55 }
  0x98   :  { %3321 = vmatprep.subr.bf16.mxu1 %v6005_v1  ;;  %v381_v42 = vcombine.low %v364_v32, %v378_v33  ;;  %v382_v43 = vcombine.high %v364_v32, %v378_v33  ;;  %v6021_v1 = vld [vmem:[#allocation2 + $0x230] ss:$12 sps:$4 sm:$0xff]   ;;  %3210 = vmatprep.mubr.bf16.mxu0 %v6705_v46  ;;  %v573_v28 = vrot.slane %v6026_v17, %v6299_v55  ;;  %v6037_v17 = vld [vmem:[#allocation2 + $0x218] ss:$12 sps:$4 sm:$0xff]  }
  0x99   :  { %v6707_v47 = vpack.c.bf16 %v451_v39, %v379_v36  ;;  %v6033_v32 = vld [vmem:[%s7455_s0 + $0xec] ss:$16 sps:$4 sm:$0xff]   ;;  %v587_v33 = vrot.slane %v6028_v19, %v6299_v55  ;;  %v6034_v36 = vld [vmem:[#allocation2 + $0x158] ss:$12 sps:$4 sm:$0xff]   ;;  %v524_v37 = vcombine.high %v501_v24, %v515_v25  ;;  %v580_v39 = vrot.slane %v6032_v29, %v6299_v55 }
  0x9a   :  { %3209 = vmatpush2.bf16.msra.mxu0 %v6000_v49  ;;  %v6019_v49 = vld [vmem:[#allocation2 + $0xb0] ss:$12 sps:$4 sm:$0xff]   ;;  %v6713_v9 = vpack.c.bf16 %v453_v50, %v381_v42  ;;  %v594_v40 = vrot.slane %v6033_v32, %v6299_v55  ;;  %v523_v42 = vcombine.low %v501_v24, %v515_v25  ;;  %v6038_v24 = vld [vmem:[%s7455_s0 + $0x108] ss:$16 sps:$4 sm:$0xff]  }
  0x9b   :  { %3322 = vmatpush2.bf16.msra.mxu1 %v6003_v61  ;;  %5294 = vmatprep.subr.bf16.mxu0 %v6018_v35  ;;  %v454_v61 = vcombine.high %v436_v34, %v450_v44  ;;  %v508_v34 = vrot.slane %v6030_v21, %v6299_v55  ;;  %v522_v35 = vrot.slane %v6031_v22, %v6299_v55  ;;  %v6040_v25 = vld [vmem:[%s7455_s0 + $0x128] ss:$16 sps:$4 sm:$0xff]   ;;  %v6046_v32 = vld [vmem:[%s7455_s0 + $0x10c] ss:$16 sps:$4 sm:$0xff]  }
  0x9c   :  { %5358 = vmatprep.subr.bf16.mxu1 %v6020_v45  ;;  %v596_v44 = vcombine.high %v573_v28, %v587_v33  ;;  %v598_v11 = vcombine.high %v580_v39, %v594_v40  ;;  %v597_v13 = vcombine.low %v580_v39, %v594_v40  ;;  %v6044_v29 = vld [vmem:[%s7455_s0 + $0x168] ss:$16 sps:$4 sm:$0xff]  }
  0x9d   :  { %v6710_v8 = vpack.c.bf16 %v454_v61, %v382_v43  ;;  %3211 = vmatmul.mubr.bf16.vlgmr.msra.gmra.mxu0 %v6707_v47  ;;  %v6035_v43 = vld [vmem:[#allocation2 + $0x98] ss:$12 sps:$4 sm:$0xff]   ;;  %v526_v45 = vcombine.high %v508_v34, %v522_v35  ;;  %v525_v50 = vcombine.low %v508_v34, %v522_v35  ;;  %v659_v34 = vrot.slane %v6040_v25, %v6299_v55  ;;  %v6047_v35 = vld [vmem:[%s7455_s0 + $0x12c] ss:$16 sps:$4 sm:$0xff]  }
  0x9e   :  { %5295 = vmatpush3.bf16.msra.mxu0 %v6019_v49  ;;  %v595_v49 = vcombine.low %v573_v28, %v587_v33  ;;  %v6036_v61 = vld [vmem:[#allocation2 + $0x2d8] ss:$12 sps:$4 sm:$0xff]   ;;  %v6749_v19 = vpack.c.bf16 %v596_v44, %v524_v37  ;;  %v645_v33 = vrot.slane %v6038_v24, %v6299_v55  ;;  %v6049_v37 = vld [vmem:[%s7455_s0 + $0x16c] ss:$16 sps:$4 sm:$0xff]   ;;  %v731_v40 = vrot.slane %v6044_v29, %v6299_v55 }
  0x9f   :  { %3323 = vmatprep.mubr.bf16.mxu1 %v6710_v8  ;;  %5296 = vmatprep.subr.bf16.mxu0 %v6034_v36  ;;  %v6753_v21 = vpack.c.bf16 %v598_v11, %v526_v45  ;;  %v6755_v22 = vpack.c.bf16 %v597_v13, %v525_v50  ;;  %v6042_v28 = vld [vmem:[%s7455_s0 + $0x148] ss:$16 sps:$4 sm:$0xff]   ;;  %v6048_v36 = vld [vmem:[%s7455_s0 + $0x14c] ss:$16 sps:$4 sm:$0xff]   ;;  %v666_v45 = vrot.slane %v6047_v35, %v6299_v55 }
  0xa0   :  { %3324 = vmatmul.mubr.bf16.vlgmr.msra.gmra.mxu1 %v6713_v9  ;;  %3220 = vmatprep.mubr.bf16.mxu0 %v6749_v19  ;;  %v717_v39 = vrot.slane %v6042_v28, %v6299_v55  ;;  %v668_v44 = vcombine.high %v645_v33, %v659_v34  ;;  %v738_v50 = vrot.slane %v6049_v37, %v6299_v55  ;;  %v6052_v24 = vld [vmem:[#allocation2 + $0x2c0] ss:$12 sps:$4 sm:$0xff]   ;;  %v6060_v37 = vld [vmem:[%s7455_s0 + $0x1e8] ss:$16 sps:$4 sm:$0xff]  }
  0xa1   :  { %5359 = vmatpush3.bf16.msra.mxu1 %v6021_v1  ;;  %v6751_v1 = vpack.c.bf16 %v595_v49, %v523_v42  ;;  %7487 = vst [vmem:[#allocation10_spill] sm:$0xff] %v6753_v21  ;;  %7488 = vst [vmem:[#allocation11_spill] sm:$0xff] %v6755_v22  ;;  %3333 = vmatprep.mubr.bf16.mxu1 %v6753_v21  ;;  %v652_v42 = vrot.slane %v6046_v32, %v6299_v55  ;;  %v6053_v32 = vld [vmem:[#allocation2 + $0x200] ss:$12 sps:$4 sm:$0xff]  }
  0xa2   :  { %5297 = vmatpush3.bf16.msra.mxu0 %v6035_v43  ;;  %5360 = vmatprep.subr.bf16.mxu1 %v6036_v61  ;;  %v6050_v43 = vld [vmem:[#allocation2 + $0x140] ss:$12 sps:$4 sm:$0xff]   ;;  %v724_v49 = vrot.slane %v6048_v36, %v6299_v55  ;;  %v740_v11 = vcombine.high %v717_v39, %v731_v40  ;;  %v667_v13 = vcombine.low %v645_v33, %v659_v34  ;;  %v6054_v33 = vld [vmem:[%s7455_s0 + $0x188] ss:$16 sps:$4 sm:$0xff]  }
  0xa3   :  { %7486 = vst [vmem:[#allocation9_spill] sm:$0xff] %v6751_v1  ;;  %v6051_v61 = vld [vmem:[#allocation2 + $0x80] ss:$12 sps:$4 sm:$0xff]   ;;  %5298 = vmatprep.subr.bf16.mxu0 %v6050_v43  ;;  %v670_v25 = vcombine.high %v652_v42, %v666_v45  ;;  %v6056_v34 = vld [vmem:[%s7455_s0 + $0x1a8] ss:$16 sps:$4 sm:$0xff]  }
  0xa4   :  { %v742_v28 = vcombine.high %v724_v49, %v738_v50  ;;  %v741_v29 = vcombine.low %v724_v49, %v738_v50  ;;  %v6064_v43 = vld [vmem:[%s7455_s0 + $0x1cc] ss:$16 sps:$4 sm:$0xff]   ;;  %v875_v49 = vrot.slane %v6060_v37, %v6299_v55  ;;  %v6068_v37 = vld [vmem:[#allocation2 + $0x2a8] ss:$12 sps:$4 sm:$0xff]  }
  0xa5   :  { %5361 = vmatpush3.bf16.msra.mxu1 %v6037_v17  ;;  %3221 = vmatmul.mubr.bf16.gmra.mxu0 %v6751_v1  ;;  %v739_v17 = vcombine.low %v717_v39, %v731_v40  ;;  %v6793_v1 = vpack.c.bf16 %v740_v11, %v668_v44  ;;  %v789_v39 = vrot.slane %v6054_v33, %v6299_v55  ;;  %v6062_v40 = vld [vmem:[%s7455_s0 + $0x18c] ss:$16 sps:$4 sm:$0xff]  }
  0xa6   :  { %5299 = vmatpush3.bf16.msra.mxu0 %v6051_v61  ;;  %5362 = vmatprep.subr.bf16.mxu1 %v6052_v24  ;;  %v6797_v35 = vpack.c.bf16 %v742_v28, %v670_v25  ;;  %v803_v44 = vrot.slane %v6056_v34, %v6299_v55  ;;  %v6065_v50 = vld [vmem:[%s7455_s0 + $0x1ec] ss:$16 sps:$4 sm:$0xff]   ;;  %v796_v61 = vrot.slane %v6062_v40, %v6299_v55 }
  0xa7   :  { %7489 = vst [vmem:[#allocation12_spill] sm:$0xff] %v6793_v1  ;;  %v6795_v21 = vpack.c.bf16 %v739_v17, %v667_v13  ;;  %3230 = vmatprep.mubr.bf16.mxu0 %v6793_v1  ;;  %v868_v13 = vrot.slane %v6064_v43, %v6299_v55  ;;  %v6066_v17 = vld [vmem:[#allocation2 + $0x128] ss:$12 sps:$4 sm:$0xff]   ;;  %v882_v28 = vrot.slane %v6065_v50, %v6299_v55  ;;  %v6078_v50 = vld [vmem:[%s7455_s0 + $0x20c] ss:$16 sps:$4 sm:$0xff]  }
  0xa8   :  { %3334 = vmatmul.mubr.bf16.gmra.mxu1 %v6755_v22  ;;  %v669_v22 = vcombine.low %v652_v42, %v666_v45  ;;  %7491 = vst [vmem:[#allocation14_spill] sm:$0xff] %v6797_v35  ;;  %v6063_v42 = vld [vmem:[%s7455_s0 + $0x1ac] ss:$16 sps:$4 sm:$0xff]   ;;  %v812_v24 = vcombine.high %v789_v39, %v803_v44  ;;  %5300 = vmatprep.subr.bf16.mxu0 %v6066_v17 }
  0xa9   :  { %7490 = vst [vmem:[#allocation13_spill] sm:$0xff] %v6795_v21  ;;  %5363 = vmatpush3.bf16.msra.mxu1 %v6053_v32  ;;  %3343 = vmatprep.mubr.bf16.mxu1 %v6797_v35  ;;  %v810_v11 = vrot.slane %v6063_v42, %v6299_v55  ;;  %v6067_v32 = vld [vmem:[#allocation2 + $0x68] ss:$12 sps:$4 sm:$0xff]   ;;  %v885_v40 = vcombine.low %v868_v13, %v882_v28 }
  0xaa   :  { %v6799_v36 = vpack.c.bf16 %v741_v29, %v669_v22  ;;  %v6058_v22 = vld [vmem:[%s7455_s0 + $0x1c8] ss:$16 sps:$4 sm:$0xff]   ;;  %v811_v29 = vcombine.low %v789_v39, %v803_v44  ;;  %5301 = vmatpush3.bf16.msra.mxu0 %v6067_v32  ;;  %5364 = vmatprep.subr.bf16.mxu1 %v6068_v37 }
  0xab   :  { %v861_v45 = vrot.slane %v6058_v22, %v6299_v55  ;;  %v814_v33 = vcombine.high %v796_v61, %v810_v11  ;;  %v813_v22 = vcombine.low %v796_v61, %v810_v11  ;;  %v6069_v42 = vld [vmem:[#allocation2 + $0x1e8] ss:$12 sps:$4 sm:$0xff]   ;;  %v6079_v61 = vld [vmem:[%s7455_s0 + $0x22c] ss:$16 sps:$4 sm:$0xff]  }
  0xac   :  { %7492 = vst [vmem:[#allocation15_spill] sm:$0xff] %v6799_v36  ;;  %v6070_v44 = vld [vmem:[%s7455_s0 + $0x208] ss:$16 sps:$4 sm:$0xff]   ;;  %v954_v32 = vrot.slane %v6079_v61, %v6299_v55 }
  0xad   :  { %3231 = vmatmul.mubr.bf16.gmra.mxu0 %v6795_v21  ;;  %v884_v25 = vcombine.high %v861_v45, %v875_v49  ;;  %v883_v34 = vcombine.low %v861_v45, %v875_v49  ;;  %v886_v21 = vcombine.high %v868_v13, %v882_v28  ;;  %v6844_v39 = vpack.c.bf16 %v885_v40, %v813_v22  ;;  %v6072_v45 = vld [vmem:[%s7455_s0 + $0x228] ss:$16 sps:$4 sm:$0xff]  }
  0xae   :  { %5365 = vmatpush3.bf16.msra.mxu1 %v6069_v42  ;;  %v6074_v49 = vld [vmem:[%s7455_s0 + $0x248] ss:$16 sps:$4 sm:$0xff]   ;;  %v933_v11 = vrot.slane %v6070_v44, %v6299_v55  ;;  %v947_v13 = vrot.slane %v6072_v45, %v6299_v55  ;;  %v6083_v42 = vld [vmem:[#allocation2 + $0x50] ss:$12 sps:$4 sm:$0xff]  }
  0xaf   :  { %v6839_v35 = vpack.c.bf16 %v883_v34, %v811_v29  ;;  %v6842_v43 = vpack.c.bf16 %v886_v21, %v814_v33  ;;  %7496 = vst [vmem:[#allocation19_spill] sm:$0xff] %v6844_v39  ;;  %v6076_v21 = vld [vmem:[%s7455_s0 + $0x268] ss:$16 sps:$4 sm:$0xff]   ;;  %v1005_v17 = vrot.slane %v6074_v49, %v6299_v55  ;;  %v940_v29 = vrot.slane %v6078_v50, %v6299_v55  ;;  %v6082_v33 = vld [vmem:[#allocation2 + $0x110] ss:$12 sps:$4 sm:$0xff]  }
  0xb0   :  { %3344 = vmatmul.mubr.bf16.gmra.mxu1 %v6799_v36  ;;  %v6837_v36 = vpack.c.bf16 %v884_v25, %v812_v24  ;;  %v6080_v24 = vld [vmem:[%s7455_s0 + $0x24c] ss:$16 sps:$4 sm:$0xff]   ;;  %v1019_v28 = vrot.slane %v6076_v21, %v6299_v55  ;;  %v956_v34 = vcombine.high %v933_v11, %v947_v13  ;;  %v955_v40 = vcombine.low %v933_v11, %v947_v13  ;;  %v6086_v11 = vld [vmem:[%s7455_s0 + $0x288] ss:$16 sps:$4 sm:$0xff]  }
  0xb1   :  { %7494 = vst [vmem:[#allocation17_spill] sm:$0xff] %v6839_v35  ;;  %7495 = vst [vmem:[#allocation18_spill] sm:$0xff] %v6842_v43  ;;  %3353 = vmatprep.mubr.bf16.mxu1 %v6842_v43  ;;  %v6081_v25 = vld [vmem:[%s7455_s0 + $0x26c] ss:$16 sps:$4 sm:$0xff]   ;;  %v1012_v22 = vrot.slane %v6080_v24, %v6299_v55  ;;  %v958_v45 = vcombine.high %v940_v29, %v954_v32  ;;  %5302 = vmatprep.subr.bf16.mxu0 %v6082_v33  ;;  %v6088_v13 = vld [vmem:[%s7455_s0 + $0x2a8] ss:$16 sps:$4 sm:$0xff]  }
  0xb2   :  { %7493 = vst [vmem:[#allocation16_spill] sm:$0xff] %v6837_v36  ;;  %3240 = vmatprep.mubr.bf16.mxu0 %v6837_v36  ;;  %v1026_v37 = vrot.slane %v6081_v25, %v6299_v55  ;;  %v1028_v44 = vcombine.high %v1005_v17, %v1019_v28  ;;  %v1027_v49 = vcombine.low %v1005_v17, %v1019_v28  ;;  %v6085_v50 = vld [vmem:[#allocation2 + $0x1d0] ss:$12 sps:$4 sm:$0xff]  }
  0xb3   :  { %5303 = vmatpush3.bf16.msra.mxu0 %v6083_v42  ;;  %v1077_v17 = vrot.slane %v6086_v11, %v6299_v55  ;;  %v1091_v28 = vrot.slane %v6088_v13, %v6299_v55  ;;  %v6097_v33 = vld [vmem:[%s7455_s0 + $0x2ec] ss:$16 sps:$4 sm:$0xff]  }
  0xb4   :  { %v1030_v43 = vcombine.high %v1012_v22, %v1026_v37  ;;  %v1029_v21 = vcombine.low %v1012_v22, %v1026_v37  ;;  %v6881_v36 = vpack.c.bf16 %v1028_v44, %v956_v34  ;;  %v6883_v61 = vpack.c.bf16 %v1027_v49, %v955_v40  ;;  %v6098_v40 = vld [vmem:[#allocation2 + $0xf8] ss:$12 sps:$4 sm:$0xff]  }
  0xb5   :  { %3241 = vmatmul.mubr.bf16.gmra.mxu0 %v6839_v35  ;;  %v6084_v35 = vld [vmem:[#allocation2 + $0x290] ss:$12 sps:$4 sm:$0xff]   ;;  %v1100_v42 = vcombine.high %v1077_v17, %v1091_v28  ;;  %v1170_v49 = vrot.slane %v6097_v33, %v6299_v55  ;;  %v1099_v11 = vcombine.low %v1077_v17, %v1091_v28  ;;  %5304 = vmatprep.subr.bf16.mxu0 %v6098_v40  ;;  %v6102_v17 = vld [vmem:[%s7455_s0 + $0x308] ss:$16 sps:$4 sm:$0xff]  }
  0xb6   :  { %7497 = vst [vmem:[#allocation20_spill] sm:$0xff] %v6881_v36  ;;  %7498 = vst [vmem:[#allocation21_spill] sm:$0xff] %v6883_v61  ;;  %5366 = vmatprep.subr.bf16.mxu1 %v6084_v35  ;;  %v6885_v24 = vpack.c.bf16 %v1030_v43, %v958_v45  ;;  %3250 = vmatprep.mubr.bf16.mxu0 %v6881_v36  ;;  %v6090_v35 = vld [vmem:[%s7455_s0 + $0x2c8] ss:$16 sps:$4 sm:$0xff]   ;;  %v6110_v33 = vld [vmem:[%s7455_s0 + $0x30c] ss:$16 sps:$4 sm:$0xff]  }
  0xb7   :  { %5367 = vmatpush3.bf16.msra.mxu1 %v6085_v50  ;;  %v6092_v43 = vld [vmem:[%s7455_s0 + $0x2e8] ss:$16 sps:$4 sm:$0xff]   ;;  %v1149_v34 = vrot.slane %v6090_v35, %v6299_v55 }
  0xb8   :  { %3354 = vmatmul.mubr.bf16.gmra.mxu1 %v6844_v39  ;;  %v957_v39 = vcombine.low %v940_v29, %v954_v32  ;;  %7499 = vst [vmem:[#allocation22_spill] sm:$0xff] %v6885_v24  ;;  %v6095_v29 = vld [vmem:[%s7455_s0 + $0x2ac] ss:$16 sps:$4 sm:$0xff]   ;;  %v1163_v22 = vrot.slane %v6092_v43, %v6299_v55  ;;  %v6104_v28 = vld [vmem:[%s7455_s0 + $0x328] ss:$16 sps:$4 sm:$0xff]  }
  0xb9   :  { %3363 = vmatprep.mubr.bf16.mxu1 %v6885_v24  ;;  %v6096_v32 = vld [vmem:[%s7455_s0 + $0x2cc] ss:$16 sps:$4 sm:$0xff]   ;;  %v1098_v44 = vrot.slane %v6095_v29, %v6299_v55 }
  0xba   :  { %v6887_v25 = vpack.c.bf16 %v1029_v21, %v957_v39  ;;  %v6094_v39 = vld [vmem:[%s7455_s0 + $0x28c] ss:$16 sps:$4 sm:$0xff]   ;;  %v1156_v45 = vrot.slane %v6096_v32, %v6299_v55  ;;  %v6099_v21 = vld [vmem:[#allocation2 + $0x38] ss:$12 sps:$4 sm:$0xff]   ;;  %v1172_v50 = vcombine.high %v1149_v34, %v1163_v22  ;;  %v1171_v13 = vcombine.low %v1149_v34, %v1163_v22 }
  0xbb   :  { %v1084_v37 = vrot.slane %v6094_v39, %v6299_v55  ;;  %5305 = vmatpush3.bf16.msra.mxu0 %v6099_v21  ;;  %v6101_v39 = vld [vmem:[#allocation2 + $0x1b8] ss:$12 sps:$4 sm:$0xff]   ;;  %v6111_v34 = vld [vmem:[%s7455_s0 + $0x32c] ss:$16 sps:$4 sm:$0xff]  }
  0xbc   :  { %7500 = vst [vmem:[#allocation23_spill] sm:$0xff] %v6887_v25  ;;  %v1174_v35 = vcombine.high %v1156_v45, %v1170_v49  ;;  %v1173_v43 = vcombine.low %v1156_v45, %v1170_v49  ;;  %v6925_v36 = vpack.c.bf16 %v1172_v50, %v1100_v42  ;;  %v6927_v1 = vpack.c.bf16 %v1171_v13, %v1099_v11  ;;  %v6112_v22 = vld [vmem:[%s7455_s0 + $0x34c] ss:$16 sps:$4 sm:$0xff]  }
  0xbd   :  { %3251 = vmatmul.mubr.bf16.gmra.mxu0 %v6883_v61  ;;  %v1102_v61 = vcombine.high %v1084_v37, %v1098_v44  ;;  %v1101_v24 = vcombine.low %v1084_v37, %v1098_v44  ;;  %v1235_v37 = vrot.slane %v6104_v28, %v6299_v55  ;;  %v6113_v44 = vld [vmem:[%s7455_s0 + $0x36c] ss:$16 sps:$4 sm:$0xff]   ;;  %v1228_v45 = vrot.slane %v6110_v33, %v6299_v55 }
  0xbe   :  { %7501 = vst [vmem:[#allocation24_spill] sm:$0xff] %v6925_v36  ;;  %7502 = vst [vmem:[#allocation25_spill] sm:$0xff] %v6927_v1  ;;  %3260 = vmatprep.mubr.bf16.mxu0 %v6925_v36  ;;  %v1242_v49 = vrot.slane %v6111_v34, %v6299_v55  ;;  %v1300_v21 = vrot.slane %v6112_v22, %v6299_v55  ;;  %v6114_v50 = vld [vmem:[#allocation2 + $0xe0] ss:$12 sps:$4 sm:$0xff]  }
  0xbf   :  { %v6929_v29 = vpack.c.bf16 %v1174_v35, %v1102_v61  ;;  %v6931_v32 = vpack.c.bf16 %v1173_v43, %v1101_v24  ;;  %v6106_v61 = vld [vmem:[%s7455_s0 + $0x348] ss:$16 sps:$4 sm:$0xff]   ;;  %v1314_v35 = vrot.slane %v6113_v44, %v6299_v55  ;;  %5306 = vmatprep.subr.bf16.mxu0 %v6114_v50  ;;  %v6117_v34 = vld [vmem:[#allocation2 + $0x1a0] ss:$12 sps:$4 sm:$0xff]  }
  0xc0   :  { %3364 = vmatmul.mubr.bf16.gmra.mxu1 %v6887_v25  ;;  %v6100_v25 = vld [vmem:[#allocation2 + $0x278] ss:$12 sps:$4 sm:$0xff]   ;;  %v1293_v40 = vrot.slane %v6106_v61, %v6299_v55  ;;  %v1245_v61 = vcombine.low %v1228_v45, %v1242_v49  ;;  %v6126_v44 = vld [vmem:[%s7455_s0 + $0x38c] ss:$16 sps:$4 sm:$0xff]  }
  0xc1   :  { %5368 = vmatprep.subr.bf16.mxu1 %v6100_v25  ;;  %7503 = vst [vmem:[#allocation26_spill] sm:$0xff] %v6929_v29  ;;  %7504 = vst [vmem:[#allocation27_spill] sm:$0xff] %v6931_v32  ;;  %3373 = vmatprep.mubr.bf16.mxu1 %v6929_v29  ;;  %v6108_v24 = vld [vmem:[%s7455_s0 + $0x368] ss:$16 sps:$4 sm:$0xff]   ;;  %v1221_v25 = vrot.slane %v6102_v17, %v6299_v55  ;;  %v1246_v17 = vcombine.high %v1228_v45, %v1242_v49  ;;  %v6127_v45 = vld [vmem:[%s7455_s0 + $0x3ac] ss:$16 sps:$4 sm:$0xff]  }
  0xc2   :  { %5369 = vmatpush3.bf16.msra.mxu1 %v6101_v39  ;;  %v1307_v42 = vrot.slane %v6108_v24, %v6299_v55  ;;  %v6115_v39 = vld [vmem:[#allocation2 + $0x20] ss:$12 sps:$4 sm:$0xff]   ;;  %v1317_v33 = vcombine.low %v1300_v21, %v1314_v35 }
  0xc3   :  { %v1244_v11 = vcombine.high %v1221_v25, %v1235_v37  ;;  %v1243_v43 = vcombine.low %v1221_v25, %v1235_v37  ;;  %v6116_v24 = vld [vmem:[#allocation2 + $0x260] ss:$12 sps:$4 sm:$0xff]   ;;  %5307 = vmatpush3.bf16.msra.mxu0 %v6115_v39  ;;  %v6118_v37 = vld [vmem:[%s7455_s0 + $0x388] ss:$16 sps:$4 sm:$0xff]   ;;  %v1386_v39 = vrot.slane %v6127_v45, %v6299_v55 }
  0xc4   :  { %v1316_v13 = vcombine.high %v1293_v40, %v1307_v42  ;;  %v1315_v28 = vcombine.low %v1293_v40, %v1307_v42  ;;  %5370 = vmatprep.subr.bf16.mxu1 %v6116_v24  ;;  %v6976_v25 = vpack.c.bf16 %v1317_v33, %v1245_v61  ;;  %v6120_v40 = vld [vmem:[%s7455_s0 + $0x3a8] ss:$16 sps:$4 sm:$0xff]   ;;  %v1365_v49 = vrot.slane %v6118_v37, %v6299_v55 }
  0xc5   :  { %3261 = vmatmul.mubr.bf16.gmra.mxu0 %v6927_v1  ;;  %v1318_v1 = vcombine.high %v1300_v21, %v1314_v35  ;;  %v6122_v42 = vld [vmem:[%s7455_s0 + $0x3c8] ss:$16 sps:$4 sm:$0xff]   ;;  %v1379_v21 = vrot.slane %v6120_v40, %v6299_v55 }
  0xc6   :  { %v6971_v29 = vpack.c.bf16 %v1315_v28, %v1243_v43  ;;  %7508 = vst [vmem:[#allocation31_spill] sm:$0xff] %v6976_v25  ;;  %5371 = vmatpush3.bf16.msra.mxu1 %v6117_v34  ;;  %v1437_v50 = vrot.slane %v6122_v42, %v6299_v55  ;;  %v1372_v43 = vrot.slane %v6126_v44, %v6299_v55  ;;  %v6131_v34 = vld [vmem:[#allocation2 + $0x8] ss:$12 sps:$4 sm:$0xff]  }
  0xc7   :  { %v6974_v22 = vpack.c.bf16 %v1318_v1, %v1246_v17  ;;  %v6124_v1 = vld [vmem:[%s7455_s0 + $0x3e8] ss:$16 sps:$4 sm:$0xff]   ;;  %v1388_v28 = vcombine.high %v1365_v49, %v1379_v21  ;;  %v1387_v33 = vcombine.low %v1365_v49, %v1379_v21  ;;  %v6136_v49 = vld [vmem:[#allocation2 + $0x5f0] ss:$12 sps:$4 sm:$0xff]  }
  0xc8   :  { %3374 = vmatmul.mubr.bf16.gmra.mxu1 %v6931_v32  ;;  %v6969_v32 = vpack.c.bf16 %v1316_v13, %v1244_v11  ;;  %7506 = vst [vmem:[#allocation29_spill] sm:$0xff] %v6971_v29  ;;  %v6128_v11 = vld [vmem:[%s7455_s0 + $0x3cc] ss:$16 sps:$4 sm:$0xff]   ;;  %v1451_v35 = vrot.slane %v6124_v1, %v6299_v55  ;;  %v6130_v17 = vld [vmem:[#allocation2 + $0xc8] ss:$12 sps:$4 sm:$0xff]   ;;  %v1390_v40 = vcombine.high %v1372_v43, %v1386_v39 }
  0xc9   :  { %7507 = vst [vmem:[#allocation30_spill] sm:$0xff] %v6974_v22  ;;  %3383 = vmatprep.mubr.bf16.mxu1 %v6974_v22  ;;  %v6129_v13 = vld [vmem:[%s7455_s0 + $0x3ec] ss:$16 sps:$4 sm:$0xff]   ;;  %v1444_v61 = vrot.slane %v6128_v11, %v6299_v55  ;;  %5308 = vmatprep.subr.bf16.mxu0 %v6130_v17  ;;  %v6133_v44 = vld [vmem:[#allocation2 + $0x188] ss:$12 sps:$4 sm:$0xff]  }
  0xca   :  { %7505 = vst [vmem:[#allocation28_spill] sm:$0xff] %v6969_v32  ;;  %3270 = vmatprep.mubr.bf16.mxu0 %v6969_v32  ;;  %v1458_v24 = vrot.slane %v6129_v13, %v6299_v55  ;;  %v1460_v37 = vcombine.high %v1437_v50, %v1451_v35  ;;  %v1459_v42 = vcombine.low %v1437_v50, %v1451_v35  ;;  %v6134_v11 = vld [vmem:[#allocation2 + $0x470] ss:$12 sps:$4 sm:$0xff]   ;;  %v6139_v21 = vld [vmem:[#allocation2 + $0x398] ss:$12 sps:$4 sm:$0xff]  }
  0xcb   :  { %5309 = vmatpush3.bf16.msra.mxu0 %v6131_v34  ;;  %v6140_v50 = vld [vmem:[#allocation2 + $0x5d8] ss:$12 sps:$4 sm:$0xff]   ;;  %v6142_v35 = vld [vmem:[#allocation2 + $0x440] ss:$12 sps:$4 sm:$0xff]   ;;  %v6152_v17 = vld [vmem:[#allocation2 + $0x590] ss:$12 sps:$4 sm:$0xff]  }
  0xcc   :  { %v1462_v22 = vcombine.high %v1444_v61, %v1458_v24  ;;  %v1461_v1 = vcombine.low %v1444_v61, %v1458_v24  ;;  %v7013_v32 = vpack.c.bf16 %v1460_v37, %v1388_v28  ;;  %v7015_v45 = vpack.c.bf16 %v1459_v42, %v1387_v33  ;;  %5422 = vmatprep.subr.bf16.mxu0 %v6134_v11  ;;  %v6141_v13 = vld [vmem:[#allocation2 + $0x518] ss:$12 sps:$4 sm:$0xff]   ;;  %v6151_v28 = vld [vmem:[#allocation2 + $0x350] ss:$12 sps:$4 sm:$0xff]   ;;  %v6158_v24 = vld [vmem:[#allocation2 + $0x3e0] ss:$12 sps:$4 sm:$0xff]  }
  0xcd   :  { %3271 = vmatmul.mubr.bf16.gmra.mxu0 %v6971_v29  ;;  %v6132_v29 = vld [vmem:[#allocation2 + $0x248] ss:$12 sps:$4 sm:$0xff]   ;;  %v6153_v61 = vld [vmem:[#allocation2 + $0x4d0] ss:$12 sps:$4 sm:$0xff]   ;;  %v6160_v33 = vld [vmem:[#allocation2 + $0x560] ss:$12 sps:$4 sm:$0xff]  }
  0xce   :  { %5372 = vmatprep.subr.bf16.mxu1 %v6132_v29  ;;  %v7017_v36 = vpack.c.bf16 %v1462_v22, %v1390_v40  ;;  %3280 = vmatprep.mubr.bf16.mxu0 %v7013_v32  ;;  %v6135_v29 = vld [vmem:[#allocation2 + $0x3b0] ss:$12 sps:$4 sm:$0xff]   ;;  %v6159_v34 = vld [vmem:[#allocation2 + $0x320] ss:$12 sps:$4 sm:$0xff]  }
  0xcf   :  { %5373 = vmatpush3.bf16.msra.mxu1 %v6133_v44  ;;  %v6137_v22 = vld [vmem:[#allocation2 + $0x530] ss:$12 sps:$4 sm:$0xff]   ;;  %v6161_v37 = vld [vmem:[#allocation2 + $0x4a0] ss:$12 sps:$4 sm:$0xff]  }
  0xd0   :  { %3384 = vmatmul.mubr.bf16.gmra.mxu1 %v6976_v25  ;;  %v1389_v25 = vcombine.low %v1372_v43, %v1386_v39  ;;  %5486 = vmatprep.subr.bf16.mxu1 %v6136_v49  ;;  %v6145_v43 = vld [vmem:[#allocation2 + $0x500] ss:$12 sps:$4 sm:$0xff]   ;;  %v6150_v39 = vld [vmem:[#allocation2 + $0x410] ss:$12 sps:$4 sm:$0xff]  }
  0xd1   :  { %3393 = vmatprep.mubr.bf16.mxu1 %v7017_v36  ;;  %v6166_v40 = vld [vmem:[#allocation4 + $0x78] sm:$0xff]  }
  0xd2   :  { %v7019_v55 = vpack.c.bf16 %v1461_v1, %v1389_v25  ;;  %v6138_v25 = vld [vmem:[#allocation2 + $0x458] ss:$12 sps:$4 sm:$0xff]  }
  0xd5   :  { %3281 = vmatmul.mubr.bf16.gmra.mxu0 %v7015_v45 }
  0xd6   :  { %3436 = vmatprep.mubr.bf16.mxu0 %v6348_v18  ;;  %v6144_v18 = vld [vmem:[#allocation2 + $0x5c0] ss:$12 sps:$4 sm:$0xff]  }
  0xd8   :  { %3394 = vmatmul.mubr.bf16.gmra.mxu1 %v7019_v55 }
  0xd9   :  { %3533 = vmatprep.mubr.bf16.mxu1 %v6351_v23  ;;  %v6143_v23 = vld [vmem:[#allocation2 + $0x380] ss:$12 sps:$4 sm:$0xff]  }
  0xdd   :  { %3437 = vmatmul.mubr.bf16.vlgmr.msra.gmra.mxu0 %v6391_v58  ;;  %v6146_v58 = vld [vmem:[#allocation2 + $0x428] ss:$12 sps:$4 sm:$0xff]  }
  0xde   :  { %5423 = vmatpush3.bf16.msra.mxu0 %v6135_v29  ;;  %3444 = vmatprep.mubr.bf16.mxu0 %v6395_v2  ;;  %v6147_v2 = vld [vmem:[#allocation2 + $0x368] ss:$12 sps:$4 sm:$0xff]  }
  0xdf   :  { %5424 = vmatprep.subr.bf16.mxu0 %v6138_v25 }
  0xe0   :  { %3534 = vmatmul.mubr.bf16.vlgmr.msra.gmra.mxu1 %v6393_v59  ;;  %v6148_v59 = vld [vmem:[#allocation2 + $0x5a8] ss:$12 sps:$4 sm:$0xff]  }
  0xe1   :  { %5487 = vmatpush3.bf16.msra.mxu1 %v6137_v22  ;;  %3541 = vmatprep.mubr.bf16.mxu1 %v6397_v3  ;;  %v6149_v3 = vld [vmem:[#allocation2 + $0x4e8] ss:$12 sps:$4 sm:$0xff]  }
  0xe2   :  { %5488 = vmatprep.subr.bf16.mxu1 %v6140_v50  ;;  %5425 = vmatpush3.bf16.msra.mxu0 %v6139_v21 }
  0xe3   :  { %5426 = vmatprep.subr.bf16.mxu0 %v6142_v35 }
  0xe5   :  { %5489 = vmatpush3.bf16.msra.mxu1 %v6141_v13  ;;  %3445 = vmatmul.mubr.bf16.gmra.mxu0 %v6413_v12  ;;  %v6154_v12 = vld [vmem:[#allocation2 + $0x3f8] ss:$12 sps:$4 sm:$0xff]  }
  0xe6   :  { %5490 = vmatprep.subr.bf16.mxu1 %v6144_v18  ;;  %3452 = vmatprep.mubr.bf16.mxu0 %v6439_v38  ;;  %v6155_v38 = vld [vmem:[#allocation2 + $0x338] ss:$12 sps:$4 sm:$0xff]  }
  0xe7   :  { %5427 = vmatpush3.bf16.msra.mxu0 %v6143_v23 }
  0xe8   :  { %3542 = vmatmul.mubr.bf16.gmra.mxu1 %v6436_v26  ;;  %5428 = vmatprep.subr.bf16.mxu0 %v6146_v58  ;;  %v6156_v26 = vld [vmem:[#allocation2 + $0x578] ss:$12 sps:$4 sm:$0xff]  }
  0xe9   :  { %3549 = vmatprep.mubr.bf16.mxu1 %v6443_v41  ;;  %5491 = vmatpush3.bf16.msra.mxu1 %v6145_v43  ;;  %v6157_v41 = vld [vmem:[#allocation2 + $0x4b8] ss:$12 sps:$4 sm:$0xff]  }
  0xea   :  { %5492 = vmatprep.subr.bf16.mxu1 %v6148_v59  ;;  %v6167_v59 = vld [vmem:[#allocation4 + $0x38] sm:$0xff]  }
  0xeb   :  { %5429 = vmatpush3.bf16.msra.mxu0 %v6147_v2 }
  0xec   :  { %5430 = vmatprep.subr.bf16.mxu0 %v6150_v39 }
  0xed   :  { %5493 = vmatpush3.bf16.msra.mxu1 %v6149_v3  ;;  %3453 = vmatmul.mubr.bf16.gmra.mxu0 %v6462_v54  ;;  %v6162_v54 = vld [vmem:[#allocation2 + $0x3c8] ss:$12 sps:$4 sm:$0xff]  }
  0xee   :  { %5494 = vmatprep.subr.bf16.mxu1 %v6152_v17  ;;  %3460 = vmatprep.mubr.bf16.mxu0 %v6485_v20  ;;  %v6163_v20 = vld [vmem:[#allocation2 + $0x308] ss:$12 sps:$4 sm:$0xff]  }
  0xef   :  { %5431 = vmatpush3.bf16.msra.mxu0 %v6151_v28  ;;  %v6168_v3 = vld [vmem:[#allocation4 + $0x70] sm:$0xff]  }
  0xf0   :  { %3550 = vmatmul.mubr.bf16.gmra.mxu1 %v6464_v56  ;;  %5432 = vmatprep.subr.bf16.mxu0 %v6154_v12  ;;  %v6164_v56 = vld [vmem:[#allocation2 + $0x548] ss:$12 sps:$4 sm:$0xff]  }
  0xf1   :  { %3557 = vmatprep.mubr.bf16.mxu1 %v6488_v27  ;;  %5495 = vmatpush3.bf16.msra.mxu1 %v6153_v61  ;;  %v6165_v27 = vld [vmem:[#allocation2 + $0x488] ss:$12 sps:$4 sm:$0xff]  }
  0xf2   :  { %5496 = vmatprep.subr.bf16.mxu1 %v6156_v26  ;;  %v7509_v61 = vld [vmem:[#allocation10_spill] sm:$0xff] }
  0xf3   :  { %5433 = vmatpush3.bf16.msra.mxu0 %v6155_v38  ;;  %v6169_v38 = vld [vmem:[#allocation4 + $0x30] sm:$0xff]  }
  0xf4   :  { %5434 = vmatprep.subr.bf16.mxu0 %v6158_v24  ;;  %v6170_v24 = vld [vmem:[#allocation4 + $0x68] sm:$0xff]  }
  0xf5   :  { %5497 = vmatpush3.bf16.msra.mxu1 %v6157_v41  ;;  %3461 = vmatmul.mubr.bf16.gmra.mxu0 %v6490_v30  ;;  %v1915_v30 = vsub.s32 0, %v6296_v48 }
  0xf6   :  { %5498 = vmatprep.subr.bf16.mxu1 %v6160_v33  ;;  %3468 = vmatprep.mubr.bf16.mxu0 %v6529_v10  ;;  %v7052_v10 = vld [vmem:[%s7457_s2] sm:$0x7] }
  0xf7   :  { %5435 = vmatpush3.bf16.msra.mxu0 %v6159_v34 }
  0xf8   :  { %3558 = vmatmul.mubr.bf16.gmra.mxu1 %v6492_v31  ;;  %5436 = vmatprep.subr.bf16.mxu0 %v6162_v54  ;;  %v1919_v31 = vsub.s32 1, %v6296_v48 }
  0xf9   :  { %3565 = vmatprep.mubr.bf16.mxu1 %v6531_v14  ;;  %5499 = vmatpush3.bf16.msra.mxu1 %v6161_v37  ;;  %v7059_v14 = vrot.slane %v7052_v10, %v1915_v30  ;;  %v6171_v37 = vld [vmem:[#allocation4 + $0x28] sm:$0xff]  }
  0xfa   :  { %5500 = vmatprep.subr.bf16.mxu1 %v6164_v56 }
  0xfb   :  { %5437 = vmatpush3.bf16.msra.mxu0 %v6163_v20  ;;  %v6172_v20 = vld [vmem:[#allocation4 + $0x60] sm:$0xff]  }
  0xfc   :  { %5550 = vmatprep.subr.bf16.mxu0 %v6166_v40 }
  0xfd   :  { %5501 = vmatpush3.bf16.msra.mxu1 %v6165_v27  ;;  %3469 = vmatmul.mubr.bf16.gmra.mxu0 %v6533_v15  ;;  %v7062_v15 = vrot.slane %v7052_v10, %v1919_v31  ;;  %v7510_v27 = vld [vmem:[#allocation9_spill] sm:$0xff]  ;;  %v7511_v31 = vld [vmem:[#allocation11_spill] sm:$0xff] }
  0xfe   :  { %3476 = vmatprep.mubr.bf16.mxu0 %v6573_v60 }
 0x100   :  { %3566 = vmatmul.mubr.bf16.gmra.mxu1 %v6535_v16 }
 0x101   :  { %3573 = vmatprep.mubr.bf16.mxu1 %v6578_v5 }
 0x105   :  { %3477 = vmatmul.mubr.bf16.gmra.mxu0 %v6575_v0 }
 0x106   :  { %3484 = vmatprep.mubr.bf16.mxu0 %v6617_v53 }
 0x108   :  { %3574 = vmatmul.mubr.bf16.gmra.mxu1 %v6580_v6 }
 0x109   :  { %3581 = vmatprep.mubr.bf16.mxu1 %v6621_v62 }
 0x10d   :  { %3485 = vmatmul.mubr.bf16.gmra.mxu0 %v6619_v57 }
 0x10e   :  { %3492 = vmatprep.mubr.bf16.mxu0 %v6661_v51 }
 0x110   :  { %3582 = vmatmul.mubr.bf16.gmra.mxu1 %v6623_v63 }
 0x111   :  { %3589 = vmatprep.mubr.bf16.mxu1 %v6665_v4 }
 0x115   :  { %3493 = vmatmul.mubr.bf16.gmra.mxu0 %v6663_v52 }
 0x116   :  { %3630 = vmatprep.mubr.bf16.mxu0 %v6705_v46 }
 0x118   :  { %3590 = vmatmul.mubr.bf16.gmra.mxu1 %v6667_v7 }
 0x119   :  { %3727 = vmatprep.mubr.bf16.mxu1 %v6710_v8 }
 0x11d   :  { %v2986_v16 = vpop.f32.mrf.mxu0  ;;  %3631 = vmatmul.mubr.bf16.vlgmr.msra.gmra.mxu0 %v6707_v47 }
 0x11e   :  { %v3099_v60 = vpop.f32.mrf.mxu1  ;;  %v2987_v5 = vadd.f32 %v2986_v16, %v7059_v14  ;;  %3638 = vmatprep.mubr.bf16.mxu0 %v6749_v19  ;;  %5551 = vmatpush3.bf16.msra.mxu0 %v6167_v59  ;;  %v7512_v16 = vld [vmem:[#allocation12_spill] sm:$0xff]  ;;  %v7514_v59 = vld [vmem:[#allocation13_spill] sm:$0xff] }
 0x11f   :  { %v2988_v42 = vpop.f32.mrf.mxu0  ;;  %5552 = vmatprep.subr.bf16.mxu0 %v6168_v3  ;;  %v7515_v3 = vld [vmem:[#allocation15_spill] sm:$0xff] }
 0x120   :  { %v3101_v1 = vpop.f32.mrf.mxu1  ;;  %v7066_v0 = vadd.f32 %v3099_v60, %v2987_v5  ;;  %v2989_v6 = vadd.f32 %v2988_v42, %v7062_v15  ;;  %3728 = vmatmul.mubr.bf16.vlgmr.msra.gmra.mxu1 %v6713_v9  ;;  %v7513_v42 = vld [vmem:[#allocation14_spill] sm:$0xff] }
 0x121   :  { %v7071_v53 = vpop.f32.mrf.mxu0  ;;  %3735 = vmatprep.mubr.bf16.mxu1 %v7509_v61  ;;  %v7517_v61 = vld [vmem:[#allocation18_spill] sm:$0xff] }
 0x122   :  { %v7073_v62 = vpop.f32.mrf.mxu1  ;;  %v7076_v44 = vadd.f32 %v3101_v1, %v2989_v6  ;;  %5553 = vmatpush3.bf16.msra.mxu0 %v6169_v38 }
 0x123   :  { %v7078_v11 = vpop.f32.mrf.mxu0  ;;  %5554 = vmatprep.subr.bf16.mxu0 %v6170_v24  ;;  %v6177_v24 = vld [vmem:[#allocation4 + $0x10] sm:$0xff]  }
 0x124   :  { %v7080_v49 = vpop.f32.mrf.mxu1 }
 0x125   :  { %v2996_v57 = vpop.f32.mrf.mxu0  ;;  %3639 = vmatmul.mubr.bf16.gmra.mxu0 %v7510_v27  ;;  %v6180_v27 = vld [vmem:[#allocation4 + $0x40] sm:$0xff]  }
 0x126   :  { %v3109_v29 = vpop.f32.mrf.mxu1  ;;  %v2997_v22 = vadd.f32 %v2996_v57, %v7059_v14  ;;  %3646 = vmatprep.mubr.bf16.mxu0 %v7512_v16  ;;  %5555 = vmatpush3.bf16.msra.mxu0 %v6171_v37  ;;  %v6173_v57 = vld [vmem:[#allocation4 + $0x20] sm:$0xff]  }
 0x127   :  { %v2998_v25 = vpop.f32.mrf.mxu0  ;;  %5556 = vmatprep.subr.bf16.mxu0 %v6172_v20 }
 0x128   :  { %v3111_v63 = vpop.f32.mrf.mxu1  ;;  %v7084_v51 = vadd.f32 %v3109_v29, %v2997_v22  ;;  %v2999_v21 = vadd.f32 %v2998_v25, %v7062_v15  ;;  %3736 = vmatmul.mubr.bf16.gmra.mxu1 %v7511_v31  ;;  %v6174_v25 = vld [vmem:[#allocation4 + $0x58] sm:$0xff]  }
 0x129   :  { %v3000_v4 = vpop.f32.mrf.mxu0  ;;  %3743 = vmatprep.mubr.bf16.mxu1 %v7513_v42 }
 0x12a   :  { %v3113_v50 = vpop.f32.mrf.mxu1  ;;  %v7090_v13 = vadd.f32 %v3111_v63, %v2999_v21  ;;  %v3001_v35 = vadd.f32 %v3000_v4, %v7059_v14  ;;  %5557 = vmatpush3.bf16.msra.mxu0 %v6173_v57  ;;  %v7521_v57 = vld [vmem:[#allocation22_spill] sm:$0xff] }
 0x12b   :  { %v7093_v18 = vpop.f32.mrf.mxu0  ;;  %5558 = vmatprep.subr.bf16.mxu0 %v6174_v25 }
 0x12c   :  { %v7095_v23 = vpop.f32.mrf.mxu1  ;;  %v7097_v52 = vadd.f32 %v3113_v50, %v3001_v35  ;;  %v6175_v35 = vld [vmem:[#allocation4 + $0x18] sm:$0xff]  }
 0x12d   :  { %v3006_v43 = vpop.f32.mrf.mxu0  ;;  %3647 = vmatmul.mubr.bf16.gmra.mxu0 %v7514_v59 }
 0x12e   :  { %v3119_v58 = vpop.f32.mrf.mxu1  ;;  %v3007_v7 = vadd.f32 %v3006_v43, %v7059_v14  ;;  %5559 = vmatpush3.bf16.msra.mxu0 %v6175_v35 }
 0x12f   :  { %v3008_v46 = vpop.f32.mrf.mxu0 }
 0x130   :  { %v3121_v2 = vpop.f32.mrf.mxu1  ;;  %v7101_v8 = vadd.f32 %v3119_v58, %v3007_v7  ;;  %v3009_v39 = vadd.f32 %v3008_v46, %v7062_v15  ;;  %v6176_v7 = vld [vmem:[#allocation4 + $0x50] sm:$0xff]   ;;  %3744 = vmatmul.mubr.bf16.gmra.mxu1 %v7515_v3 }
 0x131   :  { %v3010_v17 = vpop.f32.mrf.mxu0  ;;  %3751 = vmatprep.mubr.bf16.mxu1 %v7517_v61  ;;  %5560 = vmatprep.subr.bf16.mxu0 %v6176_v7  ;;  %v7523_v3 = vld [vmem:[#allocation23_spill] sm:$0xff] }
 0x132   :  { %v3123_v28 = vpop.f32.mrf.mxu1  ;;  %v7107_v12 = vadd.f32 %v3121_v2, %v3009_v39  ;;  %v3011_v26 = vadd.f32 %v3010_v17, %v7059_v14  ;;  %v7516_v39 = vld [vmem:[#allocation16_spill] sm:$0xff]  ;;  %5561 = vmatpush3.bf16.msra.mxu0 %v6177_v24 }
 0x133   :  { %v7110_v41 = vpop.f32.mrf.mxu0  ;;  %3654 = vmatprep.mubr.bf16.mxu0 %v7516_v39  ;;  %v7524_v39 = vld [vmem:[#allocation24_spill] sm:$0xff] }
 0x134   :  { %v7112_v47 = vpop.f32.mrf.mxu1  ;;  %v7114_v33 = vadd.f32 %v3123_v28, %v3011_v26 }
 0x135   :  { %v3016_v9 = vpop.f32.mrf.mxu0 }
 0x136   :  { %v3129_v19 = vpop.f32.mrf.mxu1  ;;  %v3017_v34 = vadd.f32 %v3016_v9, %v7059_v14 }
 0x137   :  { %v3018_v54 = vpop.f32.mrf.mxu0 }
 0x138   :  { %v3131_v56 = vpop.f32.mrf.mxu1  ;;  %v7118_v40 = vadd.f32 %v3129_v19, %v3017_v34  ;;  %v3019_v30 = vadd.f32 %v3018_v54, %v7062_v15  ;;  %v6178_v19 = vld [vmem:[#allocation4 + $0x48] sm:$0xff]  }
 0x139   :  { %v3020_v60 = vpop.f32.mrf.mxu0  ;;  %5562 = vmatprep.subr.bf16.mxu0 %v6178_v19 }
 0x13a   :  { %v3133_v5 = vpop.f32.mrf.mxu1  ;;  %v7124_v1 = vadd.f32 %v3131_v56, %v3019_v30  ;;  %v3021_v6 = vadd.f32 %v3020_v60, %v7059_v14  ;;  %v6179_v56 = vld [vmem:[#allocation4 + $0x8] sm:$0xff]   ;;  %v7518_v30 = vld [vmem:[#allocation17_spill] sm:$0xff]  ;;  %v7519_v60 = vld [vmem:[#allocation19_spill] sm:$0xff] }
 0x13b   :  { %v7127_v29 = vpop.f32.mrf.mxu0  ;;  %3655 = vmatmul.mubr.bf16.gmra.mxu0 %v7518_v30  ;;  %3752 = vmatmul.mubr.bf16.gmra.mxu1 %v7519_v60 }
 0x13c   :  { %v7129_v22 = vpop.f32.mrf.mxu1  ;;  %v7131_v63 = vadd.f32 %v3133_v5, %v3021_v6  ;;  %v7520_v5 = vld [vmem:[#allocation20_spill] sm:$0xff]  ;;  %3759 = vmatprep.mubr.bf16.mxu1 %v7521_v57  ;;  %5563 = vmatpush3.bf16.msra.mxu0 %v6179_v56 }
 0x13d   :  { %v3026_v21 = vpop.f32.mrf.mxu0  ;;  %3662 = vmatprep.mubr.bf16.mxu0 %v7520_v5  ;;  %5564 = vmatprep.subr.bf16.mxu0 %v6180_v27  ;;  %v7528_v57 = vld [vmem:[#allocation28_spill] sm:$0xff] }
 0x13e   :  { %v3139_v4 = vpop.f32.mrf.mxu1  ;;  %v3027_v50 = vadd.f32 %v3026_v21, %v7059_v14 }
 0x13f   :  { %v3028_v43 = vpop.f32.mrf.mxu0 }
 0x140   :  { %v3141_v58 = vpop.f32.mrf.mxu1  ;;  %v7135_v46 = vadd.f32 %v3139_v4, %v3027_v50  ;;  %v3029_v2 = vadd.f32 %v3028_v43, %v7062_v15  ;;  %v6181_v4 = vld [vmem:[#allocation4] sm:$0xff]  }
 0x141   :  { %v3030_v17 = vpop.f32.mrf.mxu0  ;;  %5565 = vmatpush3.bf16.msra.mxu0 %v6181_v4 }
 0x142   :  { %v3143_v28 = vpop.f32.mrf.mxu1  ;;  %v7141_v26 = vadd.f32 %v3141_v58, %v3029_v2  ;;  %v3031_v38 = vadd.f32 %v3030_v17, %v7059_v14  ;;  %v7522_v2 = vld [vmem:[#allocation21_spill] sm:$0xff] }
 0x143   :  { %v7144_v9 = vpop.f32.mrf.mxu0  ;;  %3663 = vmatmul.mubr.bf16.gmra.mxu0 %v7522_v2  ;;  %3760 = vmatmul.mubr.bf16.gmra.mxu1 %v7523_v3 }
 0x144   :  { %v7146_v34 = vadd.f32 %v3143_v28, %v3031_v38  ;;  %v7148_v37 = vpop.f32.mrf.mxu1  ;;  %3670 = vmatprep.mubr.bf16.mxu0 %v7524_v39  ;;  %v7525_v28 = vld [vmem:[#allocation26_spill] sm:$0xff] }
 0x145   :  { %v3036_v54 = vpop.f32.mrf.mxu0  ;;  %3767 = vmatprep.mubr.bf16.mxu1 %v7525_v28  ;;  %v7530_v28 = vld [vmem:[#allocation29_spill] sm:$0xff] }
 0x146   :  { %v3037_v20 = vadd.f32 %v3036_v54, %v7059_v14  ;;  %v3149_v31 = vpop.f32.mrf.mxu1 }
 0x147   :  { %v3038_v16 = vpop.f32.mrf.mxu0 }
 0x148   :  { %v7154_v42 = vadd.f32 %v3149_v31, %v3037_v20  ;;  %v3039_v6 = vadd.f32 %v3038_v16, %v7062_v15  ;;  %v3151_v25 = vpop.f32.mrf.mxu1  ;;  %v7526_v16 = vld [vmem:[#allocation25_spill] sm:$0xff] }
 0x149   :  { %v3040_v21 = vpop.f32.mrf.mxu0 }
 0x14a   :  { %v7158_v50 = vadd.f32 %v3151_v25, %v3039_v6  ;;  %v3041_v35 = vadd.f32 %v3040_v21, %v7059_v14  ;;  %v3153_v43 = vpop.f32.mrf.mxu1  ;;  %v7527_v6 = vld [vmem:[#allocation27_spill] sm:$0xff]  ;;  %v7529_v21 = vld [vmem:[#allocation30_spill] sm:$0xff] }
 0x14b   :  { %v7163_v7 = vpop.f32.mrf.mxu0  ;;  %3671 = vmatmul.mubr.bf16.gmra.mxu0 %v7526_v16  ;;  %3768 = vmatmul.mubr.bf16.gmra.mxu1 %v7527_v6  ;;  %v2991_v16 = vadd.f32 %v7071_v53, %v7059_v14 }
 0x14c   :  { %v7161_v58 = vadd.f32 %v3153_v43, %v3041_v35  ;;  %v7165_v59 = vpop.f32.mrf.mxu1  ;;  %3678 = vmatprep.mubr.bf16.mxu0 %v7528_v57  ;;  %3775 = vmatprep.mubr.bf16.mxu1 %v7529_v21 }
 0x14d   :  { %v3046_v17 = vpop.f32.mrf.mxu0 }
 0x14e   :  { %v3047_v61 = vadd.f32 %v3046_v17, %v7059_v14  ;;  %v3159_v38 = vpop.f32.mrf.mxu1 }
 0x14f   :  { %v3048_v24 = vpop.f32.mrf.mxu0 }
 0x150   :  { %v7172_v19 = vadd.f32 %v3159_v38, %v3047_v61  ;;  %v3049_v54 = vadd.f32 %v3048_v24, %v7062_v15  ;;  %v3161_v56 = vpop.f32.mrf.mxu1  ;;  %v7531_v38 = vld [vmem:[#allocation31_spill] sm:$0xff] }
 0x151   :  { %v3050_v20 = vpop.f32.mrf.mxu0 }
 0x152   :  { %v7175_v27 = vadd.f32 %v3161_v56, %v3049_v54  ;;  %v3051_v30 = vadd.f32 %v3050_v20, %v7059_v14  ;;  %v3163_v31 = vpop.f32.mrf.mxu1 }
 0x153   :  { %v7181_v5 = vpop.f32.mrf.mxu0  ;;  %3679 = vmatmul.mubr.bf16.gmra.mxu0 %v7530_v28  ;;  %3776 = vmatmul.mubr.bf16.gmra.mxu1 %v7531_v38 }
 0x154   :  { %v7179_v60 = vadd.f32 %v3163_v31, %v3051_v30  ;;  %v7185_v25 = vpop.f32.mrf.mxu1  ;;  %3686 = vmatprep.mubr.bf16.mxu0 %v7013_v32  ;;  %3783 = vmatprep.mubr.bf16.mxu1 %v7017_v36  ;;  %v6182_v31 = vld [vmem:[#allocation4 + $0xb8] sm:$0xff]   ;;  %v2993_v32 = vadd.f32 %v7078_v11, %v7062_v15  ;;  %v3104_v36 = vadd.f32 %v7073_v62, %v2991_v16 }
 0x155   :  { %v3056_v4 = vpop.f32.mrf.mxu0  ;;  %5646 = vmatprep.subr.bf16.mxu1 %v6182_v31 }
 0x156   :  { %v3057_v35 = vadd.f32 %v3056_v4, %v7059_v14  ;;  %v3169_v43 = vpop.f32.mrf.mxu1  ;;  %5647 = vmatpush3.bf16.msra.mxu1 %v6182_v31 }
 0x157   :  { %v3058_v2 = vpop.f32.mrf.mxu0 }
 0x158   :  { %v7189_v3 = vadd.f32 %v3169_v43, %v3057_v35  ;;  %v3059_v39 = vadd.f32 %v3058_v2, %v7062_v15  ;;  %v3171_v17 = vpop.f32.mrf.mxu1 }
 0x159   :  { %v3060_v61 = vpop.f32.mrf.mxu0 }
 0x15a   :  { %v7195_v24 = vadd.f32 %v3171_v17, %v3059_v39  ;;  %v3061_v54 = vadd.f32 %v3060_v61, %v7059_v14  ;;  %v3173_v56 = vpop.f32.mrf.mxu1  ;;  %v3106_v14 = vadd.f32 %v7080_v49, %v2993_v32  ;;  %v6183_v17 = vld [vmem:[#allocation4 + $0xb0] sm:$0xff]   ;;  %v3003_v49 = vadd.f32 %v7093_v18, %v7062_v15 }
 0x15b   :  { %v7199_v20 = vpop.f32.mrf.mxu0  ;;  %3687 = vmatmul.mubr.bf16.gmra.mxu0 %v7015_v45  ;;  %3784 = vmatmul.mubr.bf16.gmra.mxu1 %v7019_v55 }
 0x15c   :  { %v7201_v30 = vadd.f32 %v3173_v56, %v3061_v54  ;;  %v7205_v6 = vpop.f32.mrf.mxu1  ;;  %5648 = vmatprep.subr.bf16.mxu1 %v6183_v17 }
 0x15d   :  { %v3212_v57 = vpop.f32.mrf.mxu0  ;;  %5649 = vmatpush3.bf16.msra.mxu1 %v6183_v17 }
 0x15e   :  { %v3213_v53 = vadd.f32 %v3212_v57, %v7066_v0 }
 0x15f   :  { %v3214_v21 = vpop.f32.mrf.mxu0 }
 0x160   :  { %v3325_v4 = vpop.f32.mrf.mxu1  ;;  %v3215_v35 = vadd.f32 %v3214_v21, %v7076_v44  ;;  %v6184_v44 = vld [vmem:[#allocation4 + $0xa8] sm:$0xff]  }
 0x161   :  { %v3216_v43 = vpop.f32.mrf.mxu0  ;;  %v3326_v62 = vadd.f32 %v3325_v4, %v3213_v53  ;;  %5650 = vmatprep.subr.bf16.mxu1 %v6184_v44  ;;  %v6185_v53 = vld [vmem:[#allocation4 + $0xa0] sm:$0xff]  }
 0x162   :  { %v3327_v2 = vpop.f32.mrf.mxu1  ;;  %v3217_v39 = vadd.f32 %v3216_v43, %v3104_v36  ;;  %5651 = vmatpush3.bf16.msra.mxu1 %v6184_v44 }
 0x163   :  { %v3218_v28 = vpop.f32.mrf.mxu0  ;;  %v3328_v45 = vadd.f32 %v3327_v2, %v3215_v35  ;;  %v3792_v36 = vmax.f32 %v3326_v62, 0.0  ;;  %v3116_v2 = vadd.f32 %v7095_v23, %v3003_v49  ;;  %5652 = vmatprep.subr.bf16.mxu1 %v6185_v53  ;;  %v3013_v23 = vadd.f32 %v7110_v41, %v7062_v15 }
 0x164   :  { %v3329_v11 = vpop.f32.mrf.mxu1  ;;  %v3219_v61 = vadd.f32 %v3218_v28, %v3106_v14 }
 0x165   :  { %v3330_v38 = vadd.f32 %v3329_v11, %v3217_v39  ;;  %v3222_v56 = vpop.f32.mrf.mxu0  ;;  %v3793_v57 = vmax.f32 %v3328_v45, 0.0 }
 0x166   :  { %v3331_v55 = vpop.f32.mrf.mxu1  ;;  %v3223_v0 = vadd.f32 %v3222_v56, %v7084_v51  ;;  %5653 = vmatpush3.bf16.msra.mxu1 %v6185_v53 }
 0x167   :  { %v3332_v54 = vadd.f32 %v3331_v55, %v3219_v61  ;;  %v3795_v31 = vmax.f32 %v3330_v38, 0.0  ;;  %v3224_v21 = vpop.f32.mrf.mxu0 }
 0x168   :  { %v3335_v16 = vpop.f32.mrf.mxu1  ;;  %v3225_v35 = vadd.f32 %v3224_v21, %v7090_v13  ;;  %v6186_v13 = vld [vmem:[#allocation4 + $0x98] sm:$0xff]   ;;  %v6187_v21 = vld [vmem:[#allocation4 + $0x90] sm:$0xff]  }
 0x169   :  { %v3796_v32 = vmax.f32 %v3332_v54, 0.0  ;;  %v3226_v4 = vpop.f32.mrf.mxu0  ;;  %v3840_v39 = vpack.c.bf16 %v3795_v31, %v3792_v36  ;;  %v3336_v18 = vadd.f32 %v3335_v16, %v3223_v0  ;;  %5654 = vmatprep.subr.bf16.mxu1 %v6186_v13 }
 0x16a   :  { %v3337_v43 = vpop.f32.mrf.mxu1  ;;  %v3227_v17 = vadd.f32 %v3226_v4, %v7097_v52  ;;  %5655 = vmatpush3.bf16.msra.mxu1 %v6186_v13 }
 0x16b   :  { %v3841_v14 = vpack.c.bf16 %v3796_v32, %v3793_v57  ;;  %v3228_v28 = vpop.f32.mrf.mxu0  ;;  %v3338_v11 = vadd.f32 %v3337_v43, %v3225_v35  ;;  %v3798_v62 = vmax.f32 %v3336_v18, 0.0  ;;  %v3126_v43 = vadd.f32 %v7112_v47, %v3013_v23  ;;  %5656 = vmatprep.subr.bf16.mxu1 %v6187_v21 }
 0x16c   :  { %v3339_v51 = vpop.f32.mrf.mxu1  ;;  %v3229_v45 = vadd.f32 %v3228_v28, %v3116_v2  ;;  %v3023_v47 = vadd.f32 %v7127_v29, %v7062_v15 }
 0x16d   :  { %4095 = vmatprep.mubr.bf16.mxu0 %v3841_v14  ;;  %v3340_v61 = vadd.f32 %v3339_v51, %v3227_v17  ;;  %v3232_v56 = vpop.f32.mrf.mxu0  ;;  %v3799_v49 = vmax.f32 %v3338_v11, 0.0 }
 0x16e   :  { %v3341_v38 = vpop.f32.mrf.mxu1  ;;  %4096 = vmatmul.mubr.bf16.vlgmr.msra.gmra.mxu0 %v3840_v39  ;;  %v3233_v52 = vadd.f32 %v3232_v56, %v7101_v8  ;;  %5657 = vmatpush3.bf16.msra.mxu1 %v6187_v21 }
 0x16f   :  { %v3801_v55 = vmax.f32 %v3340_v61, 0.0  ;;  %v3342_v54 = vadd.f32 %v3341_v38, %v3229_v45  ;;  %v3234_v16 = vpop.f32.mrf.mxu0 }
 0x170   :  { %v3345_v44 = vpop.f32.mrf.mxu1  ;;  %v3235_v57 = vadd.f32 %v3234_v16, %v7107_v12  ;;  %v6188_v12 = vld [vmem:[#allocation4 + $0x88] sm:$0xff]  }
 0x171   :  { %v3843_v31 = vpack.c.bf16 %v3801_v55, %v3798_v62  ;;  %v3802_v0 = vmax.f32 %v3342_v54, 0.0  ;;  %v3236_v36 = vpop.f32.mrf.mxu0  ;;  %v3346_v4 = vadd.f32 %v3345_v44, %v3233_v52  ;;  %5658 = vmatprep.subr.bf16.mxu1 %v6188_v12  ;;  %v6189_v55 = vld [vmem:[#allocation4 + $0x80] sm:$0xff]   ;;  %v3136_v44 = vadd.f32 %v7129_v22, %v3023_v47 }
 0x172   :  { %v3347_v32 = vpop.f32.mrf.mxu1  ;;  %v3237_v41 = vadd.f32 %v3236_v36, %v7114_v33  ;;  %5659 = vmatpush3.bf16.msra.mxu1 %v6188_v12 }
 0x173   :  { %v3844_v35 = vpack.c.bf16 %v3802_v0, %v3799_v49  ;;  %v3238_v8 = vpop.f32.mrf.mxu0  ;;  %v3348_v53 = vadd.f32 %v3347_v32, %v3235_v57  ;;  %v3804_v17 = vmax.f32 %v3346_v4, 0.0  ;;  %5660 = vmatprep.subr.bf16.mxu1 %v6189_v55 }
 0x174   :  { %v3349_v14 = vpop.f32.mrf.mxu1  ;;  %v3239_v39 = vadd.f32 %v3238_v8, %v3126_v43 }
 0x175   :  { %4103 = vmatprep.mubr.bf16.mxu0 %v3844_v35  ;;  %v3350_v2 = vadd.f32 %v3349_v14, %v3237_v41  ;;  %v3242_v11 = vpop.f32.mrf.mxu0  ;;  %v3805_v61 = vmax.f32 %v3348_v53, 0.0  ;;  %v3033_v35 = vadd.f32 %v7144_v9, %v7062_v15 }
 0x176   :  { %v3351_v18 = vpop.f32.mrf.mxu1  ;;  %4104 = vmatmul.mubr.bf16.gmra.mxu0 %v3843_v31  ;;  %v3243_v33 = vadd.f32 %v3242_v11, %v7118_v40  ;;  %5661 = vmatpush3.bf16.msra.mxu1 %v6189_v55 }
 0x177   :  { %v3807_v51 = vmax.f32 %v3350_v2, 0.0  ;;  %v3352_v28 = vadd.f32 %v3351_v18, %v3239_v39  ;;  %v3244_v62 = vpop.f32.mrf.mxu0  ;;  %v3146_v12 = vadd.f32 %v7148_v37, %v3033_v35  ;;  %v3053_v35 = vadd.f32 %v7181_v5, %v7062_v15 }
 0x178   :  { %v3355_v13 = vpop.f32.mrf.mxu1  ;;  %v3245_v54 = vadd.f32 %v3244_v62, %v7124_v1 }
 0x179   :  { %v3846_v45 = vpack.c.bf16 %v3807_v51, %v3804_v17  ;;  %v3808_v38 = vmax.f32 %v3352_v28, 0.0  ;;  %v3246_v23 = vpop.f32.mrf.mxu0  ;;  %v3356_v49 = vadd.f32 %v3355_v13, %v3243_v33  ;;  %v3043_v13 = vadd.f32 %v7163_v7, %v7062_v15 }
 0x17a   :  { %v3357_v56 = vpop.f32.mrf.mxu1  ;;  %v3247_v29 = vadd.f32 %v3246_v23, %v7131_v63 }
 0x17b   :  { %v3847_v52 = vpack.c.bf16 %v3808_v38, %v3805_v61  ;;  %v3248_v31 = vpop.f32.mrf.mxu0  ;;  %v3358_v0 = vadd.f32 %v3357_v56, %v3245_v54  ;;  %v3810_v21 = vmax.f32 %v3356_v49, 0.0 }
 0x17c   :  { %v3359_v40 = vpop.f32.mrf.mxu1  ;;  %v3249_v57 = vadd.f32 %v3248_v31, %v3136_v44 }
 0x17d   :  { %4111 = vmatprep.mubr.bf16.mxu0 %v3847_v52  ;;  %v3360_v16 = vadd.f32 %v3359_v40, %v3247_v29  ;;  %v3252_v43 = vpop.f32.mrf.mxu0  ;;  %v3811_v22 = vmax.f32 %v3358_v0, 0.0  ;;  %v3156_v29 = vadd.f32 %v7165_v59, %v3043_v13 }
 0x17e   :  { %4112 = vmatmul.mubr.bf16.gmra.mxu0 %v3846_v45  ;;  %v3361_v32 = vpop.f32.mrf.mxu1  ;;  %v3253_v63 = vadd.f32 %v3252_v43, %v7135_v46 }
 0x17f   :  { %v3813_v1 = vmax.f32 %v3360_v16, 0.0  ;;  %v3362_v36 = vadd.f32 %v3361_v32, %v3249_v57  ;;  %v3254_v8 = vpop.f32.mrf.mxu0 }
 0x180   :  { %v3365_v14 = vpop.f32.mrf.mxu1  ;;  %v3255_v53 = vadd.f32 %v3254_v8, %v7141_v26 }
 0x181   :  { %v3849_v4 = vpack.c.bf16 %v3813_v1, %v3810_v21  ;;  %v3814_v41 = vmax.f32 %v3362_v36, 0.0  ;;  %v3256_v18 = vpop.f32.mrf.mxu0  ;;  %v3366_v17 = vadd.f32 %v3365_v14, %v3253_v63 }
 0x182   :  { %v3367_v2 = vpop.f32.mrf.mxu1  ;;  %v3257_v51 = vadd.f32 %v3256_v18, %v7146_v34 }
 0x183   :  { %v3850_v39 = vpack.c.bf16 %v3814_v41, %v3811_v22  ;;  %v3258_v9 = vpop.f32.mrf.mxu0  ;;  %v3368_v11 = vadd.f32 %v3367_v2, %v3255_v53  ;;  %v3816_v61 = vmax.f32 %v3366_v17, 0.0  ;;  %v3166_v2 = vadd.f32 %v7185_v25, %v3053_v35 }
 0x184   :  { %v3369_v28 = vpop.f32.mrf.mxu1  ;;  %v3259_v33 = vadd.f32 %v3258_v9, %v3146_v12 }
 0x185   :  { %4119 = vmatprep.mubr.bf16.mxu0 %v3850_v39  ;;  %v3370_v47 = vadd.f32 %v3369_v28, %v3257_v51  ;;  %v3262_v26 = vpop.f32.mrf.mxu0  ;;  %v3817_v55 = vmax.f32 %v3368_v11, 0.0 }
 0x186   :  { %4120 = vmatmul.mubr.bf16.gmra.mxu0 %v3849_v4  ;;  %v3371_v46 = vpop.f32.mrf.mxu1  ;;  %v3263_v37 = vadd.f32 %v3262_v26, %v7154_v42 }
 0x187   :  { %v3819_v45 = vmax.f32 %v3370_v47, 0.0  ;;  %v3372_v38 = vadd.f32 %v3371_v46, %v3259_v33  ;;  %v3264_v56 = vpop.f32.mrf.mxu0 }
 0x188   :  { %v3375_v62 = vpop.f32.mrf.mxu1  ;;  %v3265_v23 = vadd.f32 %v3264_v56, %v7158_v50 }
 0x189   :  { %v3852_v34 = vpack.c.bf16 %v3819_v45, %v3816_v61  ;;  %v3820_v54 = vmax.f32 %v3372_v38, 0.0  ;;  %v3266_v49 = vpop.f32.mrf.mxu0  ;;  %v3376_v40 = vadd.f32 %v3375_v62, %v3263_v37 }
 0x18a   :  { %v3377_v52 = vpop.f32.mrf.mxu1  ;;  %v3267_v31 = vadd.f32 %v3266_v49, %v7161_v58 }
 0x18b   :  { %v3853_v44 = vpack.c.bf16 %v3820_v54, %v3817_v55  ;;  %v3268_v16 = vpop.f32.mrf.mxu0  ;;  %v3378_v7 = vadd.f32 %v3377_v52, %v3265_v23  ;;  %v3822_v21 = vmax.f32 %v3376_v40, 0.0 }
 0x18c   :  { %v3379_v0 = vpop.f32.mrf.mxu1  ;;  %v3269_v57 = vadd.f32 %v3268_v16, %v3156_v29 }
 0x18d   :  { %4127 = vmatprep.mubr.bf16.mxu0 %v3853_v44  ;;  %v3380_v42 = vadd.f32 %v3379_v0, %v3267_v31  ;;  %v3272_v50 = vpop.f32.mrf.mxu0  ;;  %v3823_v43 = vmax.f32 %v3378_v7, 0.0 }
 0x18e   :  { %v3381_v32 = vpop.f32.mrf.mxu1  ;;  %4128 = vmatmul.mubr.bf16.gmra.mxu0 %v3852_v34  ;;  %v3273_v59 = vadd.f32 %v3272_v50, %v7172_v19 }
 0x18f   :  { %v3825_v1 = vmax.f32 %v3380_v42, 0.0  ;;  %v3382_v36 = vadd.f32 %v3381_v32, %v3269_v57  ;;  %v3274_v41 = vpop.f32.mrf.mxu0 }
 0x190   :  { %v3385_v4 = vpop.f32.mrf.mxu1  ;;  %v3275_v63 = vadd.f32 %v3274_v41, %v7175_v27  ;;  %v3063_v27 = vadd.f32 %v7199_v20, %v7062_v15  ;;  %v1923_v15 = vsub.s32 2, %v6296_v48 }
 0x191   :  { %v3855_v22 = vpack.c.bf16 %v3825_v1, %v3822_v21  ;;  %v3826_v58 = vmax.f32 %v3382_v36, 0.0  ;;  %v3276_v53 = vpop.f32.mrf.mxu0  ;;  %v3386_v39 = vadd.f32 %v3385_v4, %v3273_v59 }
 0x192   :  { %v3387_v8 = vpop.f32.mrf.mxu1  ;;  %v3277_v18 = vadd.f32 %v3276_v53, %v7179_v60  ;;  %v3176_v55 = vadd.f32 %v7205_v6, %v3063_v27  ;;  %v7259_v6 = vrot.slane %v7052_v10, %v1923_v15 }
 0x193   :  { %v3856_v14 = vpack.c.bf16 %v3826_v58, %v3823_v43  ;;  %v3278_v17 = vpop.f32.mrf.mxu0  ;;  %v3388_v5 = vadd.f32 %v3387_v8, %v3275_v63  ;;  %v3828_v9 = vmax.f32 %v3386_v39, 0.0 }
 0x194   :  { %v3389_v12 = vpop.f32.mrf.mxu1  ;;  %v3279_v51 = vadd.f32 %v3278_v17, %v3166_v2 }
 0x195   :  { %4135 = vmatprep.mubr.bf16.mxu0 %v3856_v14  ;;  %v3390_v19 = vadd.f32 %v3389_v12, %v3277_v18  ;;  %v3282_v33 = vpop.f32.mrf.mxu0  ;;  %v3829_v46 = vmax.f32 %v3388_v5, 0.0 }
 0x196   :  { %4136 = vmatmul.mubr.bf16.gmra.mxu0 %v3855_v22  ;;  %v3391_v28 = vpop.f32.mrf.mxu1  ;;  %v3283_v60 = vadd.f32 %v3282_v33, %v7189_v3 }
 0x197   :  { %v3831_v11 = vmax.f32 %v3390_v19, 0.0  ;;  %v3392_v47 = vadd.f32 %v3391_v28, %v3279_v51  ;;  %v3284_v38 = vpop.f32.mrf.mxu0 }
 0x198   :  { %v3395_v45 = vpop.f32.mrf.mxu1  ;;  %v3285_v13 = vadd.f32 %v3284_v38, %v7195_v24 }
 0x199   :  { %v3858_v25 = vpack.c.bf16 %v3831_v11, %v3828_v9  ;;  %v3832_v61 = vmax.f32 %v3392_v47, 0.0  ;;  %v3286_v62 = vpop.f32.mrf.mxu0  ;;  %v3396_v34 = vadd.f32 %v3395_v45, %v3283_v60 }
 0x19a   :  { %v3397_v37 = vpop.f32.mrf.mxu1  ;;  %v3287_v54 = vadd.f32 %v3286_v62, %v7201_v30 }
 0x19b   :  { %v3859_v26 = vpack.c.bf16 %v3832_v61, %v3829_v46  ;;  %v3288_v20 = vpop.f32.mrf.mxu0  ;;  %v3398_v23 = vadd.f32 %v3397_v37, %v3285_v13  ;;  %v3834_v29 = vmax.f32 %v3396_v34, 0.0 }
 0x19c   :  { %v3399_v56 = vpop.f32.mrf.mxu1  ;;  %v3289_v52 = vadd.f32 %v3288_v20, %v3176_v55 }
 0x19d   :  { %4143 = vmatprep.mubr.bf16.mxu0 %v3859_v26  ;;  %v3400_v3 = vadd.f32 %v3399_v56, %v3287_v54  ;;  %v5310_v49 = vpop.f32.mrf.mxu0  ;;  %v3835_v30 = vmax.f32 %v3398_v23, 0.0 }
 0x19e   :  { %4144 = vmatmul.mubr.bf16.gmra.mxu0 %v3858_v25  ;;  %v3401_v44 = vpop.f32.mrf.mxu1 }
 0x19f   :  { %v3837_v24 = vmax.f32 %v3400_v3, 0.0  ;;  %v3402_v40 = vadd.f32 %v3401_v44, %v3289_v52  ;;  %v5311_v0 = vpop.f32.mrf.mxu0 }
 0x1a0   :  { %v5374_v31 = vpop.f32.mrf.mxu1  ;;  %v5312_v42 = vadd.f32 %v5311_v0, %v5310_v49 }
 0x1a1   :  { %v3861_v16 = vpack.c.bf16 %v3837_v24, %v3834_v29  ;;  %v3838_v7 = vmax.f32 %v3402_v40, 0.0  ;;  %v7261_v21 = vpop.f32.mrf.mxu0 }
 0x1a2   :  { %v5375_v57 = vpop.f32.mrf.mxu1  ;;  %v3439_v36 = vadd.f32 %v5312_v42, %v7259_v6 }
 0x1a3   :  { %v5376_v32 = vadd.f32 %v5375_v57, %v5374_v31  ;;  %v3862_v1 = vpack.c.bf16 %v3838_v7, %v3835_v30  ;;  %v7266_v35 = vpop.f32.mrf.mxu0 }
 0x1a4   :  { %v7264_v50 = vpop.f32.mrf.mxu1 }
 0x1a5   :  { %v7268_v59 = vadd.f32 %v5376_v32, %v3439_v36  ;;  %4151 = vmatprep.mubr.bf16.mxu0 %v3862_v1  ;;  %v5316_v43 = vpop.f32.mrf.mxu0 }
 0x1a6   :  { %v7270_v10 = vpop.f32.mrf.mxu1  ;;  %4152 = vmatmul.mubr.bf16.gmra.mxu0 %v3861_v16 }
 0x1a7   :  { %v5317_v58 = vpop.f32.mrf.mxu0 }
 0x1a8   :  { %v5380_v22 = vpop.f32.mrf.mxu1  ;;  %v5318_v4 = vadd.f32 %v5317_v58, %v5316_v43 }
 0x1a9   :  { %v7272_v14 = vpop.f32.mrf.mxu0 }
 0x1aa   :  { %v5381_v41 = vpop.f32.mrf.mxu1  ;;  %v3447_v8 = vadd.f32 %v5318_v4, %v7259_v6 }
 0x1ab   :  { %v5382_v63 = vadd.f32 %v5381_v41, %v5380_v22  ;;  %v7277_v2 = vpop.f32.mrf.mxu0 }
 0x1ac   :  { %v7275_v53 = vpop.f32.mrf.mxu1 }
 0x1ad   :  { %v7279_v39 = vadd.f32 %v5382_v63, %v3447_v8  ;;  %v5322_v12 = vpop.f32.mrf.mxu0 }
 0x1ae   :  { %v7281_v18 = vpop.f32.mrf.mxu1 }
 0x1af   :  { %v5323_v5 = vpop.f32.mrf.mxu0 }
 0x1b0   :  { %v5386_v17 = vpop.f32.mrf.mxu1  ;;  %v5324_v19 = vadd.f32 %v5323_v5, %v5322_v12 }
 0x1b1   :  { %v7283_v9 = vpop.f32.mrf.mxu0 }
 0x1b2   :  { %v5387_v51 = vpop.f32.mrf.mxu1  ;;  %v3455_v11 = vadd.f32 %v5324_v19, %v7259_v6 }
 0x1b3   :  { %v5388_v28 = vadd.f32 %v5387_v51, %v5386_v17  ;;  %v7288_v27 = vpop.f32.mrf.mxu0 }
 0x1b4   :  { %v7286_v47 = vpop.f32.mrf.mxu1 }
 0x1b5   :  { %v7290_v33 = vadd.f32 %v5388_v28, %v3455_v11  ;;  %v5328_v25 = vpop.f32.mrf.mxu0 }
 0x1b6   :  { %v7292_v46 = vpop.f32.mrf.mxu1 }
 0x1b7   :  { %v5329_v60 = vpop.f32.mrf.mxu0 }
 0x1b8   :  { %v5392_v61 = vpop.f32.mrf.mxu1  ;;  %v5330_v45 = vadd.f32 %v5329_v60, %v5328_v25 }
 0x1b9   :  { %v7294_v13 = vpop.f32.mrf.mxu0 }
 0x1ba   :  { %v5393_v38 = vpop.f32.mrf.mxu1  ;;  %v3463_v37 = vadd.f32 %v5330_v45, %v7259_v6 }
 0x1bb   :  { %v5394_v26 = vadd.f32 %v5393_v38, %v5392_v61  ;;  %v7299_v55 = vpop.f32.mrf.mxu0 }
 0x1bc   :  { %v7297_v62 = vpop.f32.mrf.mxu1 }
 0x1bd   :  { %v7301_v34 = vadd.f32 %v5394_v26, %v3463_v37  ;;  %v5334_v56 = vpop.f32.mrf.mxu0 }
 0x1be   :  { %v7303_v54 = vpop.f32.mrf.mxu1 }
 0x1bf   :  { %v5335_v20 = vpop.f32.mrf.mxu0 }
 0x1c0   :  { %v5398_v15 = vpop.f32.mrf.mxu1  ;;  %v5336_v23 = vadd.f32 %v5335_v20, %v5334_v56 }
 0x1c1   :  { %v7305_v44 = vpop.f32.mrf.mxu0 }
 0x1c2   :  { %v5399_v3 = vpop.f32.mrf.mxu1  ;;  %v3471_v49 = vadd.f32 %v5336_v23, %v7259_v6 }
 0x1c3   :  { %v5400_v52 = vadd.f32 %v5399_v3, %v5398_v15  ;;  %v7310_v24 = vpop.f32.mrf.mxu0  ;;  %v5315_v3 = vadd.f32 %v7266_v35, %v7261_v21  ;;  %v5321_v35 = vadd.f32 %v7277_v2, %v7272_v14 }
 0x1c4   :  { %v7308_v29 = vpop.f32.mrf.mxu1 }
 0x1c5   :  { %v7312_v40 = vadd.f32 %v5400_v52, %v3471_v49  ;;  %v5340_v0 = vpop.f32.mrf.mxu0 }
 0x1c6   :  { %v7314_v31 = vpop.f32.mrf.mxu1 }
 0x1c7   :  { %v5341_v16 = vpop.f32.mrf.mxu0 }
 0x1c8   :  { %v5404_v30 = vpop.f32.mrf.mxu1  ;;  %v5342_v7 = vadd.f32 %v5341_v16, %v5340_v0 }
 0x1c9   :  { %v7316_v32 = vpop.f32.mrf.mxu0 }
 0x1ca   :  { %v5405_v42 = vpop.f32.mrf.mxu1  ;;  %v3479_v1 = vadd.f32 %v5342_v7, %v7259_v6  ;;  %v3442_v7 = vadd.f32 %v5315_v3, %v7259_v6 }
 0x1cb   :  { %v5406_v57 = vadd.f32 %v5405_v42, %v5404_v30  ;;  %v7321_v43 = vpop.f32.mrf.mxu0 }
 0x1cc   :  { %v7319_v36 = vpop.f32.mrf.mxu1 }
 0x1cd   :  { %v7323_v22 = vadd.f32 %v5406_v57, %v3479_v1  ;;  %v5346_v4 = vpop.f32.mrf.mxu0 }
 0x1ce   :  { %v7325_v58 = vpop.f32.mrf.mxu1 }
 0x1cf   :  { %v5347_v63 = vpop.f32.mrf.mxu0 }
 0x1d0   :  { %v5410_v41 = vpop.f32.mrf.mxu1  ;;  %v5348_v8 = vadd.f32 %v5347_v63, %v5346_v4  ;;  %v5379_v4 = vadd.f32 %v7270_v10, %v7264_v50 }
 0x1d1   :  { %v7327_v5 = vpop.f32.mrf.mxu0 }
 0x1d2   :  { %v5411_v12 = vpop.f32.mrf.mxu1  ;;  %v3487_v19 = vadd.f32 %v5348_v8, %v7259_v6  ;;  %v3539_v21 = vadd.f32 %v5379_v4, %v3442_v7  ;;  %v5327_v7 = vadd.f32 %v7288_v27, %v7283_v9 }
 0x1d3   :  { %v5412_v17 = vadd.f32 %v5411_v12, %v5410_v41  ;;  %v7332_v28 = vpop.f32.mrf.mxu0 }
 0x1d4   :  { %v7330_v51 = vpop.f32.mrf.mxu1 }
 0x1d5   :  { %v7334_v11 = vadd.f32 %v5412_v17, %v3487_v19  ;;  %v5352_v61 = vpop.f32.mrf.mxu0 }
 0x1d6   :  { %v7336_v25 = vpop.f32.mrf.mxu1 }
 0x1d7   :  { %v5353_v45 = vpop.f32.mrf.mxu0 }
 0x1d8   :  { %v5416_v60 = vpop.f32.mrf.mxu1  ;;  %v5354_v38 = vadd.f32 %v5353_v45, %v5352_v61 }
 0x1d9   :  { %v7338_v56 = vpop.f32.mrf.mxu0 }
 0x1da   :  { %v5417_v26 = vpop.f32.mrf.mxu1  ;;  %v3495_v15 = vadd.f32 %v5354_v38, %v7259_v6 }
 0x1db   :  { %v5418_v37 = vadd.f32 %v5417_v26, %v5416_v60  ;;  %v7343_v23 = vpop.f32.mrf.mxu0 }
 0x1dc   :  { %v7341_v20 = vpop.f32.mrf.mxu1 }
 0x1dd   :  { %v7347_v52 = vadd.f32 %v5418_v37, %v3495_v15  ;;  %v5438_v0 = vpop.f32.mrf.mxu0  ;;  %v3450_v15 = vadd.f32 %v5321_v35, %v7259_v6 }
 0x1de   :  { %v7349_v49 = vpop.f32.mrf.mxu1 }
 0x1df   :  { %v5439_v16 = vpop.f32.mrf.mxu0 }
 0x1e0   :  { %v5502_v30 = vpop.f32.mrf.mxu1  ;;  %v5440_v42 = vadd.f32 %v5439_v16, %v5438_v0  ;;  %v5385_v0 = vadd.f32 %v7281_v18, %v7275_v53 }
 0x1e1   :  { %v5441_v1 = vpop.f32.mrf.mxu0 }
 0x1e2   :  { %v5503_v57 = vpop.f32.mrf.mxu1  ;;  %v3633_v41 = vadd.f32 %v5440_v42, %v7268_v59 }
 0x1e3   :  { %v5442_v8 = vpop.f32.mrf.mxu0  ;;  %v5504_v12 = vadd.f32 %v5503_v57, %v5502_v30  ;;  %v3547_v57 = vadd.f32 %v5385_v0, %v3450_v15 }
 0x1e4   :  { %v5505_v63 = vpop.f32.mrf.mxu1  ;;  %v5443_v17 = vadd.f32 %v5442_v8, %v5441_v1  ;;  %v6190_v8 = vld [vmem:[%s7460_s5 + $0x38] sm:$0xff]  }
 0x1e5   :  { %v5444_v61 = vpop.f32.mrf.mxu0  ;;  %v3730_v60 = vadd.f32 %v5504_v12, %v3633_v41  ;;  %5678 = vmatprep.subr.bf16.mxu1 %v6190_v8 }
 0x1e6   :  { %v5506_v19 = vpop.f32.mrf.mxu1  ;;  %v3636_v45 = vadd.f32 %v5443_v17, %v3539_v21 }
 0x1e7   :  { %v5507_v38 = vadd.f32 %v5506_v19, %v5505_v63  ;;  %v5445_v37 = vpop.f32.mrf.mxu0  ;;  %v3794_v16 = vmax.f32 %v3730_v60, 0.0 }
 0x1e8   :  { %v5508_v26 = vpop.f32.mrf.mxu1  ;;  %v5446_v10 = vadd.f32 %v5445_v37, %v5444_v61  ;;  %v5391_v61 = vadd.f32 %v7292_v46, %v7286_v47 }
 0x1e9   :  { %v3733_v50 = vadd.f32 %v5507_v38, %v3636_v45  ;;  %v5447_v3 = vpop.f32.mrf.mxu0 }
 0x1ea   :  { %v5509_v59 = vpop.f32.mrf.mxu1  ;;  %v3641_v2 = vadd.f32 %v5446_v10, %v7279_v39  ;;  %v3458_v39 = vadd.f32 %v5327_v7, %v7259_v6  ;;  %v5333_v10 = vadd.f32 %v7299_v55, %v7294_v13 }
 0x1eb   :  { %v3797_v14 = vmax.f32 %v3733_v50, 0.0  ;;  %v5448_v42 = vpop.f32.mrf.mxu0  ;;  %v5510_v1 = vadd.f32 %v5509_v59, %v5508_v26 }
 0x1ec   :  { %v5511_v30 = vpop.f32.mrf.mxu1  ;;  %v5449_v4 = vadd.f32 %v5448_v42, %v5447_v3  ;;  %v3555_v15 = vadd.f32 %v5391_v61, %v3458_v39  ;;  %v3466_v42 = vadd.f32 %v5333_v10, %v7259_v6 }
 0x1ed   :  { %v3842_v63 = vpack.c.bf16 %v3797_v14, %v3794_v16  ;;  %v5450_v21 = vpop.f32.mrf.mxu0  ;;  %v3738_v53 = vadd.f32 %v5510_v1, %v3641_v2  ;;  %v6191_v14 = vld [vmem:[%s7460_s5 + $0x30] sm:$0xff]   ;;  %v6192_v1 = vld [vmem:[%s7460_s5 + $0x28] sm:$0xff]  }
 0x1ee   :  { %v5512_v41 = vpop.f32.mrf.mxu1  ;;  %v3644_v18 = vadd.f32 %v5449_v4, %v3547_v57 }
 0x1ef   :  { %v5513_v35 = vadd.f32 %v5512_v41, %v5511_v30  ;;  %5662 = vmatprep.mubr.bf16.mxu1 %v3842_v63  ;;  %v5451_v9 = vpop.f32.mrf.mxu0  ;;  %v3800_v45 = vmax.f32 %v3738_v53, 0.0  ;;  %v5397_v41 = vadd.f32 %v7303_v54, %v7297_v62  ;;  %v6193_v62 = vld [vmem:[%s7460_s5 + $0x20] sm:$0xff]  }
 0x1f0   :  { %v5514_v12 = vpop.f32.mrf.mxu1  ;;  %v5452_v17 = vadd.f32 %v5451_v9, %v5450_v21 }
 0x1f1   :  { %v3741_v27 = vadd.f32 %v5513_v35, %v3644_v18  ;;  %v5453_v60 = vpop.f32.mrf.mxu0 }
 0x1f2   :  { %v5515_v19 = vpop.f32.mrf.mxu1  ;;  %v3649_v26 = vadd.f32 %v5452_v17, %v7290_v33 }
 0x1f3   :  { %v3803_v38 = vmax.f32 %v3741_v27, 0.0  ;;  %v5454_v50 = vpop.f32.mrf.mxu0  ;;  %v5516_v3 = vadd.f32 %v5515_v19, %v5514_v12  ;;  %v3563_v12 = vadd.f32 %v5397_v41, %v3466_v42 }
 0x1f4   :  { %v5517_v37 = vpop.f32.mrf.mxu1  ;;  %v5455_v0 = vadd.f32 %v5454_v50, %v5453_v60 }
 0x1f5   :  { %v3845_v59 = vpack.c.bf16 %v3803_v38, %v3800_v45  ;;  %v3746_v46 = vadd.f32 %v5516_v3, %v3649_v26 }
 0x1f6   :  { %v5518_v16 = vpop.f32.mrf.mxu1  ;;  %v3652_v2 = vadd.f32 %v5455_v0, %v3555_v15  ;;  %v5403_v15 = vadd.f32 %v7314_v31, %v7308_v29 }
 0x1f7   :  { %v5519_v30 = vadd.f32 %v5518_v16, %v5517_v37  ;;  %5663 = vmatmul.mubr.bf16.vlgmr.msra.gmra.mxu1 %v3845_v59  ;;  %v3806_v63 = vmax.f32 %v3746_v46, 0.0  ;;  %v6194_v37 = vld [vmem:[%s7460_s5 + $0x18] sm:$0xff]  }
 0x1f8   :  { %5679 = vmatpush3.bf16.msra.mxu1 %v6190_v8  ;;  %v5339_v8 = vadd.f32 %v7310_v24, %v7305_v44 }
 0x1f9   :  { %v3749_v57 = vadd.f32 %v5519_v30, %v3652_v2  ;;  %5680 = vmatprep.subr.bf16.mxu1 %v6191_v14 }
 0x1fa   :  { %v3474_v44 = vadd.f32 %v5339_v8, %v7259_v6 }
 0x1fb   :  { %v5456_v47 = vpop.f32.mrf.mxu0  ;;  %v5520_v7 = vpop.f32.mrf.mxu1  ;;  %v3809_v21 = vmax.f32 %v3749_v57, 0.0 }
 0x1fc   :  { %5681 = vmatpush3.bf16.msra.mxu1 %v6191_v14  ;;  %v3571_v16 = vadd.f32 %v5403_v15, %v3474_v44  ;;  %v5357_v15 = vadd.f32 %v7343_v23, %v7338_v56  ;;  %v5421_v56 = vadd.f32 %v7349_v49, %v7341_v20  ;;  %v6195_v20 = vld [vmem:[%s7460_s5 + $0x10] sm:$0xff]   ;;  %v6197_v49 = vld [vmem:[%s7460_s5] sm:$0xff]  }
 0x1fd   :  { %v5457_v33 = vpop.f32.mrf.mxu0  ;;  %v5521_v55 = vpop.f32.mrf.mxu1  ;;  %v3848_v17 = vpack.c.bf16 %v3809_v21, %v3806_v63  ;;  %5682 = vmatprep.subr.bf16.mxu1 %v6192_v1 }
 0x1fe   :  { %v5458_v13 = vadd.f32 %v5457_v33, %v5456_v47  ;;  %v5522_v39 = vadd.f32 %v5521_v55, %v5520_v7  ;;  %v5345_v47 = vadd.f32 %v7321_v43, %v7316_v32  ;;  %v5409_v32 = vadd.f32 %v7325_v58, %v7319_v36 }
 0x1ff   :  { %v5459_v4 = vpop.f32.mrf.mxu0  ;;  %v5523_v18 = vpop.f32.mrf.mxu1  ;;  %5666 = vmatprep.mubr.bf16.mxu1 %v3848_v17 }
 0x200   :  { %v3657_v53 = vadd.f32 %v5458_v13, %v7301_v34  ;;  %5683 = vmatpush3.bf16.msra.mxu1 %v6192_v1 }
 0x201   :  { %v5460_v35 = vpop.f32.mrf.mxu0  ;;  %v5524_v27 = vpop.f32.mrf.mxu1  ;;  %5684 = vmatprep.subr.bf16.mxu1 %v6193_v62 }
 0x202   :  { %v5461_v9 = vadd.f32 %v5460_v35, %v5459_v4  ;;  %v3754_v19 = vadd.f32 %v5522_v39, %v3657_v53  ;;  %v5525_v34 = vadd.f32 %v5524_v27, %v5523_v18  ;;  %v5351_v18 = vadd.f32 %v7332_v28, %v7327_v5 }
 0x203   :  { %v5462_v54 = vpop.f32.mrf.mxu0  ;;  %v5526_v60 = vpop.f32.mrf.mxu1  ;;  %v5415_v5 = vadd.f32 %v7336_v25, %v7330_v51 }
 0x204   :  { %v3660_v61 = vadd.f32 %v5461_v9, %v3563_v12  ;;  %v3812_v10 = vmax.f32 %v3754_v19, 0.0  ;;  %5685 = vmatpush3.bf16.msra.mxu1 %v6193_v62  ;;  %v3490_v36 = vadd.f32 %v5351_v18, %v7259_v6 }
 0x205   :  { %v5463_v24 = vpop.f32.mrf.mxu0  ;;  %v5527_v26 = vpop.f32.mrf.mxu1  ;;  %5686 = vmatprep.subr.bf16.mxu1 %v6194_v37 }
 0x206   :  { %v3757_v45 = vadd.f32 %v5525_v34, %v3660_v61  ;;  %v5464_v38 = vadd.f32 %v5463_v24, %v5462_v54  ;;  %v5528_v2 = vadd.f32 %v5527_v26, %v5526_v60  ;;  %v3587_v26 = vadd.f32 %v5415_v5, %v3490_v36 }
 0x207   :  { %v5465_v50 = vpop.f32.mrf.mxu0  ;;  %v5529_v0 = vpop.f32.mrf.mxu1 }
 0x208   :  { %v3815_v59 = vmax.f32 %v3757_v45, 0.0  ;;  %v3665_v3 = vadd.f32 %v5464_v38, %v7312_v40  ;;  %5687 = vmatpush3.bf16.msra.mxu1 %v6194_v37  ;;  %v3482_v40 = vadd.f32 %v5345_v47, %v7259_v6 }
 0x209   :  { %v5466_v14 = vpop.f32.mrf.mxu0  ;;  %v5530_v7 = vpop.f32.mrf.mxu1  ;;  %5688 = vmatprep.subr.bf16.mxu1 %v6195_v20 }
 0x20a   :  { %v3851_v46 = vpack.c.bf16 %v3815_v59, %v3812_v10  ;;  %v5467_v30 = vadd.f32 %v5466_v14, %v5465_v50  ;;  %v3762_v42 = vadd.f32 %v5528_v2, %v3665_v3  ;;  %v5531_v31 = vadd.f32 %v5530_v7, %v5529_v0 }
 0x20b   :  { %v5468_v33 = vpop.f32.mrf.mxu0  ;;  %v5532_v57 = vpop.f32.mrf.mxu1  ;;  %v3579_v35 = vadd.f32 %v5409_v32, %v3482_v40 }
 0x20c   :  { %v3668_v29 = vadd.f32 %v5467_v30, %v3571_v16  ;;  %5667 = vmatmul.mubr.bf16.gmra.mxu1 %v3851_v46  ;;  %v3818_v43 = vmax.f32 %v3762_v42, 0.0  ;;  %v3498_v46 = vadd.f32 %v5357_v15, %v7259_v6 }
 0x20d   :  { %v5469_v13 = vpop.f32.mrf.mxu0  ;;  %v5533_v4 = vpop.f32.mrf.mxu1  ;;  %5689 = vmatpush3.bf16.msra.mxu1 %v6195_v20 }
 0x20e   :  { %v3765_v55 = vadd.f32 %v5531_v31, %v3668_v29  ;;  %v5470_v1 = vadd.f32 %v5469_v13, %v5468_v33  ;;  %v5534_v12 = vadd.f32 %v5533_v4, %v5532_v57  ;;  %v3595_v57 = vadd.f32 %v5421_v56, %v3498_v46 }
 0x20f   :  { %v5471_v41 = vpop.f32.mrf.mxu0  ;;  %v5535_v53 = vpop.f32.mrf.mxu1 }
 0x210   :  { %v3821_v63 = vmax.f32 %v3765_v55, 0.0  ;;  %v3673_v21 = vadd.f32 %v5470_v1, %v7323_v22 }
 0x211   :  { %v5472_v8 = vpop.f32.mrf.mxu0  ;;  %v5536_v9 = vpop.f32.mrf.mxu1 }
 0x212   :  { %v5473_v39 = vadd.f32 %v5472_v8, %v5471_v41  ;;  %v3854_v27 = vpack.c.bf16 %v3821_v63, %v3818_v43  ;;  %v3770_v62 = vadd.f32 %v5534_v12, %v3673_v21  ;;  %v5537_v19 = vadd.f32 %v5536_v9, %v5535_v53 }
 0x213   :  { %v5474_v17 = vpop.f32.mrf.mxu0  ;;  %v5538_v61 = vpop.f32.mrf.mxu1 }
 0x214   :  { %v3676_v54 = vadd.f32 %v5473_v39, %v3579_v35  ;;  %5670 = vmatprep.mubr.bf16.mxu1 %v3854_v27  ;;  %v3824_v44 = vmax.f32 %v3770_v62, 0.0 }
 0x215   :  { %v5475_v58 = vpop.f32.mrf.mxu0  ;;  %v5539_v60 = vpop.f32.mrf.mxu1 }
 0x216   :  { %v3773_v22 = vadd.f32 %v5537_v19, %v3676_v54  ;;  %v5476_v34 = vadd.f32 %v5475_v58, %v5474_v17  ;;  %v5540_v10 = vadd.f32 %v5539_v60, %v5538_v61 }
 0x217   :  { %v5477_v28 = vpop.f32.mrf.mxu0  ;;  %v5541_v38 = vpop.f32.mrf.mxu1 }
 0x218   :  { %v3827_v24 = vmax.f32 %v3773_v22, 0.0  ;;  %v3681_v45 = vadd.f32 %v5476_v34, %v7334_v11 }
 0x219   :  { %v5478_v37 = vpop.f32.mrf.mxu0  ;;  %v5542_v3 = vpop.f32.mrf.mxu1 }
 0x21a   :  { %v3857_v50 = vpack.c.bf16 %v3827_v24, %v3824_v44  ;;  %v5479_v59 = vadd.f32 %v5478_v37, %v5477_v28  ;;  %v3778_v16 = vadd.f32 %v5540_v10, %v3681_v45  ;;  %v5543_v47 = vadd.f32 %v5542_v3, %v5541_v38 }
 0x21b   :  { %v5480_v0 = vpop.f32.mrf.mxu0  ;;  %v5544_v51 = vpop.f32.mrf.mxu1 }
 0x21c   :  { %v3684_v14 = vadd.f32 %v5479_v59, %v3587_v26  ;;  %5671 = vmatmul.mubr.bf16.gmra.mxu1 %v3857_v50  ;;  %v3830_v23 = vmax.f32 %v3778_v16, 0.0  ;;  %v7428_v26 = vld [vmem:[%s7459_s4] ss:$0 sm:$0xff] }
 0x21d   :  { %v5481_v25 = vpop.f32.mrf.mxu0  ;;  %v5545_v30 = vpop.f32.mrf.mxu1 }
 0x21e   :  { %v3781_v11 = vadd.f32 %v5543_v47, %v3684_v14  ;;  %v5482_v2 = vadd.f32 %v5481_v25, %v5480_v0  ;;  %v5546_v13 = vadd.f32 %v5545_v30, %v5544_v51 }
 0x21f   :  { %v5483_v7 = vpop.f32.mrf.mxu0  ;;  %v5547_v29 = vpop.f32.mrf.mxu1 }
 0x220   :  { %v3833_v33 = vmax.f32 %v3781_v11, 0.0  ;;  %v3689_v42 = vadd.f32 %v5482_v2, %v7347_v52  ;;  %v6196_v52 = vld [vmem:[%s7460_s5 + $0x8] sm:$0xff]  }
 0x221   :  { %v5484_v31 = vpop.f32.mrf.mxu0  ;;  %v5548_v55 = vpop.f32.mrf.mxu1  ;;  %5690 = vmatprep.subr.bf16.mxu1 %v6196_v52 }
 0x222   :  { %v5485_v40 = vadd.f32 %v5484_v31, %v5483_v7  ;;  %v3860_v1 = vpack.c.bf16 %v3833_v33, %v3830_v23  ;;  %v3786_v4 = vadd.f32 %v5546_v13, %v3689_v42  ;;  %v5549_v41 = vadd.f32 %v5548_v55, %v5547_v29  ;;  %5691 = vmatpush3.bf16.msra.mxu1 %v6196_v52 }
 0x223   :  { %5692 = vmatprep.subr.bf16.mxu1 %v6197_v49 }
 0x224   :  { %v3692_v6 = vadd.f32 %v5485_v40, %v3595_v57  ;;  %5674 = vmatprep.mubr.bf16.mxu1 %v3860_v1  ;;  %v3836_v43 = vmax.f32 %v3786_v4, 0.0 }
 0x226   :  { %v3789_v32 = vadd.f32 %v5549_v41, %v3692_v6  ;;  %5693 = vmatpush3.bf16.msra.mxu1 %v6197_v49 }
 0x228   :  { %v3839_v63 = vmax.f32 %v3789_v32, 0.0 }
 0x22a   :  { %v3863_v21 = vpack.c.bf16 %v3839_v63, %v3836_v43 }
 0x22c   :  { %5675 = vmatmul.mubr.bf16.gmra.mxu1 %v3863_v21 }
 0x22e   :  { %v5566_v53 = vpop.f32.mrf.mxu0 }
 0x230   :  { %v5567_v18 = vpop.f32.mrf.mxu0 }
 0x231   :  { %v5568_v44 = vadd.f32 %v5567_v18, %v5566_v53 }
 0x232   :  { %v5569_v8 = vpop.f32.mrf.mxu0 }
 0x233   :  { %v4098_v10 = vadd.f32 %v5568_v44, %v7428_v26 }
 0x234   :  { %v5570_v35 = vpop.f32.mrf.mxu0 }
 0x235   :  { %v5571_v15 = vadd.f32 %v5570_v35, %v5569_v8 }
 0x236   :  { %v5572_v12 = vpop.f32.mrf.mxu0 }
 0x237   :  { %v4101_v51 = vadd.f32 %v5571_v15, %v7428_v26 }
 0x238   :  { %v5573_v39 = vpop.f32.mrf.mxu0 }
 0x239   :  { %v5574_v45 = vadd.f32 %v5573_v39, %v5572_v12 }
 0x23a   :  { %v5575_v9 = vpop.f32.mrf.mxu0 }
 0x23b   :  { %v4106_v0 = vadd.f32 %v5574_v45, %v7428_v26 }
 0x23c   :  { %v5576_v27 = vpop.f32.mrf.mxu0 }
 0x23d   :  { %v5577_v24 = vadd.f32 %v5576_v27, %v5575_v9 }
 0x23e   :  { %v5578_v17 = vpop.f32.mrf.mxu0 }
 0x23f   :  { %v4109_v59 = vadd.f32 %v5577_v24, %v7428_v26 }
 0x240   :  { %v5579_v62 = vpop.f32.mrf.mxu0 }
 0x241   :  { %v5580_v31 = vadd.f32 %v5579_v62, %v5578_v17 }
 0x242   :  { %v5581_v54 = vpop.f32.mrf.mxu0 }
 0x243   :  { %v4114_v6 = vadd.f32 %v5580_v31, %v7428_v26 }
 0x244   :  { %v5582_v19 = vpop.f32.mrf.mxu0 }
 0x245   :  { %v5583_v1 = vadd.f32 %v5582_v19, %v5581_v54 }
 0x246   :  { %v5584_v61 = vpop.f32.mrf.mxu0 }
 0x247   :  { %v4117_v52 = vadd.f32 %v5583_v1, %v7428_v26 }
 0x248   :  { %v5585_v36 = vpop.f32.mrf.mxu0 }
 0x249   :  { %v5586_v13 = vadd.f32 %v5585_v36, %v5584_v61 }
 0x24a   :  { %v5587_v58 = vpop.f32.mrf.mxu0 }
 0x24b   :  { %v4122_v43 = vadd.f32 %v5586_v13, %v7428_v26 }
 0x24c   :  { %v5588_v22 = vpop.f32.mrf.mxu0 }
 0x24d   :  { %v5589_v57 = vadd.f32 %v5588_v22, %v5587_v58 }
 0x24e   :  { %v5590_v34 = vpop.f32.mrf.mxu0 }
 0x24f   :  { %v4125_v41 = vadd.f32 %v5589_v57, %v7428_v26 }
 0x250   :  { %v5591_v60 = vpop.f32.mrf.mxu0 }
 0x251   :  { %v5592_v54 = vadd.f32 %v5591_v60, %v5590_v34 }
 0x252   :  { %v7421_v5 = vpop.f32.mrf.mxu0 }
 0x253   :  { %v4130_v24 = vadd.f32 %v5592_v54, %v7428_v26 }
 0x254   :  { %v7423_v28 = vpop.f32.mrf.mxu0 }
 0x255   :  { %v5595_v22 = vadd.f32 %v7423_v28, %v7421_v5 }
 0x256   :  { %v5596_v38 = vpop.f32.mrf.mxu0 }
 0x257   :  { %v4133_v34 = vadd.f32 %v5595_v22, %v7428_v26 }
 0x258   :  { %v5597_v3 = vpop.f32.mrf.mxu0 }
 0x259   :  { %v5598_v61 = vadd.f32 %v5597_v3, %v5596_v38 }
 0x25a   :  { %v5599_v2 = vpop.f32.mrf.mxu0 }
 0x25b   :  { %v4138_v15 = vadd.f32 %v5598_v61, %v7428_v26 }
 0x25c   :  { %v5600_v42 = vpop.f32.mrf.mxu0 }
 0x25d   :  { %v5601_v19 = vadd.f32 %v5600_v42, %v5599_v2 }
 0x25e   :  { %v5602_v40 = vpop.f32.mrf.mxu0 }
 0x25f   :  { %v4141_v45 = vadd.f32 %v5601_v19, %v7428_v26 }
 0x260   :  { %v5603_v32 = vpop.f32.mrf.mxu0 }
 0x262   :  { %v5605_v8 = vpop.f32.mrf.mxu0 }
 0x264   :  { %v5606_v17 = vpop.f32.mrf.mxu0 }
 0x266   :  { %v5608_v36 = vpop.f32.mrf.mxu0 }
 0x2b7   :  { %v5664_v37 = vpop.f32.mrf.mxu1 }
 0x2b8   :  { %v4203_v25 = vadd.f32 %v5664_v37, %v4106_v0  ;;  %v5609_v37 = vpop.f32.mrf.mxu0 }
 0x2b9   :  { %v4194_v50 = vpop.f32.mrf.mxu1  ;;  %v5610_v2 = vadd.f32 %v5609_v37, %v5608_v36 }
 0x2ba   :  { %v4195_v14 = vadd.f32 %v4194_v50, %v4098_v10  ;;  %v4259_v23 = vmax.f32 %v4203_v25, 0.0  ;;  %v5611_v0 = vpop.f32.mrf.mxu0 }
 0x2bb   :  { %v5665_v16 = vpop.f32.mrf.mxu1  ;;  %v4154_v42 = vadd.f32 %v5610_v2, %v7428_v26 }
 0x2bc   :  { %v4206_v47 = vadd.f32 %v5665_v16, %v4109_v59  ;;  %v4257_v7 = vmax.f32 %v4195_v14, 0.0 }
 0x2bd   :  { %v4197_v46 = vpop.f32.mrf.mxu1 }
 0x2be   :  { %v4198_v11 = vadd.f32 %v4197_v46, %v4101_v51  ;;  %v4260_v30 = vmax.f32 %v4206_v47, 0.0  ;;  %v5612_v51 = vpop.f32.mrf.mxu0  ;;  %v5604_v46 = vadd.f32 %v5603_v32, %v5602_v40 }
 0x2c0   :  { %v4258_v56 = vmax.f32 %v4198_v11, 0.0  ;;  %v4274_v29 = vpack.c.bf16 %v4260_v30, %v4259_v23  ;;  %v5613_v11 = vadd.f32 %v5612_v51, %v5611_v0  ;;  %v4146_v23 = vadd.f32 %v5604_v46, %v7428_v26 }
 0x2c2   :  { %v4273_v33 = vpack.c.bf16 %v4258_v56, %v4257_v7  ;;  %v5607_v7 = vadd.f32 %v5606_v17, %v5605_v8 }
 0x2c4   :  { %5694 = vmatprep.mubr.bf16.mxu1 %v4273_v33  ;;  %v4157_v33 = vadd.f32 %v5613_v11, %v7428_v26  ;;  %v4149_v13 = vadd.f32 %v5607_v7, %v7428_v26 }
 0x2c5   :  { %5695 = vmatmul.mubr.bf16.vlgmr.msra.gmra.mxu1 %v4274_v29 }
 0x2cc   :  { %v5668_v55 = vpop.f32.mrf.mxu1 }
 0x2cd   :  { %v4219_v49 = vadd.f32 %v5668_v55, %v4122_v43 }
 0x2ce   :  { %v4210_v4 = vpop.f32.mrf.mxu1 }
 0x2cf   :  { %v4211_v21 = vadd.f32 %v4210_v4, %v4114_v6  ;;  %v4263_v9 = vmax.f32 %v4219_v49, 0.0 }
 0x2d0   :  { %v5669_v63 = vpop.f32.mrf.mxu1 }
 0x2d1   :  { %v4222_v20 = vadd.f32 %v5669_v63, %v4125_v41  ;;  %v4261_v12 = vmax.f32 %v4211_v21, 0.0  ;;  %v6249_v21 = vmov 1966171168  }
 0x2d2   :  { %v4213_v53 = vpop.f32.mrf.mxu1 }
 0x2d3   :  { %v4214_v18 = vadd.f32 %v4213_v53, %v4117_v52  ;;  %v4264_v35 = vmax.f32 %v4222_v20, 0.0  ;;  %v4467_v20 = vunpack.c.l.s4 %v6249_v21  ;;  %v5245_v53 = vld [vmem:[%s7461_s6] ss:$0 sm:$0xff] }
 0x2d5   :  { %v4262_v39 = vmax.f32 %v4214_v18, 0.0  ;;  %v4276_v62 = vpack.c.bf16 %v4264_v35, %v4263_v9  ;;  %v4468_v49 = vunpack.c.0.s8 %v4467_v20 }
 0x2d7   :  { %v4275_v27 = vpack.c.bf16 %v4262_v39, %v4261_v12  ;;  %v4471_v8 = vsub.s32 %v4468_v49, %v6296_v48 }
 0x2d9   :  { %5698 = vmatprep.mubr.bf16.mxu1 %v4275_v27 }
 0x2da   :  { %5699 = vmatmul.mubr.bf16.gmra.mxu1 %v4276_v62 }
 0x2dc   :  { %v5672_v58 = vpop.f32.mrf.mxu1 }
 0x2dd   :  { %v4235_v60 = vadd.f32 %v5672_v58, %v4138_v15 }
 0x2de   :  { %v4226_v44 = vpop.f32.mrf.mxu1 }
 0x2df   :  { %v4227_v10 = vadd.f32 %v4226_v44, %v4130_v24  ;;  %v4267_v28 = vmax.f32 %v4235_v60, 0.0 }
 0x2e0   :  { %v5673_v50 = vpop.f32.mrf.mxu1 }
 0x2e1   :  { %v4238_v59 = vadd.f32 %v5673_v50, %v4141_v45  ;;  %v4265_v14 = vmax.f32 %v4227_v10, 0.0 }
 0x2e2   :  { %v4229_v38 = vpop.f32.mrf.mxu1 }
 0x2e3   :  { %v4230_v3 = vadd.f32 %v4229_v38, %v4133_v34  ;;  %v4268_v16 = vmax.f32 %v4238_v59, 0.0 }
 0x2e5   :  { %v4266_v5 = vmax.f32 %v4230_v3, 0.0  ;;  %v4278_v25 = vpack.c.bf16 %v4268_v16, %v4267_v28 }
 0x2e7   :  { %v4277_v47 = vpack.c.bf16 %v4266_v5, %v4265_v14 }
 0x2e9   :  { %5702 = vmatprep.mubr.bf16.mxu1 %v4277_v47 }
 0x2ea   :  { %5703 = vmatmul.mubr.bf16.gmra.mxu1 %v4278_v25 }
 0x2ec   :  { %v5676_v30 = vpop.f32.mrf.mxu1 }
 0x2ed   :  { %v4251_v55 = vadd.f32 %v5676_v30, %v4154_v42 }
 0x2ee   :  { %v4242_v56 = vpop.f32.mrf.mxu1 }
 0x2ef   :  { %v4243_v31 = vadd.f32 %v4242_v56, %v4146_v23  ;;  %v4271_v32 = vmax.f32 %v4251_v55, 0.0 }
 0x2f0   :  { %v5677_v29 = vpop.f32.mrf.mxu1 }
 0x2f1   :  { %v4254_v57 = vadd.f32 %v5677_v29, %v4157_v33  ;;  %v4269_v6 = vmax.f32 %v4243_v31, 0.0 }
 0x2f2   :  { %v4245_v1 = vpop.f32.mrf.mxu1 }
 0x2f3   :  { %v4246_v4 = vadd.f32 %v4245_v1, %v4149_v13  ;;  %v4272_v40 = vmax.f32 %v4254_v57, 0.0 }
 0x2f5   :  { %v4270_v41 = vmax.f32 %v4246_v4, 0.0  ;;  %v4280_v63 = vpack.c.bf16 %v4272_v40, %v4271_v32 }
 0x2f7   :  { %v4279_v43 = vpack.c.bf16 %v4270_v41, %v4269_v6 }
 0x2f9   :  { %5706 = vmatprep.mubr.bf16.mxu1 %v4279_v43 }
 0x2fa   :  { %5707 = vmatmul.mubr.bf16.gmra.mxu1 %v4280_v63 }
 0x385   :  { %v5696_v52 = vpop.f32.mrf.mxu1 }
 0x387   :  { %v4386_v26 = vpop.f32.mrf.mxu1 }
 0x388   :  { %v4387_v12 = vadd.f32 %v5245_v53, %v4386_v26 }
 0x389   :  { %v5697_v18 = vpop.f32.mrf.mxu1 }
 0x38b   :  { %v4389_v35 = vpop.f32.mrf.mxu1 }
 0x38c   :  { %v4390_v39 = vadd.f32 %v5245_v53, %v4389_v35 }
 0x38e   :  { %v4449_v9 = vpack.c.bf16 %v4390_v39, %v4387_v12 }
 0x390   :  { %v4472_v27 = vrot.slane %v4449_v9, %v4471_v8 }
 0x392   :  { %5262 = vst.sshfl [vmem:[#allocation6] sm:$0x1 pattern:$0x73625140] %v4472_v27 }
 0x399   :  { %v5003_v19 = vld [vmem:[#allocation6] sm:$0x1] }
 0x39a   :  { %v5700_v17 = vpop.f32.mrf.mxu1  ;;  %5004 = vst [vmem:[%s7462_s7] sm:$0x1] %v5003_v19 }
 0x39c   :  { %v4402_v62 = vpop.f32.mrf.mxu1 }
 0x39e   :  { %v5701_v54 = vpop.f32.mrf.mxu1 }
 0x3a0   :  { %v4405_v61 = vpop.f32.mrf.mxu1 }
 0x3aa   :  { %v5704_v36 = vpop.f32.mrf.mxu1 }
 0x3ac   :  { %v4418_v58 = vpop.f32.mrf.mxu1 }
 0x3ae   :  { %v5705_v22 = vpop.f32.mrf.mxu1 }
 0x3b0   :  { %v4421_v44 = vpop.f32.mrf.mxu1 }
 0x3ba   :  { %v5708_v48 = vpop.f32.mrf.mxu1 }
 0x3bc   :  { %v4434_v24 = vpop.f32.mrf.mxu1 }
 0x3be   :  { %v5709_v45 = vpop.f32.mrf.mxu1 }
 0x3c0   :  { %v4437_v37 = vpop.f32.mrf.mxu1 }
 0x3c1   :  { %5022 = vsyncpa [#allocation3], 1 }
 0x3c2   :  { %5023 = vsyncpa [#allocation5], 1 }

</bundles_post_ra>
